<compile_context>
chip_gen: v7x
topology: tpu7x:2x2x1
jax: 0.10.0
libtpu: 0.0.40
codegen_flags: <defaults>
</compile_context>

<pallas_src>
import jax
import jax.numpy as jnp
from jax.experimental import pallas as pl
from jax.experimental.pallas import tpu as pltpu

MXU_DTYPE = jnp.bfloat16   # MXU operand precision; accumulation is fp32 everywhere
BN_EPS = 1e-5


def _round_up(x, m):
    return (x + m - 1) // m * m


# ---------------------------------------------------------------------------
# Trilinear x2 upsample, align_corners=True (layout glue in plain JAX/XLA).
# TODO(synk): fold the upsample gather into the conv kernel's input path via
# scalar-prefetched index/weight tables to avoid materializing the 8x tensor.
# ---------------------------------------------------------------------------
def _linear_interp_axis(x, axis, out_size):
    in_size = x.shape[axis]
    if in_size == 1:
        return jnp.take(x, jnp.zeros((out_size,), jnp.int32), axis=axis)
    pos = jnp.arange(out_size, dtype=jnp.float32) * (in_size - 1) / (out_size - 1)
    lo = jnp.clip(jnp.floor(pos).astype(jnp.int32), 0, in_size - 2)
    w = pos - lo.astype(jnp.float32)
    x_lo = jnp.take(x, lo, axis=axis)
    x_hi = jnp.take(x, lo + 1, axis=axis)
    bshape = [1] * x.ndim
    bshape[axis] = out_size
    w = w.reshape(bshape)
    return x_lo * (1.0 - w) + x_hi * w


def _upsample_trilinear_x2(x_ncdhw):
    _, _, d, h, w = x_ncdhw.shape
    y = _linear_interp_axis(x_ncdhw, 2, 2 * d)
    y = _linear_interp_axis(y, 3, 2 * h)
    y = _linear_interp_axis(y, 4, 2 * w)
    return y


# ---------------------------------------------------------------------------
# Pass 1: Conv3d (27-tap in-kernel accumulation, bf16 MXU / fp32 acc) + bias,
#         plus per-tile masked sum / sum-of-squares for BatchNorm statistics.
# ---------------------------------------------------------------------------
def _make_conv_stats_kernel(m_rows, row_stride, cout_p):
    def kernel(mask_ref, x0_ref, x1_ref, x2_ref, w_ref, b_ref, conv_ref, stats_ref):
        x_refs = (x0_ref, x1_ref, x2_ref)          # depth taps kd = 0, 1, 2
        acc = jnp.zeros((m_rows, cout_p), jnp.float32)
        for kd in range(3):
            for kh in range(3):
                for kw in range(3):
                    off = kh * row_stride + kw     # static offset in flattened (H,W)
                    lhs = x_refs[kd][off:off + m_rows, :]       # (m_rows, Cin) bf16
                    rhs = w_ref[kd * 9 + kh * 3 + kw]           # (Cin, Cout_p) bf16
                    acc = acc + jnp.dot(lhs, rhs, preferred_element_type=jnp.float32)
        conv = acc + b_ref[...]                                 # fp32 bias
        conv_ref[...] = conv
        # BN partial stats; mask drops the pad-stripe "junk" rows of the flat layout
        mask = mask_ref[...]                                    # (m_rows, 1) in {0,1}
        masked = conv * mask
        stats_ref[0:1, :] = jnp.sum(masked, axis=0, keepdims=True)          # sum(x)
        stats_ref[1:2, :] = jnp.sum(masked * conv, axis=0, keepdims=True)   # sum(x^2)
    return kernel


# ---------------------------------------------------------------------------
# Pass 2: fused BatchNorm affine (precomputed scale/shift) + ReLU, lane-dense.
# ---------------------------------------------------------------------------
def _bn_relu_kernel(conv_ref, scale_ref, shift_ref, o_ref):
    o_ref[...] = jnp.maximum(conv_ref[...] * scale_ref[...] + shift_ref[...], 0.0)


@jax.jit
def up_conv_forward(x_ncdhw, conv_w, conv_b, bn_gamma, bn_beta):
    """up_conv forward.  x: (N, Cin, D, H, W) -> (N, Cout, 2D, 2H, 2W) fp32."""
    n, cin, d, h, w = x_ncdhw.shape
    cout = conv_w.shape[0]
    d2, h2, w2 = 2 * d, 2 * h, 2 * w
    cout_p = _round_up(cout, 128)          # lane-dense output channels
    s = w2 + 2                             # padded row stride of the flat (H,W) layout
    m_rows = h2 * s                        # rows per (n, depth) tile (incl. junk columns)
    flat = (h2 + 2) * s
    flat_pad = _round_up(flat + 2, 8)      # +2 headroom for the last tap's over-read

    # --- upsample + layout glue (plain JAX); bf16 to halve HBM traffic of the 8x tensor
    x_up = _upsample_trilinear_x2(x_ncdhw.astype(jnp.float32)).astype(MXU_DTYPE)
    x_cl = jnp.transpose(x_up, (0, 2, 3, 4, 1))                       # (N, D2, H2, W2, Cin)
    x_pd = jnp.pad(x_cl, ((0, 0), (1, 1), (1, 1), (1, 1), (0, 0)))    # conv zero pad = 1
    x_fl = x_pd.reshape(n, d2 + 2, flat, cin)                         # flatten (H, W) w/ pad stride
    x_fl = jnp.pad(x_fl, ((0, 0), (0, 0), (0, flat_pad - flat), (0, 0)))

    # --- weights / bias: (kd,kh,kw,Cin,Cout) taps, zero-padded to Cout_p, bf16 operands
    w_taps = jnp.transpose(conv_w.astype(jnp.float32), (2, 3, 4, 1, 0)).reshape(27, cin, cout)
    w_taps = jnp.pad(w_taps, ((0, 0), (0, 0), (0, cout_p - cout))).astype(MXU_DTYPE)
    b_row = jnp.pad(conv_b.astype(jnp.float32).reshape(1, cout), ((0, 0), (0, cout_p - cout)))

    # rows whose flat column index falls in the pad stripe are junk -> exclude from BN stats
    col = jnp.arange(m_rows, dtype=jnp.int32) % s
    mask = (col < w2).astype(jnp.float32).reshape(m_rows, 1)

    def x_tap_spec(kd):
        return pl.BlockSpec((None, None, flat_pad, cin),
                            lambda ni, di: (ni, di + kd, 0, 0))

    conv_spec = pl.BlockSpec((None, None, m_rows, cout_p), lambda ni, di: (ni, di, 0, 0))

    flops = 2 * n * d2 * 27 * m_rows * cin * cout_p
    bytes_accessed = (3 * n * d2 * flat_pad * cin * 2      # activation taps (bf16, read 3x)
                      + 27 * cin * cout_p * 2              # weights
                      + n * d2 * m_rows * cout_p * 4       # conv output (fp32)
                      + n * d2 * 2 * cout_p * 4)           # partial stats

    compiler_params = pltpu.CompilerParams(
        dimension_semantics=("parallel", "parallel"),
        # re-derive per generation: v7x has 64 MiB physical VMEM (32 MiB default scoped)
        vmem_limit_bytes=32 * 1024 * 1024,
    )

    conv_out, stats = pl.pallas_call(
        _make_conv_stats_kernel(m_rows, s, cout_p),
        grid=(n, d2),
        in_specs=[
            pl.BlockSpec((m_rows, 1), lambda ni, di: (0, 0)),            # mask    (resident)
            x_tap_spec(0), x_tap_spec(1), x_tap_spec(2),                 # depth taps
            pl.BlockSpec((27, cin, cout_p), lambda ni, di: (0, 0, 0)),   # weights (resident)
            pl.BlockSpec((1, cout_p), lambda ni, di: (0, 0)),            # bias    (resident)
        ],
        out_specs=[
            conv_spec,
            pl.BlockSpec((None, None, 2, cout_p), lambda ni, di: (ni, di, 0, 0)),
        ],
        out_shape=[
            jax.ShapeDtypeStruct((n, d2, m_rows, cout_p), jnp.float32),
            jax.ShapeDtypeStruct((n, d2, 2, cout_p), jnp.float32),
        ],
        compiler_params=compiler_params,
        cost_estimate=pl.CostEstimate(flops=flops, transcendentals=0,
                                      bytes_accessed=bytes_accessed),
    )(mask, x_fl, x_fl, x_fl, w_taps, b_row)

    # --- exact batch statistics from per-tile partial sums (tiny JAX reduction) ---
    count = float(n * d2 * h2 * w2)
    s1 = jnp.sum(stats[:, :, 0, :], axis=(0, 1))
    s2 = jnp.sum(stats[:, :, 1, :], axis=(0, 1))
    mean = s1 / count
    var = jnp.maximum(s2 / count - mean * mean, 0.0)   # biased var, as PyTorch BN normalization
    gamma_p = jnp.pad(bn_gamma.astype(jnp.float32), (0, cout_p - cout))
    beta_p = jnp.pad(bn_beta.astype(jnp.float32), (0, cout_p - cout))
    scale_v = gamma_p * jax.lax.rsqrt(var + BN_EPS)
    shift_v = beta_p - mean * scale_v
    scale = scale_v.reshape(1, cout_p)
    shift = shift_v.reshape(1, cout_p)

    y = pl.pallas_call(
        _bn_relu_kernel,
        grid=(n, d2),
        in_specs=[conv_spec,
                  pl.BlockSpec((1, cout_p), lambda ni, di: (0, 0)),
                  pl.BlockSpec((1, cout_p), lambda ni, di: (0, 0))],
        out_specs=conv_spec,
        out_shape=jax.ShapeDtypeStruct((n, d2, m_rows, cout_p), jnp.float32),
        compiler_params=compiler_params,
    )(conv_out, scale, shift)

    # drop pad-stripe junk rows / padded channels, back to NCDHW
    y = y.reshape(n, d2, h2, s, cout_p)[:, :, :, :w2, :cout]
    # TODO(synk): skip this transpose if the downstream consumer accepts channels-last.
    return jnp.transpose(y, (0, 4, 1, 2, 3))


def _reference(x, conv_w, conv_b, gamma, beta):
    """Pure-JAX reference with the same MXU operand rounding (bf16 in, fp32 accum)."""
    x_up = _upsample_trilinear_x2(x.astype(jnp.float32))
    x_up = x_up.astype(MXU_DTYPE).astype(jnp.float32)
    w_r = conv_w.astype(jnp.float32).astype(MXU_DTYPE).astype(jnp.float32)
    conv = jax.lax.conv_general_dilated(
        x_up, w_r, window_strides=(1, 1, 1),
        padding=((1, 1), (1, 1), (1, 1)),
        dimension_numbers=('NCDHW', 'OIDHW', 'NCDHW'),
        precision=jax.lax.Precision.HIGHEST)
    conv = conv + conv_b.astype(jnp.float32).reshape(1, -1, 1, 1, 1)
    mean = conv.mean(axis=(0, 2, 3, 4), keepdims=True)
    var = conv.var(axis=(0, 2, 3, 4), keepdims=True)
    yn = (conv - mean) * jax.lax.rsqrt(var + BN_EPS)
    yn = yn * gamma.astype(jnp.float32).reshape(1, -1, 1, 1, 1) \
        + beta.astype(jnp.float32).reshape(1, -1, 1, 1, 1)
    return jnp.maximum(yn, 0.0)


if __name__ == "__main__":
    key = jax.random.PRNGKey(0)
    kx, kw, kb, kg, kbe = jax.random.split(key, 5)

    N, Cin, Cout, D, H, W = 2, 4, 8, 8, 8, 8
    x = jax.random.normal(kx, (N, Cin, D, H, W), jnp.float32)

    # deterministic synthetic parameters (shapes from Conv3d / BatchNorm3d __init__)
    fan_in = Cin * 3 * 3 * 3
    conv_w = jax.random.normal(kw, (Cout, Cin, 3, 3, 3), jnp.float32) / jnp.sqrt(fan_in)
    conv_b = 0.1 * jax.random.normal(kb, (Cout,), jnp.float32)
    bn_gamma = 1.0 + 0.1 * jax.random.normal(kg, (Cout,), jnp.float32)
    bn_beta = 0.1 * jax.random.normal(kbe, (Cout,), jnp.float32)

    out = jax.block_until_ready(up_conv_forward(x, conv_w, conv_b, bn_gamma, bn_beta))
    assert out.shape == (N, Cout, 2 * D, 2 * H, 2 * W), out.shape

    ref = _reference(x, conv_w, conv_b, bn_gamma, bn_beta)
    if not jnp.allclose(out, ref, atol=2e-3, rtol=2e-3):
        err = float(jnp.max(jnp.abs(out - ref)))
        raise AssertionError(f"Pallas kernel output does not match JAX reference (max|err|={err})")

    print("KERNEL_OK")
</pallas_src>

<mosaic_0001>
module attributes {stable_mosaic.version = 11 : i64} {
  func.func @kernel(%arg0: i32, %arg1: i32, %arg2: memref<288x1xf32, #tpu.memory_space<vmem>>, %arg3: memref<1x1x328x4xbf16, #tpu.memory_space<vmem>>, %arg4: memref<1x1x328x4xbf16, #tpu.memory_space<vmem>>, %arg5: memref<1x1x328x4xbf16, #tpu.memory_space<vmem>>, %arg6: memref<27x4x128xbf16, #tpu.memory_space<vmem>>, %arg7: memref<1x128xf32, #tpu.memory_space<vmem>>, %arg8: memref<1x1x288x128xf32, #tpu.memory_space<vmem>>, %arg9: memref<1x1x2x128xf32, #tpu.memory_space<vmem>>) attributes {dimension_semantics = [#tpu.dimension_semantics<parallel>, #tpu.dimension_semantics<parallel>], iteration_bounds = array<i64: 2, 16>, scalar_prefetch = 0 : i64, scratch_operands = 0 : i64, tpu.core_type = #tpu.core_type<tc>, window_params = [{pipeline_mode = #tpu.pipeline_mode<synchronous>, transform_indices = @transform_0, window_bounds = array<i64: 288, 1>}, {transform_indices = @transform_1, window_bounds = array<i64: 1, 1, 328, 4>}, {transform_indices = @transform_2, window_bounds = array<i64: 1, 1, 328, 4>}, {transform_indices = @transform_3, window_bounds = array<i64: 1, 1, 328, 4>}, {pipeline_mode = #tpu.pipeline_mode<synchronous>, transform_indices = @transform_4, window_bounds = array<i64: 27, 4, 128>}, {pipeline_mode = #tpu.pipeline_mode<synchronous>, transform_indices = @transform_5, window_bounds = array<i64: 1, 128>}, {transform_indices = @transform_6, window_bounds = array<i64: 1, 1, 288, 128>}, {transform_indices = @transform_7, window_bounds = array<i64: 1, 1, 2, 128>}]} {
    %cst = arith.constant 0.000000e+00 : f32
    %0 = vector.broadcast %cst : f32 to vector<288x128xf32>
    %c0 = arith.constant 0 : index
    %c0_0 = arith.constant 0 : index
    %c0_1 = arith.constant 0 : index
    %c0_2 = arith.constant 0 : index
    %1 = vector.load %arg3[%c0, %c0_0, %c0_1, %c0_2] : memref<1x1x328x4xbf16, #tpu.memory_space<vmem>>, vector<1x1x288x4xbf16>
    %2 = vector.shape_cast %1 : vector<1x1x288x4xbf16> to vector<288x4xbf16>
    %c0_3 = arith.constant 0 : index
    %c0_4 = arith.constant 0 : index
    %c0_5 = arith.constant 0 : index
    %3 = vector.load %arg6[%c0_3, %c0_4, %c0_5] : memref<27x4x128xbf16, #tpu.memory_space<vmem>>, vector<1x4x128xbf16>
    %4 = vector.shape_cast %3 : vector<1x4x128xbf16> to vector<4x128xbf16>
    %cst_6 = arith.constant dense<0.000000e+00> : vector<288x128xf32>
    %5 = tpu.matmul %2, %4, %cst_6 {dimension_numbers = #tpu.dot_dimension_numbers<[1], [0], [0], [1], [0, 0, 1, 1], [], []>} : vector<288x4xbf16>, vector<4x128xbf16>, vector<288x128xf32> -> vector<288x128xf32>
    %6 = arith.addf %0, %5 : vector<288x128xf32>
    %c0_7 = arith.constant 0 : index
    %c0_8 = arith.constant 0 : index
    %c1 = arith.constant 1 : index
    %c0_9 = arith.constant 0 : index
    %7 = vector.load %arg3[%c0_7, %c0_8, %c1, %c0_9] : memref<1x1x328x4xbf16, #tpu.memory_space<vmem>>, vector<1x1x288x4xbf16>
    %8 = vector.shape_cast %7 : vector<1x1x288x4xbf16> to vector<288x4xbf16>
    %c1_10 = arith.constant 1 : index
    %c0_11 = arith.constant 0 : index
    %c0_12 = arith.constant 0 : index
    %9 = vector.load %arg6[%c1_10, %c0_11, %c0_12] : memref<27x4x128xbf16, #tpu.memory_space<vmem>>, vector<1x4x128xbf16>
    %10 = vector.shape_cast %9 : vector<1x4x128xbf16> to vector<4x128xbf16>
    %cst_13 = arith.constant dense<0.000000e+00> : vector<288x128xf32>
    %11 = tpu.matmul %8, %10, %cst_13 {dimension_numbers = #tpu.dot_dimension_numbers<[1], [0], [0], [1], [0, 0, 1, 1], [], []>} : vector<288x4xbf16>, vector<4x128xbf16>, vector<288x128xf32> -> vector<288x128xf32>
    %12 = arith.addf %6, %11 : vector<288x128xf32>
    %c0_14 = arith.constant 0 : index
    %c0_15 = arith.constant 0 : index
    %c2 = arith.constant 2 : index
    %c0_16 = arith.constant 0 : index
    %13 = vector.load %arg3[%c0_14, %c0_15, %c2, %c0_16] : memref<1x1x328x4xbf16, #tpu.memory_space<vmem>>, vector<1x1x288x4xbf16>
    %14 = vector.shape_cast %13 : vector<1x1x288x4xbf16> to vector<288x4xbf16>
    %c2_17 = arith.constant 2 : index
    %c0_18 = arith.constant 0 : index
    %c0_19 = arith.constant 0 : index
    %15 = vector.load %arg6[%c2_17, %c0_18, %c0_19] : memref<27x4x128xbf16, #tpu.memory_space<vmem>>, vector<1x4x128xbf16>
    %16 = vector.shape_cast %15 : vector<1x4x128xbf16> to vector<4x128xbf16>
    %cst_20 = arith.constant dense<0.000000e+00> : vector<288x128xf32>
    %17 = tpu.matmul %14, %16, %cst_20 {dimension_numbers = #tpu.dot_dimension_numbers<[1], [0], [0], [1], [0, 0, 1, 1], [], []>} : vector<288x4xbf16>, vector<4x128xbf16>, vector<288x128xf32> -> vector<288x128xf32>
    %18 = arith.addf %12, %17 : vector<288x128xf32>
    %c0_21 = arith.constant 0 : index
    %c0_22 = arith.constant 0 : index
    %c18 = arith.constant 18 : index
    %c0_23 = arith.constant 0 : index
    %19 = vector.load %arg3[%c0_21, %c0_22, %c18, %c0_23] : memref<1x1x328x4xbf16, #tpu.memory_space<vmem>>, vector<1x1x288x4xbf16>
    %20 = vector.shape_cast %19 : vector<1x1x288x4xbf16> to vector<288x4xbf16>
    %c3 = arith.constant 3 : index
    %c0_24 = arith.constant 0 : index
    %c0_25 = arith.constant 0 : index
    %21 = vector.load %arg6[%c3, %c0_24, %c0_25] : memref<27x4x128xbf16, #tpu.memory_space<vmem>>, vector<1x4x128xbf16>
    %22 = vector.shape_cast %21 : vector<1x4x128xbf16> to vector<4x128xbf16>
    %cst_26 = arith.constant dense<0.000000e+00> : vector<288x128xf32>
    %23 = tpu.matmul %20, %22, %cst_26 {dimension_numbers = #tpu.dot_dimension_numbers<[1], [0], [0], [1], [0, 0, 1, 1], [], []>} : vector<288x4xbf16>, vector<4x128xbf16>, vector<288x128xf32> -> vector<288x128xf32>
    %24 = arith.addf %18, %23 : vector<288x128xf32>
    %c0_27 = arith.constant 0 : index
    %c0_28 = arith.constant 0 : index
    %c19 = arith.constant 19 : index
    %c0_29 = arith.constant 0 : index
    %25 = vector.load %arg3[%c0_27, %c0_28, %c19, %c0_29] : memref<1x1x328x4xbf16, #tpu.memory_space<vmem>>, vector<1x1x288x4xbf16>
    %26 = vector.shape_cast %25 : vector<1x1x288x4xbf16> to vector<288x4xbf16>
    %c4 = arith.constant 4 : index
    %c0_30 = arith.constant 0 : index
    %c0_31 = arith.constant 0 : index
    %27 = vector.load %arg6[%c4, %c0_30, %c0_31] : memref<27x4x128xbf16, #tpu.memory_space<vmem>>, vector<1x4x128xbf16>
    %28 = vector.shape_cast %27 : vector<1x4x128xbf16> to vector<4x128xbf16>
    %cst_32 = arith.constant dense<0.000000e+00> : vector<288x128xf32>
    %29 = tpu.matmul %26, %28, %cst_32 {dimension_numbers = #tpu.dot_dimension_numbers<[1], [0], [0], [1], [0, 0, 1, 1], [], []>} : vector<288x4xbf16>, vector<4x128xbf16>, vector<288x128xf32> -> vector<288x128xf32>
    %30 = arith.addf %24, %29 : vector<288x128xf32>
    %c0_33 = arith.constant 0 : index
    %c0_34 = arith.constant 0 : index
    %c20 = arith.constant 20 : index
    %c0_35 = arith.constant 0 : index
    %31 = vector.load %arg3[%c0_33, %c0_34, %c20, %c0_35] : memref<1x1x328x4xbf16, #tpu.memory_space<vmem>>, vector<1x1x288x4xbf16>
    %32 = vector.shape_cast %31 : vector<1x1x288x4xbf16> to vector<288x4xbf16>
    %c5 = arith.constant 5 : index
    %c0_36 = arith.constant 0 : index
    %c0_37 = arith.constant 0 : index
    %33 = vector.load %arg6[%c5, %c0_36, %c0_37] : memref<27x4x128xbf16, #tpu.memory_space<vmem>>, vector<1x4x128xbf16>
    %34 = vector.shape_cast %33 : vector<1x4x128xbf16> to vector<4x128xbf16>
    %cst_38 = arith.constant dense<0.000000e+00> : vector<288x128xf32>
    %35 = tpu.matmul %32, %34, %cst_38 {dimension_numbers = #tpu.dot_dimension_numbers<[1], [0], [0], [1], [0, 0, 1, 1], [], []>} : vector<288x4xbf16>, vector<4x128xbf16>, vector<288x128xf32> -> vector<288x128xf32>
    %36 = arith.addf %30, %35 : vector<288x128xf32>
    %c0_39 = arith.constant 0 : index
    %c0_40 = arith.constant 0 : index
    %c36 = arith.constant 36 : index
    %c0_41 = arith.constant 0 : index
    %37 = vector.load %arg3[%c0_39, %c0_40, %c36, %c0_41] : memref<1x1x328x4xbf16, #tpu.memory_space<vmem>>, vector<1x1x288x4xbf16>
    %38 = vector.shape_cast %37 : vector<1x1x288x4xbf16> to vector<288x4xbf16>
    %c6 = arith.constant 6 : index
    %c0_42 = arith.constant 0 : index
    %c0_43 = arith.constant 0 : index
    %39 = vector.load %arg6[%c6, %c0_42, %c0_43] : memref<27x4x128xbf16, #tpu.memory_space<vmem>>, vector<1x4x128xbf16>
    %40 = vector.shape_cast %39 : vector<1x4x128xbf16> to vector<4x128xbf16>
    %cst_44 = arith.constant dense<0.000000e+00> : vector<288x128xf32>
    %41 = tpu.matmul %38, %40, %cst_44 {dimension_numbers = #tpu.dot_dimension_numbers<[1], [0], [0], [1], [0, 0, 1, 1], [], []>} : vector<288x4xbf16>, vector<4x128xbf16>, vector<288x128xf32> -> vector<288x128xf32>
    %42 = arith.addf %36, %41 : vector<288x128xf32>
    %c0_45 = arith.constant 0 : index
    %c0_46 = arith.constant 0 : index
    %c37 = arith.constant 37 : index
    %c0_47 = arith.constant 0 : index
    %43 = vector.load %arg3[%c0_45, %c0_46, %c37, %c0_47] : memref<1x1x328x4xbf16, #tpu.memory_space<vmem>>, vector<1x1x288x4xbf16>
    %44 = vector.shape_cast %43 : vector<1x1x288x4xbf16> to vector<288x4xbf16>
    %c7 = arith.constant 7 : index
    %c0_48 = arith.constant 0 : index
    %c0_49 = arith.constant 0 : index
    %45 = vector.load %arg6[%c7, %c0_48, %c0_49] : memref<27x4x128xbf16, #tpu.memory_space<vmem>>, vector<1x4x128xbf16>
    %46 = vector.shape_cast %45 : vector<1x4x128xbf16> to vector<4x128xbf16>
    %cst_50 = arith.constant dense<0.000000e+00> : vector<288x128xf32>
    %47 = tpu.matmul %44, %46, %cst_50 {dimension_numbers = #tpu.dot_dimension_numbers<[1], [0], [0], [1], [0, 0, 1, 1], [], []>} : vector<288x4xbf16>, vector<4x128xbf16>, vector<288x128xf32> -> vector<288x128xf32>
    %48 = arith.addf %42, %47 : vector<288x128xf32>
    %c0_51 = arith.constant 0 : index
    %c0_52 = arith.constant 0 : index
    %c38 = arith.constant 38 : index
    %c0_53 = arith.constant 0 : index
    %49 = vector.load %arg3[%c0_51, %c0_52, %c38, %c0_53] : memref<1x1x328x4xbf16, #tpu.memory_space<vmem>>, vector<1x1x288x4xbf16>
    %50 = vector.shape_cast %49 : vector<1x1x288x4xbf16> to vector<288x4xbf16>
    %c8 = arith.constant 8 : index
    %c0_54 = arith.constant 0 : index
    %c0_55 = arith.constant 0 : index
    %51 = vector.load %arg6[%c8, %c0_54, %c0_55] : memref<27x4x128xbf16, #tpu.memory_space<vmem>>, vector<1x4x128xbf16>
    %52 = vector.shape_cast %51 : vector<1x4x128xbf16> to vector<4x128xbf16>
    %cst_56 = arith.constant dense<0.000000e+00> : vector<288x128xf32>
    %53 = tpu.matmul %50, %52, %cst_56 {dimension_numbers = #tpu.dot_dimension_numbers<[1], [0], [0], [1], [0, 0, 1, 1], [], []>} : vector<288x4xbf16>, vector<4x128xbf16>, vector<288x128xf32> -> vector<288x128xf32>
    %54 = arith.addf %48, %53 : vector<288x128xf32>
    %c0_57 = arith.constant 0 : index
    %c0_58 = arith.constant 0 : index
    %c0_59 = arith.constant 0 : index
    %c0_60 = arith.constant 0 : index
    %55 = vector.load %arg4[%c0_57, %c0_58, %c0_59, %c0_60] : memref<1x1x328x4xbf16, #tpu.memory_space<vmem>>, vector<1x1x288x4xbf16>
    %56 = vector.shape_cast %55 : vector<1x1x288x4xbf16> to vector<288x4xbf16>
    %c9 = arith.constant 9 : index
    %c0_61 = arith.constant 0 : index
    %c0_62 = arith.constant 0 : index
    %57 = vector.load %arg6[%c9, %c0_61, %c0_62] : memref<27x4x128xbf16, #tpu.memory_space<vmem>>, vector<1x4x128xbf16>
    %58 = vector.shape_cast %57 : vector<1x4x128xbf16> to vector<4x128xbf16>
    %cst_63 = arith.constant dense<0.000000e+00> : vector<288x128xf32>
    %59 = tpu.matmul %56, %58, %cst_63 {dimension_numbers = #tpu.dot_dimension_numbers<[1], [0], [0], [1], [0, 0, 1, 1], [], []>} : vector<288x4xbf16>, vector<4x128xbf16>, vector<288x128xf32> -> vector<288x128xf32>
    %60 = arith.addf %54, %59 : vector<288x128xf32>
    %c0_64 = arith.constant 0 : index
    %c0_65 = arith.constant 0 : index
    %c1_66 = arith.constant 1 : index
    %c0_67 = arith.constant 0 : index
    %61 = vector.load %arg4[%c0_64, %c0_65, %c1_66, %c0_67] : memref<1x1x328x4xbf16, #tpu.memory_space<vmem>>, vector<1x1x288x4xbf16>
    %62 = vector.shape_cast %61 : vector<1x1x288x4xbf16> to vector<288x4xbf16>
    %c10 = arith.constant 10 : index
    %c0_68 = arith.constant 0 : index
    %c0_69 = arith.constant 0 : index
    %63 = vector.load %arg6[%c10, %c0_68, %c0_69] : memref<27x4x128xbf16, #tpu.memory_space<vmem>>, vector<1x4x128xbf16>
    %64 = vector.shape_cast %63 : vector<1x4x128xbf16> to vector<4x128xbf16>
    %cst_70 = arith.constant dense<0.000000e+00> : vector<288x128xf32>
    %65 = tpu.matmul %62, %64, %cst_70 {dimension_numbers = #tpu.dot_dimension_numbers<[1], [0], [0], [1], [0, 0, 1, 1], [], []>} : vector<288x4xbf16>, vector<4x128xbf16>, vector<288x128xf32> -> vector<288x128xf32>
    %66 = arith.addf %60, %65 : vector<288x128xf32>
    %c0_71 = arith.constant 0 : index
    %c0_72 = arith.constant 0 : index
    %c2_73 = arith.constant 2 : index
    %c0_74 = arith.constant 0 : index
    %67 = vector.load %arg4[%c0_71, %c0_72, %c2_73, %c0_74] : memref<1x1x328x4xbf16, #tpu.memory_space<vmem>>, vector<1x1x288x4xbf16>
    %68 = vector.shape_cast %67 : vector<1x1x288x4xbf16> to vector<288x4xbf16>
    %c11 = arith.constant 11 : index
    %c0_75 = arith.constant 0 : index
    %c0_76 = arith.constant 0 : index
    %69 = vector.load %arg6[%c11, %c0_75, %c0_76] : memref<27x4x128xbf16, #tpu.memory_space<vmem>>, vector<1x4x128xbf16>
    %70 = vector.shape_cast %69 : vector<1x4x128xbf16> to vector<4x128xbf16>
    %cst_77 = arith.constant dense<0.000000e+00> : vector<288x128xf32>
    %71 = tpu.matmul %68, %70, %cst_77 {dimension_numbers = #tpu.dot_dimension_numbers<[1], [0], [0], [1], [0, 0, 1, 1], [], []>} : vector<288x4xbf16>, vector<4x128xbf16>, vector<288x128xf32> -> vector<288x128xf32>
    %72 = arith.addf %66, %71 : vector<288x128xf32>
    %c0_78 = arith.constant 0 : index
    %c0_79 = arith.constant 0 : index
    %c18_80 = arith.constant 18 : index
    %c0_81 = arith.constant 0 : index
    %73 = vector.load %arg4[%c0_78, %c0_79, %c18_80, %c0_81] : memref<1x1x328x4xbf16, #tpu.memory_space<vmem>>, vector<1x1x288x4xbf16>
    %74 = vector.shape_cast %73 : vector<1x1x288x4xbf16> to vector<288x4xbf16>
    %c12 = arith.constant 12 : index
    %c0_82 = arith.constant 0 : index
    %c0_83 = arith.constant 0 : index
    %75 = vector.load %arg6[%c12, %c0_82, %c0_83] : memref<27x4x128xbf16, #tpu.memory_space<vmem>>, vector<1x4x128xbf16>
    %76 = vector.shape_cast %75 : vector<1x4x128xbf16> to vector<4x128xbf16>
    %cst_84 = arith.constant dense<0.000000e+00> : vector<288x128xf32>
    %77 = tpu.matmul %74, %76, %cst_84 {dimension_numbers = #tpu.dot_dimension_numbers<[1], [0], [0], [1], [0, 0, 1, 1], [], []>} : vector<288x4xbf16>, vector<4x128xbf16>, vector<288x128xf32> -> vector<288x128xf32>
    %78 = arith.addf %72, %77 : vector<288x128xf32>
    %c0_85 = arith.constant 0 : index
    %c0_86 = arith.constant 0 : index
    %c19_87 = arith.constant 19 : index
    %c0_88 = arith.constant 0 : index
    %79 = vector.load %arg4[%c0_85, %c0_86, %c19_87, %c0_88] : memref<1x1x328x4xbf16, #tpu.memory_space<vmem>>, vector<1x1x288x4xbf16>
    %80 = vector.shape_cast %79 : vector<1x1x288x4xbf16> to vector<288x4xbf16>
    %c13 = arith.constant 13 : index
    %c0_89 = arith.constant 0 : index
    %c0_90 = arith.constant 0 : index
    %81 = vector.load %arg6[%c13, %c0_89, %c0_90] : memref<27x4x128xbf16, #tpu.memory_space<vmem>>, vector<1x4x128xbf16>
    %82 = vector.shape_cast %81 : vector<1x4x128xbf16> to vector<4x128xbf16>
    %cst_91 = arith.constant dense<0.000000e+00> : vector<288x128xf32>
    %83 = tpu.matmul %80, %82, %cst_91 {dimension_numbers = #tpu.dot_dimension_numbers<[1], [0], [0], [1], [0, 0, 1, 1], [], []>} : vector<288x4xbf16>, vector<4x128xbf16>, vector<288x128xf32> -> vector<288x128xf32>
    %84 = arith.addf %78, %83 : vector<288x128xf32>
    %c0_92 = arith.constant 0 : index
    %c0_93 = arith.constant 0 : index
    %c20_94 = arith.constant 20 : index
    %c0_95 = arith.constant 0 : index
    %85 = vector.load %arg4[%c0_92, %c0_93, %c20_94, %c0_95] : memref<1x1x328x4xbf16, #tpu.memory_space<vmem>>, vector<1x1x288x4xbf16>
    %86 = vector.shape_cast %85 : vector<1x1x288x4xbf16> to vector<288x4xbf16>
    %c14 = arith.constant 14 : index
    %c0_96 = arith.constant 0 : index
    %c0_97 = arith.constant 0 : index
    %87 = vector.load %arg6[%c14, %c0_96, %c0_97] : memref<27x4x128xbf16, #tpu.memory_space<vmem>>, vector<1x4x128xbf16>
    %88 = vector.shape_cast %87 : vector<1x4x128xbf16> to vector<4x128xbf16>
    %cst_98 = arith.constant dense<0.000000e+00> : vector<288x128xf32>
    %89 = tpu.matmul %86, %88, %cst_98 {dimension_numbers = #tpu.dot_dimension_numbers<[1], [0], [0], [1], [0, 0, 1, 1], [], []>} : vector<288x4xbf16>, vector<4x128xbf16>, vector<288x128xf32> -> vector<288x128xf32>
    %90 = arith.addf %84, %89 : vector<288x128xf32>
    %c0_99 = arith.constant 0 : index
    %c0_100 = arith.constant 0 : index
    %c36_101 = arith.constant 36 : index
    %c0_102 = arith.constant 0 : index
    %91 = vector.load %arg4[%c0_99, %c0_100, %c36_101, %c0_102] : memref<1x1x328x4xbf16, #tpu.memory_space<vmem>>, vector<1x1x288x4xbf16>
    %92 = vector.shape_cast %91 : vector<1x1x288x4xbf16> to vector<288x4xbf16>
    %c15 = arith.constant 15 : index
    %c0_103 = arith.constant 0 : index
    %c0_104 = arith.constant 0 : index
    %93 = vector.load %arg6[%c15, %c0_103, %c0_104] : memref<27x4x128xbf16, #tpu.memory_space<vmem>>, vector<1x4x128xbf16>
    %94 = vector.shape_cast %93 : vector<1x4x128xbf16> to vector<4x128xbf16>
    %cst_105 = arith.constant dense<0.000000e+00> : vector<288x128xf32>
    %95 = tpu.matmul %92, %94, %cst_105 {dimension_numbers = #tpu.dot_dimension_numbers<[1], [0], [0], [1], [0, 0, 1, 1], [], []>} : vector<288x4xbf16>, vector<4x128xbf16>, vector<288x128xf32> -> vector<288x128xf32>
    %96 = arith.addf %90, %95 : vector<288x128xf32>
    %c0_106 = arith.constant 0 : index
    %c0_107 = arith.constant 0 : index
    %c37_108 = arith.constant 37 : index
    %c0_109 = arith.constant 0 : index
    %97 = vector.load %arg4[%c0_106, %c0_107, %c37_108, %c0_109] : memref<1x1x328x4xbf16, #tpu.memory_space<vmem>>, vector<1x1x288x4xbf16>
    %98 = vector.shape_cast %97 : vector<1x1x288x4xbf16> to vector<288x4xbf16>
    %c16 = arith.constant 16 : index
    %c0_110 = arith.constant 0 : index
    %c0_111 = arith.constant 0 : index
    %99 = vector.load %arg6[%c16, %c0_110, %c0_111] : memref<27x4x128xbf16, #tpu.memory_space<vmem>>, vector<1x4x128xbf16>
    %100 = vector.shape_cast %99 : vector<1x4x128xbf16> to vector<4x128xbf16>
    %cst_112 = arith.constant dense<0.000000e+00> : vector<288x128xf32>
    %101 = tpu.matmul %98, %100, %cst_112 {dimension_numbers = #tpu.dot_dimension_numbers<[1], [0], [0], [1], [0, 0, 1, 1], [], []>} : vector<288x4xbf16>, vector<4x128xbf16>, vector<288x128xf32> -> vector<288x128xf32>
    %102 = arith.addf %96, %101 : vector<288x128xf32>
    %c0_113 = arith.constant 0 : index
    %c0_114 = arith.constant 0 : index
    %c38_115 = arith.constant 38 : index
    %c0_116 = arith.constant 0 : index
    %103 = vector.load %arg4[%c0_113, %c0_114, %c38_115, %c0_116] : memref<1x1x328x4xbf16, #tpu.memory_space<vmem>>, vector<1x1x288x4xbf16>
    %104 = vector.shape_cast %103 : vector<1x1x288x4xbf16> to vector<288x4xbf16>
    %c17 = arith.constant 17 : index
    %c0_117 = arith.constant 0 : index
    %c0_118 = arith.constant 0 : index
    %105 = vector.load %arg6[%c17, %c0_117, %c0_118] : memref<27x4x128xbf16, #tpu.memory_space<vmem>>, vector<1x4x128xbf16>
    %106 = vector.shape_cast %105 : vector<1x4x128xbf16> to vector<4x128xbf16>
    %cst_119 = arith.constant dense<0.000000e+00> : vector<288x128xf32>
    %107 = tpu.matmul %104, %106, %cst_119 {dimension_numbers = #tpu.dot_dimension_numbers<[1], [0], [0], [1], [0, 0, 1, 1], [], []>} : vector<288x4xbf16>, vector<4x128xbf16>, vector<288x128xf32> -> vector<288x128xf32>
    %108 = arith.addf %102, %107 : vector<288x128xf32>
    %c0_120 = arith.constant 0 : index
    %c0_121 = arith.constant 0 : index
    %c0_122 = arith.constant 0 : index
    %c0_123 = arith.constant 0 : index
    %109 = vector.load %arg5[%c0_120, %c0_121, %c0_122, %c0_123] : memref<1x1x328x4xbf16, #tpu.memory_space<vmem>>, vector<1x1x288x4xbf16>
    %110 = vector.shape_cast %109 : vector<1x1x288x4xbf16> to vector<288x4xbf16>
    %c18_124 = arith.constant 18 : index
    %c0_125 = arith.constant 0 : index
    %c0_126 = arith.constant 0 : index
    %111 = vector.load %arg6[%c18_124, %c0_125, %c0_126] : memref<27x4x128xbf16, #tpu.memory_space<vmem>>, vector<1x4x128xbf16>
    %112 = vector.shape_cast %111 : vector<1x4x128xbf16> to vector<4x128xbf16>
    %cst_127 = arith.constant dense<0.000000e+00> : vector<288x128xf32>
    %113 = tpu.matmul %110, %112, %cst_127 {dimension_numbers = #tpu.dot_dimension_numbers<[1], [0], [0], [1], [0, 0, 1, 1], [], []>} : vector<288x4xbf16>, vector<4x128xbf16>, vector<288x128xf32> -> vector<288x128xf32>
    %114 = arith.addf %108, %113 : vector<288x128xf32>
    %c0_128 = arith.constant 0 : index
    %c0_129 = arith.constant 0 : index
    %c1_130 = arith.constant 1 : index
    %c0_131 = arith.constant 0 : index
    %115 = vector.load %arg5[%c0_128, %c0_129, %c1_130, %c0_131] : memref<1x1x328x4xbf16, #tpu.memory_space<vmem>>, vector<1x1x288x4xbf16>
    %116 = vector.shape_cast %115 : vector<1x1x288x4xbf16> to vector<288x4xbf16>
    %c19_132 = arith.constant 19 : index
    %c0_133 = arith.constant 0 : index
    %c0_134 = arith.constant 0 : index
    %117 = vector.load %arg6[%c19_132, %c0_133, %c0_134] : memref<27x4x128xbf16, #tpu.memory_space<vmem>>, vector<1x4x128xbf16>
    %118 = vector.shape_cast %117 : vector<1x4x128xbf16> to vector<4x128xbf16>
    %cst_135 = arith.constant dense<0.000000e+00> : vector<288x128xf32>
    %119 = tpu.matmul %116, %118, %cst_135 {dimension_numbers = #tpu.dot_dimension_numbers<[1], [0], [0], [1], [0, 0, 1, 1], [], []>} : vector<288x4xbf16>, vector<4x128xbf16>, vector<288x128xf32> -> vector<288x128xf32>
    %120 = arith.addf %114, %119 : vector<288x128xf32>
    %c0_136 = arith.constant 0 : index
    %c0_137 = arith.constant 0 : index
    %c2_138 = arith.constant 2 : index
    %c0_139 = arith.constant 0 : index
    %121 = vector.load %arg5[%c0_136, %c0_137, %c2_138, %c0_139] : memref<1x1x328x4xbf16, #tpu.memory_space<vmem>>, vector<1x1x288x4xbf16>
    %122 = vector.shape_cast %121 : vector<1x1x288x4xbf16> to vector<288x4xbf16>
    %c20_140 = arith.constant 20 : index
    %c0_141 = arith.constant 0 : index
    %c0_142 = arith.constant 0 : index
    %123 = vector.load %arg6[%c20_140, %c0_141, %c0_142] : memref<27x4x128xbf16, #tpu.memory_space<vmem>>, vector<1x4x128xbf16>
    %124 = vector.shape_cast %123 : vector<1x4x128xbf16> to vector<4x128xbf16>
    %cst_143 = arith.constant dense<0.000000e+00> : vector<288x128xf32>
    %125 = tpu.matmul %122, %124, %cst_143 {dimension_numbers = #tpu.dot_dimension_numbers<[1], [0], [0], [1], [0, 0, 1, 1], [], []>} : vector<288x4xbf16>, vector<4x128xbf16>, vector<288x128xf32> -> vector<288x128xf32>
    %126 = arith.addf %120, %125 : vector<288x128xf32>
    %c0_144 = arith.constant 0 : index
    %c0_145 = arith.constant 0 : index
    %c18_146 = arith.constant 18 : index
    %c0_147 = arith.constant 0 : index
    %127 = vector.load %arg5[%c0_144, %c0_145, %c18_146, %c0_147] : memref<1x1x328x4xbf16, #tpu.memory_space<vmem>>, vector<1x1x288x4xbf16>
    %128 = vector.shape_cast %127 : vector<1x1x288x4xbf16> to vector<288x4xbf16>
    %c21 = arith.constant 21 : index
    %c0_148 = arith.constant 0 : index
    %c0_149 = arith.constant 0 : index
    %129 = vector.load %arg6[%c21, %c0_148, %c0_149] : memref<27x4x128xbf16, #tpu.memory_space<vmem>>, vector<1x4x128xbf16>
    %130 = vector.shape_cast %129 : vector<1x4x128xbf16> to vector<4x128xbf16>
    %cst_150 = arith.constant dense<0.000000e+00> : vector<288x128xf32>
    %131 = tpu.matmul %128, %130, %cst_150 {dimension_numbers = #tpu.dot_dimension_numbers<[1], [0], [0], [1], [0, 0, 1, 1], [], []>} : vector<288x4xbf16>, vector<4x128xbf16>, vector<288x128xf32> -> vector<288x128xf32>
    %132 = arith.addf %126, %131 : vector<288x128xf32>
    %c0_151 = arith.constant 0 : index
    %c0_152 = arith.constant 0 : index
    %c19_153 = arith.constant 19 : index
    %c0_154 = arith.constant 0 : index
    %133 = vector.load %arg5[%c0_151, %c0_152, %c19_153, %c0_154] : memref<1x1x328x4xbf16, #tpu.memory_space<vmem>>, vector<1x1x288x4xbf16>
    %134 = vector.shape_cast %133 : vector<1x1x288x4xbf16> to vector<288x4xbf16>
    %c22 = arith.constant 22 : index
    %c0_155 = arith.constant 0 : index
    %c0_156 = arith.constant 0 : index
    %135 = vector.load %arg6[%c22, %c0_155, %c0_156] : memref<27x4x128xbf16, #tpu.memory_space<vmem>>, vector<1x4x128xbf16>
    %136 = vector.shape_cast %135 : vector<1x4x128xbf16> to vector<4x128xbf16>
    %cst_157 = arith.constant dense<0.000000e+00> : vector<288x128xf32>
    %137 = tpu.matmul %134, %136, %cst_157 {dimension_numbers = #tpu.dot_dimension_numbers<[1], [0], [0], [1], [0, 0, 1, 1], [], []>} : vector<288x4xbf16>, vector<4x128xbf16>, vector<288x128xf32> -> vector<288x128xf32>
    %138 = arith.addf %132, %137 : vector<288x128xf32>
    %c0_158 = arith.constant 0 : index
    %c0_159 = arith.constant 0 : index
    %c20_160 = arith.constant 20 : index
    %c0_161 = arith.constant 0 : index
    %139 = vector.load %arg5[%c0_158, %c0_159, %c20_160, %c0_161] : memref<1x1x328x4xbf16, #tpu.memory_space<vmem>>, vector<1x1x288x4xbf16>
    %140 = vector.shape_cast %139 : vector<1x1x288x4xbf16> to vector<288x4xbf16>
    %c23 = arith.constant 23 : index
    %c0_162 = arith.constant 0 : index
    %c0_163 = arith.constant 0 : index
    %141 = vector.load %arg6[%c23, %c0_162, %c0_163] : memref<27x4x128xbf16, #tpu.memory_space<vmem>>, vector<1x4x128xbf16>
    %142 = vector.shape_cast %141 : vector<1x4x128xbf16> to vector<4x128xbf16>
    %cst_164 = arith.constant dense<0.000000e+00> : vector<288x128xf32>
    %143 = tpu.matmul %140, %142, %cst_164 {dimension_numbers = #tpu.dot_dimension_numbers<[1], [0], [0], [1], [0, 0, 1, 1], [], []>} : vector<288x4xbf16>, vector<4x128xbf16>, vector<288x128xf32> -> vector<288x128xf32>
    %144 = arith.addf %138, %143 : vector<288x128xf32>
    %c0_165 = arith.constant 0 : index
    %c0_166 = arith.constant 0 : index
    %c36_167 = arith.constant 36 : index
    %c0_168 = arith.constant 0 : index
    %145 = vector.load %arg5[%c0_165, %c0_166, %c36_167, %c0_168] : memref<1x1x328x4xbf16, #tpu.memory_space<vmem>>, vector<1x1x288x4xbf16>
    %146 = vector.shape_cast %145 : vector<1x1x288x4xbf16> to vector<288x4xbf16>
    %c24 = arith.constant 24 : index
    %c0_169 = arith.constant 0 : index
    %c0_170 = arith.constant 0 : index
    %147 = vector.load %arg6[%c24, %c0_169, %c0_170] : memref<27x4x128xbf16, #tpu.memory_space<vmem>>, vector<1x4x128xbf16>
    %148 = vector.shape_cast %147 : vector<1x4x128xbf16> to vector<4x128xbf16>
    %cst_171 = arith.constant dense<0.000000e+00> : vector<288x128xf32>
    %149 = tpu.matmul %146, %148, %cst_171 {dimension_numbers = #tpu.dot_dimension_numbers<[1], [0], [0], [1], [0, 0, 1, 1], [], []>} : vector<288x4xbf16>, vector<4x128xbf16>, vector<288x128xf32> -> vector<288x128xf32>
    %150 = arith.addf %144, %149 : vector<288x128xf32>
    %c0_172 = arith.constant 0 : index
    %c0_173 = arith.constant 0 : index
    %c37_174 = arith.constant 37 : index
    %c0_175 = arith.constant 0 : index
    %151 = vector.load %arg5[%c0_172, %c0_173, %c37_174, %c0_175] : memref<1x1x328x4xbf16, #tpu.memory_space<vmem>>, vector<1x1x288x4xbf16>
    %152 = vector.shape_cast %151 : vector<1x1x288x4xbf16> to vector<288x4xbf16>
    %c25 = arith.constant 25 : index
    %c0_176 = arith.constant 0 : index
    %c0_177 = arith.constant 0 : index
    %153 = vector.load %arg6[%c25, %c0_176, %c0_177] : memref<27x4x128xbf16, #tpu.memory_space<vmem>>, vector<1x4x128xbf16>
    %154 = vector.shape_cast %153 : vector<1x4x128xbf16> to vector<4x128xbf16>
    %cst_178 = arith.constant dense<0.000000e+00> : vector<288x128xf32>
    %155 = tpu.matmul %152, %154, %cst_178 {dimension_numbers = #tpu.dot_dimension_numbers<[1], [0], [0], [1], [0, 0, 1, 1], [], []>} : vector<288x4xbf16>, vector<4x128xbf16>, vector<288x128xf32> -> vector<288x128xf32>
    %156 = arith.addf %150, %155 : vector<288x128xf32>
    %c0_179 = arith.constant 0 : index
    %c0_180 = arith.constant 0 : index
    %c38_181 = arith.constant 38 : index
    %c0_182 = arith.constant 0 : index
    %157 = vector.load %arg5[%c0_179, %c0_180, %c38_181, %c0_182] : memref<1x1x328x4xbf16, #tpu.memory_space<vmem>>, vector<1x1x288x4xbf16>
    %158 = vector.shape_cast %157 : vector<1x1x288x4xbf16> to vector<288x4xbf16>
    %c26 = arith.constant 26 : index
    %c0_183 = arith.constant 0 : index
    %c0_184 = arith.constant 0 : index
    %159 = vector.load %arg6[%c26, %c0_183, %c0_184] : memref<27x4x128xbf16, #tpu.memory_space<vmem>>, vector<1x4x128xbf16>
    %160 = vector.shape_cast %159 : vector<1x4x128xbf16> to vector<4x128xbf16>
    %cst_185 = arith.constant dense<0.000000e+00> : vector<288x128xf32>
    %161 = tpu.matmul %158, %160, %cst_185 {dimension_numbers = #tpu.dot_dimension_numbers<[1], [0], [0], [1], [0, 0, 1, 1], [], []>} : vector<288x4xbf16>, vector<4x128xbf16>, vector<288x128xf32> -> vector<288x128xf32>
    %162 = arith.addf %156, %161 : vector<288x128xf32>
    %c0_186 = arith.constant 0 : index
    %c0_187 = arith.constant 0 : index
    %163 = vector.load %arg7[%c0_186, %c0_187] : memref<1x128xf32, #tpu.memory_space<vmem>>, vector<1x128xf32>
    %164 = vector.broadcast %163 : vector<1x128xf32> to vector<288x128xf32>
    %165 = arith.addf %162, %164 : vector<288x128xf32>
    %c0_188 = arith.constant 0 : index
    %c0_189 = arith.constant 0 : index
    %c0_190 = arith.constant 0 : index
    %c0_191 = arith.constant 0 : index
    %166 = vector.load %arg8[%c0_188, %c0_189, %c0_190, %c0_191] : memref<1x1x288x128xf32, #tpu.memory_space<vmem>>, vector<1x1x288x128xf32>
    %167 = vector.shape_cast %166 : vector<1x1x288x128xf32> to vector<288x128xf32>
    %168 = vector.shape_cast %165 : vector<288x128xf32> to vector<1x1x288x128xf32>
    tpu.vector_store %arg8[%c0_188, %c0_189, %c0_190, %c0_191], %168 {strides = array<i32>} : memref<1x1x288x128xf32, #tpu.memory_space<vmem>>, vector<1x1x288x128xf32>,
    %c0_192 = arith.constant 0 : index
    %c0_193 = arith.constant 0 : index
    %169 = vector.load %arg2[%c0_192, %c0_193] : memref<288x1xf32, #tpu.memory_space<vmem>>, vector<288x1xf32>
    %170 = vector.broadcast %169 : vector<288x1xf32> to vector<288x128xf32>
    %171 = arith.mulf %165, %170 : vector<288x128xf32>
    %cst_194 = arith.constant dense<0.000000e+00> : vector<128xf32>
    %172 = vector.multi_reduction <add>, %171, %cst_194 [0] : vector<288x128xf32> to vector<128xf32>
    %173 = vector.shape_cast %172 : vector<128xf32> to vector<1x128xf32>
    %c0_195 = arith.constant 0 : index
    %c0_196 = arith.constant 0 : index
    %c0_197 = arith.constant 0 : index
    %c0_198 = arith.constant 0 : index
    %174 = vector.load %arg9[%c0_195, %c0_196, %c0_197, %c0_198] : memref<1x1x2x128xf32, #tpu.memory_space<vmem>>, vector<1x1x1x128xf32>
    %175 = vector.shape_cast %174 : vector<1x1x1x128xf32> to vector<1x128xf32>
    %176 = vector.shape_cast %173 : vector<1x128xf32> to vector<1x1x1x128xf32>
    tpu.vector_store %arg9[%c0_195, %c0_196, %c0_197, %c0_198], %176 {strides = array<i32>} : memref<1x1x2x128xf32, #tpu.memory_space<vmem>>, vector<1x1x1x128xf32>,
    %177 = arith.mulf %171, %165 : vector<288x128xf32>
    %cst_199 = arith.constant dense<0.000000e+00> : vector<128xf32>
    %178 = vector.multi_reduction <add>, %177, %cst_199 [0] : vector<288x128xf32> to vector<128xf32>
    %179 = vector.shape_cast %178 : vector<128xf32> to vector<1x128xf32>
    %c0_200 = arith.constant 0 : index
    %c0_201 = arith.constant 0 : index
    %c1_202 = arith.constant 1 : index
    %c0_203 = arith.constant 0 : index
    %180 = vector.load %arg9[%c0_200, %c0_201, %c1_202, %c0_203] : memref<1x1x2x128xf32, #tpu.memory_space<vmem>>, vector<1x1x1x128xf32>
    %181 = vector.shape_cast %180 : vector<1x1x1x128xf32> to vector<1x128xf32>
    %182 = vector.shape_cast %179 : vector<1x128xf32> to vector<1x1x1x128xf32>
    tpu.vector_store %arg9[%c0_200, %c0_201, %c1_202, %c0_203], %182 {strides = array<i32>} : memref<1x1x2x128xf32, #tpu.memory_space<vmem>>, vector<1x1x1x128xf32>,
    return
  }
  func.func @transform_0(%arg0: i32, %arg1: i32) -> (i32, i32) {
    %c0_i32 = arith.constant 0 : i32
    %c0_i32_0 = arith.constant 0 : i32
    %c0_i32_1 = arith.constant 0 : i32
    return %c0_i32, %c0_i32_0 : i32, i32
  }
  func.func @transform_1(%arg0: i32, %arg1: i32) -> (i32, i32, i32, i32) {
    %c0_i32 = arith.constant 0 : i32
    %0 = arith.addi %arg1, %c0_i32 : i32
    %c0_i32_0 = arith.constant 0 : i32
    %c0_i32_1 = arith.constant 0 : i32
    %c0_i32_2 = arith.constant 0 : i32
    return %arg0, %0, %c0_i32_0, %c0_i32_1 : i32, i32, i32, i32
  }
  func.func @transform_2(%arg0: i32, %arg1: i32) -> (i32, i32, i32, i32) {
    %c1_i32 = arith.constant 1 : i32
    %0 = arith.addi %arg1, %c1_i32 : i32
    %c0_i32 = arith.constant 0 : i32
    %c0_i32_0 = arith.constant 0 : i32
    %c0_i32_1 = arith.constant 0 : i32
    return %arg0, %0, %c0_i32, %c0_i32_0 : i32, i32, i32, i32
  }
  func.func @transform_3(%arg0: i32, %arg1: i32) -> (i32, i32, i32, i32) {
    %c2_i32 = arith.constant 2 : i32
    %0 = arith.addi %arg1, %c2_i32 : i32
    %c0_i32 = arith.constant 0 : i32
    %c0_i32_0 = arith.constant 0 : i32
    %c0_i32_1 = arith.constant 0 : i32
    return %arg0, %0, %c0_i32, %c0_i32_0 : i32, i32, i32, i32
  }
  func.func @transform_4(%arg0: i32, %arg1: i32) -> (i32, i32, i32) {
    %c0_i32 = arith.constant 0 : i32
    %c0_i32_0 = arith.constant 0 : i32
    %c0_i32_1 = arith.constant 0 : i32
    %c0_i32_2 = arith.constant 0 : i32
    return %c0_i32, %c0_i32_0, %c0_i32_1 : i32, i32, i32
  }
  func.func @transform_5(%arg0: i32, %arg1: i32) -> (i32, i32) {
    %c0_i32 = arith.constant 0 : i32
    %c0_i32_0 = arith.constant 0 : i32
    %c0_i32_1 = arith.constant 0 : i32
    return %c0_i32, %c0_i32_0 : i32, i32
  }
  func.func @transform_6(%arg0: i32, %arg1: i32) -> (i32, i32, i32, i32) {
    %c0_i32 = arith.constant 0 : i32
    %c0_i32_0 = arith.constant 0 : i32
    %c0_i32_1 = arith.constant 0 : i32
    return %arg0, %arg1, %c0_i32, %c0_i32_0 : i32, i32, i32, i32
  }
  func.func @transform_7(%arg0: i32, %arg1: i32) -> (i32, i32, i32, i32) {
    %c0_i32 = arith.constant 0 : i32
    %c0_i32_0 = arith.constant 0 : i32
    %c0_i32_1 = arith.constant 0 : i32
    return %arg0, %arg1, %c0_i32, %c0_i32_0 : i32, i32, i32, i32
  }
}

module attributes {stable_mosaic.version = 11 : i64} {
  func.func @_bn_relu_kernel(%arg0: i32, %arg1: i32, %arg2: memref<1x1x288x128xf32, #tpu.memory_space<vmem>>, %arg3: memref<1x128xf32, #tpu.memory_space<vmem>>, %arg4: memref<1x128xf32, #tpu.memory_space<vmem>>, %arg5: memref<1x1x288x128xf32, #tpu.memory_space<vmem>>) attributes {dimension_semantics = [#tpu.dimension_semantics<parallel>, #tpu.dimension_semantics<parallel>], iteration_bounds = array<i64: 2, 16>, scalar_prefetch = 0 : i64, scratch_operands = 0 : i64, tpu.core_type = #tpu.core_type<tc>, window_params = [{transform_indices = @transform_0, window_bounds = array<i64: 1, 1, 288, 128>}, {pipeline_mode = #tpu.pipeline_mode<synchronous>, transform_indices = @transform_1, window_bounds = array<i64: 1, 128>}, {pipeline_mode = #tpu.pipeline_mode<synchronous>, transform_indices = @transform_2, window_bounds = array<i64: 1, 128>}, {transform_indices = @transform_3, window_bounds = array<i64: 1, 1, 288, 128>}]} {
    %c0 = arith.constant 0 : index
    %c0_0 = arith.constant 0 : index
    %c0_1 = arith.constant 0 : index
    %c0_2 = arith.constant 0 : index
    %0 = vector.load %arg2[%c0, %c0_0, %c0_1, %c0_2] : memref<1x1x288x128xf32, #tpu.memory_space<vmem>>, vector<1x1x288x128xf32>
    %1 = vector.shape_cast %0 : vector<1x1x288x128xf32> to vector<288x128xf32>
    %c0_3 = arith.constant 0 : index
    %c0_4 = arith.constant 0 : index
    %2 = vector.load %arg3[%c0_3, %c0_4] : memref<1x128xf32, #tpu.memory_space<vmem>>, vector<1x128xf32>
    %3 = vector.broadcast %2 : vector<1x128xf32> to vector<288x128xf32>
    %4 = arith.mulf %1, %3 : vector<288x128xf32>
    %c0_5 = arith.constant 0 : index
    %c0_6 = arith.constant 0 : index
    %5 = vector.load %arg4[%c0_5, %c0_6] : memref<1x128xf32, #tpu.memory_space<vmem>>, vector<1x128xf32>
    %6 = vector.broadcast %5 : vector<1x128xf32> to vector<288x128xf32>
    %7 = arith.addf %4, %6 : vector<288x128xf32>
    %cst = arith.constant 0.000000e+00 : f32
    %8 = vector.broadcast %cst : f32 to vector<288x128xf32>
    %9 = arith.maximumf %7, %8 : vector<288x128xf32>
    %c0_7 = arith.constant 0 : index
    %c0_8 = arith.constant 0 : index
    %c0_9 = arith.constant 0 : index
    %c0_10 = arith.constant 0 : index
    %10 = vector.load %arg5[%c0_7, %c0_8, %c0_9, %c0_10] : memref<1x1x288x128xf32, #tpu.memory_space<vmem>>, vector<1x1x288x128xf32>
    %11 = vector.shape_cast %10 : vector<1x1x288x128xf32> to vector<288x128xf32>
    %12 = vector.shape_cast %9 : vector<288x128xf32> to vector<1x1x288x128xf32>
    tpu.vector_store %arg5[%c0_7, %c0_8, %c0_9, %c0_10], %12 {strides = array<i32>} : memref<1x1x288x128xf32, #tpu.memory_space<vmem>>, vector<1x1x288x128xf32>,
    return
  }
  func.func @transform_0(%arg0: i32, %arg1: i32) -> (i32, i32, i32, i32) {
    %c0_i32 = arith.constant 0 : i32
    %c0_i32_0 = arith.constant 0 : i32
    %c0_i32_1 = arith.constant 0 : i32
    return %arg0, %arg1, %c0_i32, %c0_i32_0 : i32, i32, i32, i32
  }
  func.func @transform_1(%arg0: i32, %arg1: i32) -> (i32, i32) {
    %c0_i32 = arith.constant 0 : i32
    %c0_i32_0 = arith.constant 0 : i32
    %c0_i32_1 = arith.constant 0 : i32
    return %c0_i32, %c0_i32_0 : i32, i32
  }
  func.func @transform_2(%arg0: i32, %arg1: i32) -> (i32, i32) {
    %c0_i32 = arith.constant 0 : i32
    %c0_i32_0 = arith.constant 0 : i32
    %c0_i32_1 = arith.constant 0 : i32
    return %c0_i32, %c0_i32_0 : i32, i32
  }
  func.func @transform_3(%arg0: i32, %arg1: i32) -> (i32, i32, i32, i32) {
    %c0_i32 = arith.constant 0 : i32
    %c0_i32_0 = arith.constant 0 : i32
    %c0_i32_1 = arith.constant 0 : i32
    return %arg0, %arg1, %c0_i32, %c0_i32_0 : i32, i32, i32, i32
  }
}

</mosaic_0001>

<bundles_post_ra>
// kernel: up_conv_forward.3
= control target key start
LH: loop header
LB: loop body
LE: loop exit
PB: predicated region body
PF: predicated region fallthrough
CT: control target
= control target key end

     0   :  { %s609_s12 = smov 0   ;;  %s611_s13 = smov 0   ;;  %s818_s0 = inlined_call_operand.vmem [shape: f32[2,16,288,128], index: 0, kind: input, shape index: {}]   ;;  %s819_s1 = inlined_call_operand.vmem [shape: f32[1,128], index: 1, kind: input, shape index: {}]   ;;  %s820_s2 = inlined_call_operand.vmem [shape: f32[1,128], index: 2, kind: input, shape index: {}]   ;;  %s821_s3 = inlined_call_operand.vmem [shape: f32[2,16,288,128], index: 3, kind: output, shape index: {}]  }
   0x1   :  { %s613_s14 = smov 0   ;;  %s615_s15 = smov 0  }
   0x2   :  { %s617_s16 = smov 0  }
   0x3 LB: > { %s22_s17 = sadd.s32 1, %s579_s14  ;;  %s25_s18 = sadd.s32 1, %s583_s15  ;;  %s587_s16 = sphi %s617_s16, %s13_s16   ;;  %s583_s15 = sphi %s615_s15, %s825_s15   ;;  %s579_s14 = sphi %s613_s14, %s824_s14   ;;  %s575_s13 = sphi %s611_s13, %s823_s13   ;;  %s571_s12 = sphi %s609_s12, %s822_s12  }
   0x4   : > { %p23_p0 = scmp.ge.s32.totalorder %s22_s17, 16  ;;  %p500_p1 = scmp.ge.s32.totalorder %s587_s16, 1 }
   0x5   : > { %p157_p2 = scmp.lt.s32.totalorder %s587_s16, 33 }
   0x6   : > { %s827_s17 = smov (%p23_p0, %s22_s17), 0  ;;  %s829_s18 = smov (!%p23_p0, %s25_s18), %s583_s15 }
   0x7   : > { %p158_p3 = pnand %p500_p1, %p157_p2  ;;  %p27_p4 = scmp.ge.s32.totalorder %s829_s18, 2 }
   0x8   : > { %p189_p5 = scmp.lt.s32.totalorder (!%p158_p3), %s575_s13, 1  ;;  %p191_p6 = scmp.lt.s32.totalorder (!%p158_p3), %s571_s12, 15  ;;  %v642_v0 = vld [vmem:[%s819_s1] ss:$0 sm:$0xff] (!%p158_p3) }
   0x9   : > { %s831_s18 = smov (%p27_p4, %s829_s18), 0  ;;  %161 = sbr.rel (%p158_p3) target bundleno = 56 (0x38), region = 32 }
   0xa   : > { %v652_v1 = vld [vmem:[%s820_s2] ss:$0 sm:$0xff] (!%p158_p3) }
  0x10   : > { %s833_s13 = smov (!%p189_p5, %s575_s13), 1  ;;  %s835_s12 = smov (!%p191_p6, %s571_s12), 15 }
  0x11   : > { %s508_s19 = smul.u32 576, %s833_s13 }
  0x12   : > { %s507_s20 = smul.u32 36, %s835_s12 }
  0x14   : > { %s195_s21 = sadd.s32 %s508_s19, %s507_s20 }
  0x15   : > { %s501_s22 = sshll.u32 %s195_s21, 3 }
  0x16   : > { %s647_s27 = scalar_lea.vmem %s818_s0, %s501_s22  ;;  %s675_s5 = scalar_lea.vmem %s821_s3, %s501_s22 }
  0x17   : > { %v207_v2 = vld [vmem:[%s647_s27] sm:$0xff]  ;;  %v208_v3 = vld [vmem:[%s647_s27 + $0x8] sm:$0xff]  ;;  %v209_v4 = vld [vmem:[%s647_s27 + $0x10] sm:$0xff] }
  0x18   : > { %v250_v5 = vmul.f32 %v642_v0, %v207_v2  ;;  %v251_v6 = vmul.f32 %v642_v0, %v208_v3  ;;  %v252_v7 = vmul.f32 %v642_v0, %v209_v4  ;;  %v210_v8 = vld [vmem:[%s647_s27 + $0x18] sm:$0xff]  ;;  %v211_v9 = vld [vmem:[%s647_s27 + $0x20] sm:$0xff]  ;;  %v212_v10 = vld [vmem:[%s647_s27 + $0x28] sm:$0xff] }
  0x19   : > { %v253_v11 = vmul.f32 %v642_v0, %v210_v8  ;;  %v254_v12 = vmul.f32 %v642_v0, %v211_v9  ;;  %v255_v13 = vmul.f32 %v642_v0, %v212_v10  ;;  %v213_v14 = vld [vmem:[%s647_s27 + $0x30] sm:$0xff]  ;;  %v214_v15 = vld [vmem:[%s647_s27 + $0x38] sm:$0xff]  ;;  %v215_v24 = vld [vmem:[%s647_s27 + $0x40] sm:$0xff] }
  0x1a   : > { %v293_v16 = vadd.f32 %v652_v1, %v250_v5  ;;  %v294_v17 = vadd.f32 %v652_v1, %v251_v6  ;;  %v295_v18 = vadd.f32 %v652_v1, %v252_v7  ;;  %v256_v19 = vmul.f32 %v642_v0, %v213_v14  ;;  %v216_v25 = vld [vmem:[%s647_s27 + $0x48] sm:$0xff]  ;;  %v217_v26 = vld [vmem:[%s647_s27 + $0x50] sm:$0xff]  ;;  %v218_v31 = vld [vmem:[%s647_s27 + $0x58] sm:$0xff] }
  0x1b   : > { %v296_v20 = vadd.f32 %v652_v1, %v253_v11  ;;  %v297_v21 = vadd.f32 %v652_v1, %v254_v12  ;;  %v298_v22 = vadd.f32 %v652_v1, %v255_v13  ;;  %v257_v23 = vmul.f32 %v642_v0, %v214_v15  ;;  %v219_v32 = vld [vmem:[%s647_s27 + $0x60] sm:$0xff]  ;;  %v220_v33 = vld [vmem:[%s647_s27 + $0x68] sm:$0xff]  ;;  %v221_v38 = vld [vmem:[%s647_s27 + $0x70] sm:$0xff] }
  0x1c   : > { %v329_v27 = vmax.f32 %v293_v16, 0.0  ;;  %v330_v28 = vmax.f32 %v294_v17, 0.0  ;;  %v331_v29 = vmax.f32 %v295_v18, 0.0  ;;  %v299_v30 = vadd.f32 %v652_v1, %v256_v19  ;;  %v222_v43 = vld [vmem:[%s647_s27 + $0x78] sm:$0xff]  ;;  %v223_v56 = vld [vmem:[%s647_s27 + $0x80] sm:$0xff]  ;;  %v224_v57 = vld [vmem:[%s647_s27 + $0x88] sm:$0xff] }
  0x1d   : > { %v332_v34 = vmax.f32 %v296_v20, 0.0  ;;  %v333_v35 = vmax.f32 %v297_v21, 0.0  ;;  %v334_v36 = vmax.f32 %v298_v22, 0.0  ;;  %v300_v37 = vadd.f32 %v652_v1, %v257_v23  ;;  %v225_v58 = vld [vmem:[%s647_s27 + $0x90] sm:$0xff]  ;;  %v226_v63 = vld [vmem:[%s647_s27 + $0x98] sm:$0xff]  ;;  %v227_v2 = vld [vmem:[%s647_s27 + $0xa0] sm:$0xff] }
  0x1e   : > { %365 = vst [vmem:[%s675_s5] sm:$0xff] %v329_v27  ;;  %366 = vst [vmem:[%s675_s5 + $0x8] sm:$0xff] %v330_v28  ;;  %v335_v39 = vmax.f32 %v299_v30, 0.0  ;;  %v258_v40 = vmul.f32 %v642_v0, %v215_v24  ;;  %v259_v41 = vmul.f32 %v642_v0, %v216_v25  ;;  %v260_v42 = vmul.f32 %v642_v0, %v217_v26  ;;  %v228_v3 = vld [vmem:[%s647_s27 + $0xa8] sm:$0xff]  ;;  %v229_v8 = vld [vmem:[%s647_s27 + $0xb0] sm:$0xff] }
  0x1f   : > { %367 = vst [vmem:[%s675_s5 + $0x10] sm:$0xff] %v331_v29  ;;  %368 = vst [vmem:[%s675_s5 + $0x18] sm:$0xff] %v332_v34  ;;  %v336_v44 = vmax.f32 %v300_v37, 0.0  ;;  %v261_v45 = vmul.f32 %v642_v0, %v218_v31  ;;  %v262_v46 = vmul.f32 %v642_v0, %v219_v32  ;;  %v263_v47 = vmul.f32 %v642_v0, %v220_v33  ;;  %v230_v13 = vld [vmem:[%s647_s27 + $0xb8] sm:$0xff]  ;;  %v231_v26 = vld [vmem:[%s647_s27 + $0xc0] sm:$0xff] }
  0x20   : > { %369 = vst [vmem:[%s675_s5 + $0x20] sm:$0xff] %v333_v35  ;;  %370 = vst [vmem:[%s675_s5 + $0x28] sm:$0xff] %v334_v36  ;;  %v301_v48 = vadd.f32 %v652_v1, %v258_v40  ;;  %v302_v49 = vadd.f32 %v652_v1, %v259_v41  ;;  %v303_v50 = vadd.f32 %v652_v1, %v260_v42  ;;  %v232_v27 = vld [vmem:[%s647_s27 + $0xc8] sm:$0xff]  ;;  %v233_v28 = vld [vmem:[%s647_s27 + $0xd0] sm:$0xff] }
  0x21   : > { %371 = vst [vmem:[%s675_s5 + $0x30] sm:$0xff] %v335_v39  ;;  %v264_v51 = vmul.f32 %v642_v0, %v221_v38  ;;  %372 = vst [vmem:[%s675_s5 + $0x38] sm:$0xff] %v336_v44  ;;  %v304_v52 = vadd.f32 %v652_v1, %v261_v45  ;;  %v305_v53 = vadd.f32 %v652_v1, %v262_v46  ;;  %v234_v33 = vld [vmem:[%s647_s27 + $0xd8] sm:$0xff]  ;;  %v235_v34 = vld [vmem:[%s647_s27 + $0xe0] sm:$0xff] }
  0x22   : > { %v306_v54 = vadd.f32 %v652_v1, %v263_v47  ;;  %v265_v55 = vmul.f32 %v642_v0, %v222_v43  ;;  %v337_v59 = vmax.f32 %v301_v48, 0.0  ;;  %v338_v60 = vmax.f32 %v302_v49, 0.0  ;;  %v236_v35 = vld [vmem:[%s647_s27 + $0xe8] sm:$0xff]  ;;  %v237_v40 = vld [vmem:[%s647_s27 + $0xf0] sm:$0xff]  ;;  %v238_v45 = vld [vmem:[%s647_s27 + $0xf8] sm:$0xff] }
  0x23   : > { %v339_v61 = vmax.f32 %v303_v50, 0.0  ;;  %v307_v62 = vadd.f32 %v652_v1, %v264_v51  ;;  %v340_v4 = vmax.f32 %v304_v52, 0.0  ;;  %v341_v5 = vmax.f32 %v305_v53, 0.0 }
  0x24   : > { %v342_v6 = vmax.f32 %v306_v54, 0.0  ;;  %v308_v7 = vadd.f32 %v652_v1, %v265_v55  ;;  %373 = vst [vmem:[%s675_s5 + $0x40] sm:$0xff] %v337_v59  ;;  %374 = vst [vmem:[%s675_s5 + $0x48] sm:$0xff] %v338_v60  ;;  %v266_v10 = vmul.f32 %v642_v0, %v223_v56  ;;  %v267_v11 = vmul.f32 %v642_v0, %v224_v57  ;;  %v240_v59 = vld [vmem:[%s647_s27 + $0x108] sm:$0xff]  ;;  %v241_v60 = vld [vmem:[%s647_s27 + $0x110] sm:$0xff] }
  0x25   : > { %375 = vst [vmem:[%s675_s5 + $0x50] sm:$0xff] %v339_v61  ;;  %v343_v9 = vmax.f32 %v307_v62, 0.0  ;;  %v268_v12 = vmul.f32 %v642_v0, %v225_v58  ;;  %376 = vst [vmem:[%s675_s5 + $0x58] sm:$0xff] %v340_v4  ;;  %v269_v15 = vmul.f32 %v642_v0, %v226_v63  ;;  %v270_v16 = vmul.f32 %v642_v0, %v227_v2  ;;  %v239_v58 = vld [vmem:[%s647_s27 + $0x100] sm:$0xff] }
  0x26   : > { %377 = vst [vmem:[%s675_s5 + $0x60] sm:$0xff] %v341_v5  ;;  %378 = vst [vmem:[%s675_s5 + $0x68] sm:$0xff] %v342_v6  ;;  %v344_v14 = vmax.f32 %v308_v7, 0.0  ;;  %v271_v17 = vmul.f32 %v642_v0, %v228_v3  ;;  %v309_v18 = vadd.f32 %v652_v1, %v266_v10  ;;  %v310_v19 = vadd.f32 %v652_v1, %v267_v11  ;;  %v242_v3 = vld [vmem:[%s647_s27 + $0x118] sm:$0xff] }
  0x27   : > { %379 = vst [vmem:[%s675_s5 + $0x70] sm:$0xff] %v343_v9  ;;  %v311_v20 = vadd.f32 %v652_v1, %v268_v12  ;;  %v272_v21 = vmul.f32 %v642_v0, %v229_v8  ;;  %v312_v22 = vadd.f32 %v652_v1, %v269_v15  ;;  %v313_v23 = vadd.f32 %v652_v1, %v270_v16 }
  0x28   : > { %380 = vst [vmem:[%s675_s5 + $0x78] sm:$0xff] %v344_v14  ;;  %v314_v24 = vadd.f32 %v652_v1, %v271_v17  ;;  %v273_v25 = vmul.f32 %v642_v0, %v230_v13  ;;  %v345_v29 = vmax.f32 %v309_v18, 0.0  ;;  %v346_v30 = vmax.f32 %v310_v19, 0.0 }
  0x29   : > { %v347_v31 = vmax.f32 %v311_v20, 0.0  ;;  %v315_v32 = vadd.f32 %v652_v1, %v272_v21  ;;  %v348_v36 = vmax.f32 %v312_v22, 0.0  ;;  %v349_v37 = vmax.f32 %v313_v23, 0.0 }
  0x2a   : > { %v350_v38 = vmax.f32 %v314_v24, 0.0  ;;  %v316_v39 = vadd.f32 %v652_v1, %v273_v25  ;;  %381 = vst [vmem:[%s675_s5 + $0x80] sm:$0xff] %v345_v29  ;;  %382 = vst [vmem:[%s675_s5 + $0x88] sm:$0xff] %v346_v30  ;;  %v274_v42 = vmul.f32 %v642_v0, %v231_v26  ;;  %v275_v43 = vmul.f32 %v642_v0, %v232_v27 }
  0x2b   : > { %383 = vst [vmem:[%s675_s5 + $0x90] sm:$0xff] %v347_v31  ;;  %v351_v41 = vmax.f32 %v315_v32, 0.0  ;;  %v276_v44 = vmul.f32 %v642_v0, %v233_v28  ;;  %384 = vst [vmem:[%s675_s5 + $0x98] sm:$0xff] %v348_v36  ;;  %v277_v47 = vmul.f32 %v642_v0, %v234_v33  ;;  %v278_v48 = vmul.f32 %v642_v0, %v235_v34 }
  0x2c   : > { %385 = vst [vmem:[%s675_s5 + $0xa0] sm:$0xff] %v349_v37  ;;  %386 = vst [vmem:[%s675_s5 + $0xa8] sm:$0xff] %v350_v38  ;;  %v352_v46 = vmax.f32 %v316_v39, 0.0  ;;  %v279_v49 = vmul.f32 %v642_v0, %v236_v35  ;;  %v317_v50 = vadd.f32 %v652_v1, %v274_v42  ;;  %v318_v51 = vadd.f32 %v652_v1, %v275_v43 }
  0x2d   : > { %387 = vst [vmem:[%s675_s5 + $0xb0] sm:$0xff] %v351_v41  ;;  %v319_v52 = vadd.f32 %v652_v1, %v276_v44  ;;  %v280_v53 = vmul.f32 %v642_v0, %v237_v40  ;;  %v320_v54 = vadd.f32 %v652_v1, %v277_v47  ;;  %v321_v55 = vadd.f32 %v652_v1, %v278_v48 }
  0x2e   : > { %388 = vst [vmem:[%s675_s5 + $0xb8] sm:$0xff] %v352_v46  ;;  %v322_v56 = vadd.f32 %v652_v1, %v279_v49  ;;  %v281_v57 = vmul.f32 %v642_v0, %v238_v45  ;;  %v353_v61 = vmax.f32 %v317_v50, 0.0  ;;  %v354_v62 = vmax.f32 %v318_v51, 0.0 }
  0x2f   : > { %v355_v63 = vmax.f32 %v319_v52, 0.0  ;;  %v323_v2 = vadd.f32 %v652_v1, %v280_v53  ;;  %v356_v4 = vmax.f32 %v320_v54, 0.0  ;;  %v357_v5 = vmax.f32 %v321_v55, 0.0 }
  0x30   : > { %v358_v6 = vmax.f32 %v322_v56, 0.0  ;;  %v324_v7 = vadd.f32 %v652_v1, %v281_v57  ;;  %389 = vst [vmem:[%s675_s5 + $0xc0] sm:$0xff] %v353_v61  ;;  %390 = vst [vmem:[%s675_s5 + $0xc8] sm:$0xff] %v354_v62  ;;  %v282_v9 = vmul.f32 %v642_v0, %v239_v58  ;;  %v283_v10 = vmul.f32 %v642_v0, %v240_v59 }
  0x31   : > { %391 = vst [vmem:[%s675_s5 + $0xd0] sm:$0xff] %v355_v63  ;;  %v359_v8 = vmax.f32 %v323_v2, 0.0  ;;  %v284_v11 = vmul.f32 %v642_v0, %v241_v60  ;;  %392 = vst [vmem:[%s675_s5 + $0xd8] sm:$0xff] %v356_v4  ;;  %v285_v13 = vmul.f32 %v642_v0, %v242_v3 }
  0x32   : > { %393 = vst [vmem:[%s675_s5 + $0xe0] sm:$0xff] %v357_v5  ;;  %394 = vst [vmem:[%s675_s5 + $0xe8] sm:$0xff] %v358_v6  ;;  %v360_v12 = vmax.f32 %v324_v7, 0.0  ;;  %v325_v14 = vadd.f32 %v652_v1, %v282_v9  ;;  %v326_v15 = vadd.f32 %v652_v1, %v283_v10 }
  0x33   : > { %395 = vst [vmem:[%s675_s5 + $0xf0] sm:$0xff] %v359_v8  ;;  %v327_v16 = vadd.f32 %v652_v1, %v284_v11  ;;  %v328_v17 = vadd.f32 %v652_v1, %v285_v13 }
  0x34   : > { %396 = vst [vmem:[%s675_s5 + $0xf8] sm:$0xff] %v360_v12  ;;  %v361_v18 = vmax.f32 %v325_v14, 0.0  ;;  %v362_v19 = vmax.f32 %v326_v15, 0.0 }
  0x35   : > { %v363_v20 = vmax.f32 %v327_v16, 0.0  ;;  %v364_v21 = vmax.f32 %v328_v17, 0.0 }
  0x36   : > { %397 = vst [vmem:[%s675_s5 + $0x100] sm:$0xff] %v361_v18  ;;  %398 = vst [vmem:[%s675_s5 + $0x108] sm:$0xff] %v362_v19 }
  0x37   : > { %399 = vst [vmem:[%s675_s5 + $0x110] sm:$0xff] %v363_v20  ;;  %400 = vst [vmem:[%s675_s5 + $0x118] sm:$0xff] %v364_v21 }
  0x38 PF: > { %s13_s16 = sadd.s32 1, %s587_s16   ;;  %s822_s12 = smov %s579_s14 }
  0x39   : > { %p10_p7 = scmp.ge.s32.totalorder %s13_s16, 34   ;;  %s823_s13 = smov %s583_s15 }
  0x3a   : > { %s824_s14 = smov %s827_s17  ;;  %s825_s15 = smov %s831_s18 }
  0x3b   :  { %12 = sbr.rel (!%p10_p7) target bundleno = 3 (0x3), region = 62 }

// kernel: up_conv_forward.2
= control target key start
LH: loop header
LB: loop body
LE: loop exit
PB: predicated region body
PF: predicated region fallthrough
CT: control target
= control target key end

     0   :  { %s15473_s24 = smov 0   ;;  %s15475_s25 = smov 0   ;;  %s18222_s0 = inlined_call_operand.vmem [shape: f32[288,1], index: 0, kind: input, shape index: {}]   ;;  %s18223_s1 = inlined_call_operand.vmem [shape: bf16[2,18,328,4], index: 1, kind: input, shape index: {}, may-alias: {1,2,3}]   ;;  %s18224_s2 = inlined_call_operand.vmem [shape: bf16[2,18,328,4], index: 2, kind: input, shape index: {}, may-alias: {1,2,3}]   ;;  %s18225_s3 = inlined_call_operand.vmem [shape: bf16[2,18,328,4], index: 3, kind: input, shape index: {}, may-alias: {1,2,3}]   ;;  %s18226_s4 = inlined_call_operand.vmem [shape: bf16[27,4,128], index: 4, kind: input, shape index: {}]   ;;  %s18227_s5 = inlined_call_operand.vmem [shape: f32[1,128], index: 5, kind: input, shape index: {}]   ;;  %s18228_s6 = inlined_call_operand.vmem [shape: f32[2,16,288,128], index: 6, kind: output, shape index: {0}]   ;;  %s18229_s7 = inlined_call_operand.vmem [shape: f32[2,16,2,128], index: 7, kind: output, shape index: {1}]  }
   0x1   :  { %s15477_s26 = smov 0   ;;  %s15479_s27 = smov 0  }
   0x2   :  { %s15481_s28 = smov 0  }
   0x3 LB: > { %s27_s29 = sadd.s32 1, %s15422_s26  ;;  %s30_s30 = sadd.s32 1, %s15426_s27  ;;  %s15430_s28 = sphi %s15481_s28, %s18_s28   ;;  %s15426_s27 = sphi %s15479_s27, %s18233_s27   ;;  %s15422_s26 = sphi %s15477_s26, %s18232_s26   ;;  %s15418_s25 = sphi %s15475_s25, %s18231_s25   ;;  %s15414_s24 = sphi %s15473_s24, %s18230_s24  }
   0x4   : > { %p28_p0 = scmp.ge.s32.totalorder %s27_s29, 16  ;;  %p11820_p1 = scmp.ge.s32.totalorder %s15430_s28, 1 }
   0x5   : > { %p302_p2 = scmp.lt.s32.totalorder %s15430_s28, 33 }
   0x6   : > { %s18235_s29 = smov (%p28_p0, %s27_s29), 0  ;;  %s18237_s30 = smov (!%p28_p0, %s30_s30), %s15426_s27 }
   0x7   : > { %p303_p3 = pnand %p11820_p1, %p302_p2  ;;  %p32_p4 = scmp.ge.s32.totalorder %s18237_s30, 2 }
   0x8   : > { %v11827_v0 = vld [vmem:[%s18226_s4 + $0x2] sm:$0x3] (!%p303_p3)  ;;  %vm756_vm0 = vcmask (!%p303_p3), 1041408   ;;  %v12192_v1 = vld [vmem:[%s18226_s4 + $0x1a] sm:$0x3] (!%p303_p3)  ;;  %p370_p5 = scmp.lt.s32.totalorder (!%p303_p3), %s15418_s25, 1 }
   0x9   : > { %s18239_s30 = smov (%p32_p4, %s18237_s30), 0  ;;  %306 = sbr.rel (%p303_p3) target bundleno = 1247 (0x4df), region = 44 }
   0xa   : > { %15041 = vmatprep.subr.msk.bf16.mxu1 (!%p303_p3), %vm756_vm0, %v11827_v0  ;;  %15054 = vmatprep.subr.msk.bf16.mxu0 (!%p303_p3), %vm756_vm0, %v12192_v1  ;;  %v758_v2 = vsel (!%p303_p3), %vm756_vm0, %v11827_v0, 0  ;;  %v15515_v3 = vsel (!%p303_p3), %vm756_vm0, %v12192_v1, 0  ;;  %p372_p6 = scmp.lt.s32.totalorder (!%p303_p3), %s15414_s24, 17  ;;  %s379_s12 = sadd.s32 (!%p303_p3), 1, %s15414_s24  ;;  %v12212_v4 = vld [vmem:[%s18226_s4 + $0x1c] sm:$0x3] (!%p303_p3) }
   0xb   : > { %13078 = vmatpush3.bf16.msra.mxu1 (!%p303_p3), %v758_v2  ;;  %13572 = vmatpush3.bf16.msra.mxu0 (!%p303_p3), %v15515_v3  ;;  %v455_v5 = vld [vmem:[%s18226_s4] sm:$0x3] (!%p303_p3)  ;;  %p382_p7 = scmp.lt.s32.totalorder (!%p303_p3), %s379_s12, 17  ;;  %vm552_vm1 = vsmask.f32 (!%p303_p3), 7424  ;;  %vm701_vm2 = vcmask (!%p303_p3), 31744  }
   0xc   : > { %15056 = vmatprep.subr.msk.bf16.mxu0 (!%p303_p3), %vm756_vm0, %v12212_v4  ;;  %15042 = vmatprep.subr.msk.bf16.mxu1 (!%p303_p3), %vm756_vm0, %v455_v5  ;;  %v15541_v6 = vsel (!%p303_p3), %vm756_vm0, %v12212_v4, 0  ;;  %vm1912_vm3 = vsmask.f32 (!%p303_p3), 6400  ;;  %v974_v12 = vsel (!%p303_p3), %vm756_vm0, %v455_v5, 0  ;;  %v15590_v37 = vld [vmem:[%s18226_s4 + $0x4] sm:$0x3] (!%p303_p3) }
   0xd   : > { %v15615_v56 = vld [vmem:[%s18226_s4 + $0x1e] sm:$0x3] (!%p303_p3)  ;;  %vm2359_vm4 = vcmask (!%p303_p3), 1045504   ;;  %vm1159_vm5 = vcmask (!%p303_p3), 1046528   ;;  %vm3112_vm6 = vsmask.f32 (!%p303_p3), 5376 }
   0xe   : > { %vm3559_vm7 = vcmask (!%p303_p3), 1044480   ;;  %p403_p9 = scmp.lt.s32.totalorder (!%p303_p3), %s15414_s24, 15 }
  0x10   : > { %s18241_s25 = smov (!%p370_p5, %s15418_s25), 1  ;;  %s18243_s12 = smov (!%p382_p7, %s379_s12), 17 }
  0x11   : > { %s373_s15 = scalar_select %p372_p6, %s15414_s24, 17 }
  0x12   : > { %s15531_s18 = smul.u32 738, %s18241_s25 }
  0x13   : > { %s15069_s19 = smul.u32 41, %s373_s15 }
  0x14   : > { %s15071_s22 = smul.u32 41, %s18243_s12 }
  0x15   : > { %s376_s20 = sadd.s32 %s15531_s18, %s15069_s19 }
  0x16   : > { %s11821_s21 = sshll.u32 %s376_s20, 2  ;;  %s386_s10 = sadd.s32 %s15071_s22, %s15531_s18 }
  0x17   : > { %s15538_s9 = scalar_lea.vmem %s18223_s1, %s11821_s21  ;;  %s11822_s11 = sshll.u32 %s386_s10, 2 }
  0x18   : > { %v419_v7 = vld [vmem:[%s15538_s9] sm:$0xf]  ;;  %v420_v8 = vld [vmem:[%s15538_s9 + $0x4] sm:$0xf]  ;;  %v15549_v10 = vld [vmem:[%s15538_s9 + $0x8] sm:$0xff]   ;;  %s15554_s14 = scalar_lea.vmem %s18224_s2, %s11822_s11  ;;  %s390_s22 = sadd.s32 2, %s15414_s24 }
  0x19   : > { %v15546_v9 = vcombine.low %v419_v7, %v420_v8  ;;  %v15557_v11 = vld [vmem:[%s15538_s9 + $0x10] sm:$0xff]   ;;  %v561_v15 = vshll.u32 %v15549_v10, 16  ;;  %v565_v16 = vshrl.u32 %v15549_v10, 16  ;;  %v5128_v19 = vld [vmem:[%s15554_s14 + $0x8] sm:$0xe]  ;;  %v15573_v21 = vld [vmem:[%s15554_s14 + $0x18] sm:$0xff]  }
  0x1a   : > { %v15565_v17 = vld [vmem:[%s15554_s14 + $0x10] sm:$0xff]   ;;  %v569_v18 = vshll.u32 %v15557_v11, 16  ;;  %v15570_v20 = vld [vmem:[%s15554_s14 + $0xc] sm:$0xf]  ;;  %v5591_v34 = vshrl.u32 %v15573_v21, 16  ;;  %v5594_v35 = vshll.u32 %v15573_v21, 16 }
  0x1b   : > { %v554_v13 = vshrl.u32 %v15546_v9, 16  ;;  %v556_v14 = vshll.u32 %v15546_v9, 16  ;;  %v563_v23 = vrot.slane %v561_v15, 1  ;;  %v15576_v24 = vcombine.low %v5128_v19, %v15570_v20  ;;  %v15585_v36 = vld [vmem:[%s15538_s9 + $0x18] sm:$0xff]   ;;  %v15597_v46 = vld [vmem:[%s15538_s9 + $0x20] sm:$0xff]   ;;  %v15606_v51 = vld [vmem:[%s15554_s14 + $0x28] sm:$0xff]  }
  0x1c   : > { %v5582_v25 = vshrl.u32 %v15565_v17, 16  ;;  %v571_v26 = vrot.slane %v569_v18, 1  ;;  %v5585_v27 = vshll.u32 %v15565_v17, 16  ;;  %v5593_v43 = vrot.slane %v5591_v34, 1  ;;  %v15603_v50 = vld [vmem:[%s15554_s14 + $0x20] sm:$0xff]   ;;  %v15610_v55 = vld [vmem:[%s15538_s9 + $0x28] sm:$0xff]  }
  0x1d   : > { %v558_v22 = vrot.slane %v556_v14, 1  ;;  %v567_v29 = vor.u32 %v565_v16, %v563_v23  ;;  %v5574_v30 = vshrl.u32 %v15576_v24, 16  ;;  %v5577_v31 = vshll.u32 %v15576_v24, 16  ;;  %v15621_v61 = vld [vmem:[%s15538_s9 + $0x30] sm:$0xff]   ;;  %p393_p8 = scmp.lt.s32.totalorder %s390_s22, 17  ;;  %s18247_s24 = smov (!%p403_p9, %s15414_s24), 15 }
  0x1e   : > { %v5584_v32 = vrot.slane %v5582_v25, 1  ;;  %v5587_v33 = vrot.slane %v5585_v27, 2  ;;  %v5596_v44 = vrot.slane %v5594_v35, 2  ;;  %v573_v45 = vshrl.u32 %v15557_v11, 16  ;;  %v15630_v2 = vld [vmem:[%s15554_s14 + $0x30] sm:$0xff]   ;;  %v15645_v27 = vld [vmem:[%s15554_s14 + $0x38] sm:$0xff]  }
  0x1f   : > { %v559_v28 = vor.u32 %v558_v22, %v554_v13  ;;  %v572_v39 = vsel %vm552_vm1, %v567_v29, %v571_v26  ;;  %v5576_v40 = vrot.slane %v5574_v30, 1  ;;  %v5579_v41 = vrot.slane %v5577_v31, 2  ;;  %s18245_s22 = smov (!%p393_p8, %s390_s22), 17 }
  0x20   : > { %v5588_v42 = vor.u32 %v5587_v33, %v5584_v32  ;;  %v577_v48 = vshll.u32 %v15585_v36, 16  ;;  %v581_v49 = vshrl.u32 %v15585_v36, 16  ;;  %v5597_v52 = vor.u32 %v5596_v44, %v5593_v43  ;;  %s15072_s10 = smul.u32 41, %s18245_s22 }
  0x21   : > { %v564_v38 = vsel %vm552_vm1, %v559_v28, %v563_v23  ;;  %v5580_v47 = vor.u32 %v5579_v41, %v5576_v40  ;;  %v575_v53 = vor.u32 %v573_v45, %v571_v26  ;;  %v585_v54 = vshll.u32 %v15597_v46, 16  ;;  %v15648_v28 = vld [vmem:[%s15538_s9 + $0x38] sm:$0xff]  }
  0x22   : > { %13079 = vmatprep.mubr.msk.bf16.mxu1 %vm701_vm2, %v564_v38  ;;  %v579_v58 = vrot.slane %v577_v48, 1  ;;  %v5600_v59 = vshrl.u32 %v15603_v50, 16  ;;  %v5603_v60 = vshll.u32 %v15603_v50, 16  ;;  %v5598_v62 = vsel %vm1912_vm3, %v5588_v42, %v5597_v52  ;;  %v15657_v38 = vld [vmem:[%s15538_s9 + $0x40] sm:$0xff]   ;;  %s397_s11 = sadd.s32 %s15072_s10, %s15531_s18  ;;  %s11825_s10 = sshll.u32 %s18241_s25, 4 }
  0x23   : > { %13080 = vmatmul.mubr.msk.bf16.vlgmr.msra.gmra.mrb[0].mxu1 %vm701_vm2, %v572_v39  ;;  %v5589_v57 = vsel %vm1912_vm3, %v5580_v47, %v5588_v42  ;;  %v587_v63 = vrot.slane %v585_v54, 1  ;;  %v5609_v0 = vshrl.u32 %v15606_v51, 16  ;;  %v5612_v1 = vshll.u32 %v15606_v51, 16  ;;  %v15668_v48 = vld [vmem:[%s15554_s14 + $0x40] sm:$0xff]   ;;  %s11823_s12 = sshll.u32 %s397_s11, 2  ;;  %s415_s11 = sadd.s32 %s11825_s10, %s18247_s24 }
  0x24   : > { %13116 = vmatpush3.bf16.msra.mxu1 %v974_v12  ;;  %13573 = vmatprep.mubr.msk.bf16.mxu0 %vm701_vm2, %v5589_v57  ;;  %v580_v4 = vsel %vm552_vm1, %v575_v53, %v579_v58  ;;  %v583_v5 = vor.u32 %v581_v49, %v579_v58  ;;  %v5602_v7 = vrot.slane %v5600_v59, 1  ;;  %v5605_v8 = vrot.slane %v5603_v60, 2  ;;  %s15852_s16 = scalar_lea.vmem %s18225_s3, %s11823_s12  ;;  %s11826_s12 = sshll.u32 %s415_s11, 1 }
  0x25   : > { %15043 = vmatprep.subr.msk.bf16.mxu1 %vm756_vm0, %v15590_v37  ;;  %13574 = vmatmul.mubr.msk.bf16.vlgmr.msra.gmra.mrb[0].mxu0 %vm701_vm2, %v5598_v62  ;;  %v5611_v12 = vrot.slane %v5609_v0, 1  ;;  %v5614_v13 = vrot.slane %v5612_v1, 2  ;;  %v589_v14 = vshrl.u32 %v15597_v46, 16  ;;  %v593_v15 = vshll.u32 %v15610_v55, 16  ;;  %v15674_v62 = vld [vmem:[%s15554_s14 + $0x48] sm:$0xff]  }
  0x26   : > { %13610 = vmatpush3.bf16.msra.mxu0 %v15541_v6  ;;  %13083 = vmatprep.mubr.msk.bf16.mxu1 %vm701_vm2, %v580_v4  ;;  %v588_v16 = vsel %vm552_vm1, %v583_v5, %v587_v63  ;;  %v5606_v18 = vor.u32 %v5605_v8, %v5602_v7  ;;  %v597_v19 = vshrl.u32 %v15610_v55, 16  ;;  %v601_v22 = vshll.u32 %v15621_v61, 16  ;;  %v15682_v5 = vld [vmem:[%s15538_s9 + $0x50] sm:$0xff]  }
  0x27   : > { %15057 = vmatprep.subr.msk.bf16.mxu0 %vm756_vm0, %v15615_v56  ;;  %v5615_v6 = vor.u32 %v5614_v13, %v5611_v12  ;;  %v591_v23 = vor.u32 %v589_v14, %v587_v63  ;;  %v595_v25 = vrot.slane %v593_v15, 1  ;;  %v5618_v26 = vshrl.u32 %v15630_v2, 16  ;;  %v15677_v63 = vld [vmem:[%s15538_s9 + $0x48] sm:$0xff]  }
  0x28   : > { %v5607_v29 = vsel %vm1912_vm3, %v5597_v52, %v5606_v18  ;;  %v603_v30 = vrot.slane %v601_v22, 1  ;;  %v5621_v31 = vshll.u32 %v15630_v2, 16  ;;  %v5627_v40 = vshrl.u32 %v15645_v27, 16  ;;  %v15693_v22 = vld [vmem:[%s15554_s14 + $0x50] sm:$0xff]  }
  0x29   : > { %13577 = vmatprep.mubr.msk.bf16.mxu0 %vm701_vm2, %v5607_v29  ;;  %v5616_v32 = vsel %vm1912_vm3, %v5606_v18, %v5615_v6  ;;  %v596_v33 = vsel %vm552_vm1, %v591_v23, %v595_v25  ;;  %v599_v34 = vor.u32 %v597_v19, %v595_v25  ;;  %v5620_v35 = vrot.slane %v5618_v26, 1 }
  0x2a   : > { %v5623_v39 = vrot.slane %v5621_v31, 2  ;;  %v5630_v41 = vshll.u32 %v15645_v27, 16  ;;  %v605_v42 = vshrl.u32 %v15621_v61, 16  ;;  %v609_v44 = vshll.u32 %v15648_v28, 16 }
  0x2b   : > { %13084 = vmatmul.mubr.msk.bf16.gmra.mrb[4].mxu1 %vm701_vm2, %v588_v16  ;;  %v604_v43 = vsel %vm552_vm1, %v599_v34, %v603_v30  ;;  %v613_v45 = vshrl.u32 %v15648_v28, 16  ;;  %v617_v47 = vshll.u32 %v15657_v38, 16  ;;  %v5629_v52 = vrot.slane %v5627_v40, 1 }
  0x2c   : > { %13087 = vmatprep.mubr.msk.bf16.mxu1 %vm701_vm2, %v596_v33  ;;  %v5624_v49 = vor.u32 %v5623_v39, %v5620_v35  ;;  %v5632_v53 = vrot.slane %v5630_v41, 2  ;;  %v607_v54 = vor.u32 %v605_v42, %v603_v30  ;;  %v611_v57 = vrot.slane %v609_v44, 1  ;;  %v15702_v33 = vld [vmem:[%s15538_s9 + $0x58] sm:$0xff]  }
  0x2d   : > { %13578 = vmatmul.mubr.msk.bf16.gmra.mrb[4].mxu0 %vm701_vm2, %v5616_v32  ;;  %v619_v58 = vrot.slane %v617_v47, 1  ;;  %v5636_v59 = vshrl.u32 %v15668_v48, 16  ;;  %v5639_v60 = vshll.u32 %v15668_v48, 16  ;;  %v621_v4 = vshrl.u32 %v15657_v38, 16 }
  0x2e   : > { %v5625_v0 = vsel %vm1912_vm3, %v5615_v6, %v5624_v49  ;;  %v5633_v1 = vor.u32 %v5632_v53, %v5629_v52  ;;  %v612_v7 = vsel %vm552_vm1, %v607_v54, %v611_v57  ;;  %v5645_v13 = vshrl.u32 %v15674_v62, 16  ;;  %v15696_v6 = vld [vmem:[%s15554_s14 + $0x58] sm:$0xff]  }
  0x2f   : > { %13581 = vmatprep.mubr.msk.bf16.mxu0 %vm701_vm2, %v5625_v0  ;;  %v5638_v8 = vrot.slane %v5636_v59, 1  ;;  %v5641_v12 = vrot.slane %v5639_v60, 2  ;;  %v5648_v14 = vshll.u32 %v15674_v62, 16  ;;  %v615_v16 = vor.u32 %v613_v45, %v611_v57  ;;  %v15717_v57 = vld [vmem:[%s15538_s9 + $0x60] sm:$0xff]  }
  0x30   : > { %v5634_v15 = vsel %vm1912_vm3, %v5624_v49, %v5633_v1  ;;  %v625_v19 = vshll.u32 %v15677_v63, 16  ;;  %v5647_v23 = vrot.slane %v5645_v13, 1  ;;  %v623_v26 = vor.u32 %v621_v4, %v619_v58  ;;  %v6013_v49 = vld [vmem:[%s15554_s14 + $0x8] sm:$0xc] }
  0x31   : > { %v5642_v18 = vor.u32 %v5641_v12, %v5638_v8  ;;  %v5650_v25 = vrot.slane %v5648_v14, 2  ;;  %v5654_v31 = vshrl.u32 %v15693_v22, 16  ;;  %v5657_v32 = vshll.u32 %v15693_v22, 16  ;;  %v15724_v12 = vld [vmem:[%s15538_s9 + $0x68] sm:$0xff]  }
  0x32   : > { %v627_v30 = vrot.slane %v625_v19, 1  ;;  %v629_v34 = vshrl.u32 %v15677_v63, 16  ;;  %v633_v35 = vshll.u32 %v15682_v5, 16  ;;  %v5663_v39 = vshrl.u32 %v15696_v6, 16 }
  0x33   : > { %13088 = vmatmul.mubr.msk.bf16.gmra.mrb[8].mxu1 %vm701_vm2, %v604_v43  ;;  %v5643_v29 = vsel %vm1912_vm3, %v5633_v1, %v5642_v18  ;;  %v5666_v40 = vshll.u32 %v15696_v6, 16  ;;  %v620_v41 = vsel %vm552_vm1, %v615_v16, %v619_v58  ;;  %v5651_v42 = vor.u32 %v5650_v25, %v5647_v23 }
  0x34   : > { %13091 = vmatprep.mubr.msk.bf16.mxu1 %vm701_vm2, %v612_v7  ;;  %v5656_v43 = vrot.slane %v5654_v31, 1  ;;  %v5659_v44 = vrot.slane %v5657_v32, 2  ;;  %v628_v45 = vsel %vm552_vm1, %v623_v26, %v627_v30  ;;  %v637_v47 = vshrl.u32 %v15682_v5, 16 }
  0x35   : > { %13582 = vmatmul.mubr.msk.bf16.gmra.mrb[8].mxu0 %vm701_vm2, %v5634_v15  ;;  %v641_v53 = vshll.u32 %v15702_v33, 16  ;;  %v635_v54 = vrot.slane %v633_v35, 1  ;;  %v5652_v58 = vsel %vm1912_vm3, %v5642_v18, %v5651_v42  ;;  %v631_v59 = vor.u32 %v629_v34, %v627_v30  ;;  %v15746_v35 = vld [vmem:[%s15538_s9 + $0x78] sm:$0xff]  }
  0x36   : > { %13585 = vmatprep.mubr.msk.bf16.mxu0 %vm701_vm2, %v5643_v29  ;;  %v5660_v52 = vor.u32 %v5659_v44, %v5656_v43  ;;  %v5665_v60 = vrot.slane %v5663_v39, 1  ;;  %v5668_v0 = vrot.slane %v5666_v40, 2  ;;  %v12213_v8 = vcombine.low %v6013_v49, %v15570_v20  ;;  %v15739_v29 = vld [vmem:[%s15538_s9 + $0x70] sm:$0xff]  }
  0x37   : > { %v639_v4 = vor.u32 %v637_v47, %v635_v54  ;;  %v643_v7 = vrot.slane %v641_v53, 1  ;;  %v649_v13 = vshll.u32 %v15717_v57, 16  ;;  %v636_v14 = vsel %vm552_vm1, %v631_v59, %v635_v54  ;;  %v15765_v54 = vld [vmem:[%s15538_s9 + $0x88] sm:$0xff]  }
  0x38   : > { %v5661_v1 = vsel %vm1912_vm3, %v5651_v42, %v5660_v52  ;;  %v15730_v15 = vor.u32 %v5668_v0, %v5665_v60  ;;  %v645_v16 = vshrl.u32 %v15702_v33, 16  ;;  %v6020_v18 = vrot.slane %v15565_v17, 2  ;;  %v15773_v0 = vld [vmem:[%s18226_s4 + $0x20] sm:$0x3] }
  0x39   : > { %v644_v20 = vsel %vm552_vm1, %v639_v4, %v643_v7  ;;  %v6019_v19 = vrot.slane %v12213_v8, 2  ;;  %v653_v23 = vshrl.u32 %v15717_v57, 16  ;;  %v657_v25 = vshll.u32 %v15724_v12, 16 }
  0x3a   : > { %v651_v26 = vrot.slane %v649_v13, 1  ;;  %v5670_v30 = vsel %vm1912_vm3, %v5660_v52, %v15730_v15  ;;  %v647_v31 = vor.u32 %v645_v16, %v643_v7  ;;  %v665_v39 = vshll.u32 %v15739_v29, 16  ;;  %v15760_v52 = vld [vmem:[%s15538_s9 + $0x80] sm:$0xff]  }
  0x3b   : > { %13092 = vmatmul.mubr.msk.bf16.gmra.mrb[12].mxu1 %vm701_vm2, %v620_v41  ;;  %v6021_v17 = vsel %vm2359_vm4, %v6019_v19, %v6020_v18  ;;  %v659_v34 = vrot.slane %v657_v25, 1  ;;  %v6022_v41 = vrot.slane %v15573_v21, 2  ;;  %v661_v42 = vshrl.u32 %v15724_v12, 16 }
  0x3c   : > { %13095 = vmatprep.mubr.msk.bf16.mxu1 %vm701_vm2, %v628_v45  ;;  %v655_v32 = vor.u32 %v653_v23, %v651_v26  ;;  %v652_v40 = vsel %vm552_vm1, %v647_v31, %v651_v26  ;;  %v6024_v43 = vrot.slane %v15603_v50, 2  ;;  %v669_v45 = vshrl.u32 %v15739_v29, 16 }
  0x3d   : > { %13586 = vmatmul.mubr.msk.bf16.gmra.mrb[12].mxu0 %vm701_vm2, %v5652_v58  ;;  %v673_v47 = vshll.u32 %v15746_v35, 16  ;;  %v667_v49 = vrot.slane %v665_v39, 1  ;;  %v6023_v53 = vsel %vm2359_vm4, %v6020_v18, %v6022_v41  ;;  %v663_v21 = vor.u32 %v661_v42, %v659_v34 }
  0x3e   : > { %13589 = vmatprep.mubr.msk.bf16.mxu0 %vm701_vm2, %v5661_v1  ;;  %v660_v44 = vsel %vm552_vm1, %v655_v32, %v659_v34  ;;  %v6550_v50 = vsel %vm756_vm0, %v15615_v56, 0  ;;  %v6025_v58 = vsel %vm2359_vm4, %v6022_v41, %v6024_v43  ;;  %v6026_v1 = vrot.slane %v15606_v51, 2  ;;  %v15148_v51 = vld [vmem:[%s15538_s9 + $0x90] ss:$0 sps:$4 sm:$0x11]  }
  0x3f   : > { %v671_v59 = vor.u32 %v669_v45, %v667_v49  ;;  %v675_v60 = vrot.slane %v673_v47, 1  ;;  %v677_v4 = vshrl.u32 %v15746_v35, 16  ;;  %v681_v7 = vshll.u32 %v15760_v52, 16  ;;  %v15149_v47 = vld [vmem:[%s15554_s14 + $0x60] sm:$0xff]  }
  0x40   : > { %v6028_v56 = vrot.slane %v15630_v2, 2  ;;  %v668_v8 = vsel %vm552_vm1, %v663_v21, %v667_v49  ;;  %v685_v13 = vshrl.u32 %v15760_v52, 16  ;;  %v6027_v2 = vsel %vm2359_vm4, %v6024_v43, %v6026_v1  ;;  %v15151_v21 = vld [vmem:[%s15554_s14 + $0x70] sm:$0xff]  }
  0x41   : > { %v676_v16 = vsel %vm552_vm1, %v671_v59, %v675_v60  ;;  %v683_v18 = vrot.slane %v681_v7, 1  ;;  %v693_v31 = vshrl.u32 %v15765_v54, 16  ;;  %v6032_v34 = vrot.slane %v15668_v48, 2 }
  0x42   : > { %v6029_v19 = vsel %vm2359_vm4, %v6026_v1, %v6028_v56  ;;  %v6034_v48 = vrot.slane %v15674_v62, 2  ;;  %v6036_v43 = vrot.slane %v15693_v22, 2  ;;  %v6038_v62 = vrot.slane %v15696_v6, 2 }
  0x43   : > { %13096 = vmatmul.mubr.msk.bf16.gmra.mrb[16].mxu1 %vm701_vm2, %v636_v14  ;;  %v689_v14 = vshll.u32 %v15765_v54, 16  ;;  %v687_v23 = vor.u32 %v685_v13, %v683_v18  ;;  %v1252_v22 = vsel %vm756_vm0, %v15590_v37, 0  ;;  %v6040_v49 = vrot.slane %v15149_v47, 2  ;;  %v15150_v37 = vld [vmem:[%s15554_s14 + $0x68] sm:$0xff]  }
  0x44   : > { %13099 = vmatprep.mubr.msk.bf16.mxu1 %vm701_vm2, %v644_v20  ;;  %v679_v20 = vor.u32 %v677_v4, %v675_v60  ;;  %v6037_v45 = vsel %vm2359_vm4, %v6034_v48, %v6036_v43 }
  0x45   : > { %13590 = vmatmul.mubr.msk.bf16.gmra.mrb[16].mxu0 %vm701_vm2, %v5670_v30  ;;  %v691_v25 = vrot.slane %v689_v14, 1  ;;  %v6030_v30 = vrot.slane %v15645_v27, 2  ;;  %v6041_v6 = vsel %vm2359_vm4, %v6038_v62, %v6040_v49  ;;  %v6326_v14 = vld [vmem:[%s15554_s14 + $0x10] sm:$0xc] }
  0x46   : > { %13611 = vmatprep.mubr.msk.bf16.mxu0 %vm701_vm2, %v6021_v17  ;;  %v684_v26 = vsel %vm552_vm1, %v679_v20, %v683_v18  ;;  %v697_v17 = vshll.u32 %v15148_v51, 16  ;;  %v6327_v51 = vld [vmem:[%s15554_s14 + $0x14] sm:$0xf] }
  0x47   : > { %v692_v32 = vsel %vm552_vm1, %v687_v23, %v691_v25  ;;  %v6031_v39 = vsel %vm2359_vm4, %v6028_v56, %v6030_v30  ;;  %v6033_v42 = vsel %vm2359_vm4, %v6030_v30, %v6032_v34  ;;  %v15882_v23 = vld [vmem:[%s15554_s14 + $0x20] sm:$0xff]  }
  0x48   : > { %v699_v41 = vrot.slane %v697_v17, 1  ;;  %v6461_v30 = vrot.slane %v15882_v23, 2  ;;  %v15900_v17 = vld [vmem:[%s15554_s14 + $0x30] sm:$0xff]  }
  0x4b   : > { %13100 = vmatmul.mubr.msk.bf16.gmra.mrb[20].mxu1 %vm701_vm2, %v652_v40  ;;  %v695_v40 = vor.u32 %v693_v31, %v691_v25 }
  0x4c   : > { %13103 = vmatprep.mubr.msk.bf16.mxu1 %vm701_vm2, %v660_v44  ;;  %v6035_v44 = vsel %vm2359_vm4, %v6032_v34, %v6034_v48 }
  0x4d   : > { %13612 = vmatmul.mubr.msk.bf16.vlgmr.msra.gmra.mrb[0].mxu0 %vm701_vm2, %v6023_v53  ;;  %v700_v27 = vsel %vm552_vm1, %v695_v40, %v699_v41  ;;  %v6039_v53 = vsel %vm2359_vm4, %v6036_v43, %v6038_v62  ;;  %v15928_v40 = vld [vmem:[%s15554_s14 + $0x48] sm:$0xff]   ;;  %v1153_v41 = vld [vmem:[%s15538_s9] sm:$0xe]  ;;  %v15340_v43 = vld [vmem:[%s15538_s9 + $0x4] sm:$0xf] }
  0x4e   : > { %13648 = vmatpush3.bf16.msra.mxu0 %v6550_v50  ;;  %13615 = vmatprep.mubr.msk.bf16.mxu0 %vm701_vm2, %v6025_v58  ;;  %v6044_v50 = vrot.slane %v15151_v21, 2  ;;  %v15153_v58 = vld [vmem:[%s15554_s14 + $0x80] sm:$0xff]   ;;  %v15342_v21 = vld [vmem:[%s15538_s9 + $0x10] sm:$0xff]  }
  0x4f   : > { %15058 = vmatprep.subr.msk.bf16.mxu0 %vm756_vm0, %v15773_v0  ;;  %v6048_v4 = vrot.slane %v15153_v58, 2  ;;  %v15966_v58 = vld [vmem:[%s15554_s14 + $0x68] sm:$0xff]  }
  0x53   : > { %13104 = vmatmul.mubr.msk.bf16.gmra.mrb[24].mxu1 %vm701_vm2, %v668_v8 }
  0x54   : > { %13107 = vmatprep.mubr.msk.bf16.mxu1 %vm701_vm2, %v676_v16  ;;  %v15156_v16 = vld [vmem:[%s15554_s14 + $0x98] ss:$0 sps:$4 sm:$0x33]  }
  0x55   : > { %13616 = vmatmul.mubr.msk.bf16.gmra.mrb[4].mxu0 %vm701_vm2, %v6027_v2  ;;  %v15875_v2 = vcombine.low %v6326_v14, %v6327_v51  ;;  %v6054_v20 = vrot.slane %v15156_v16, 2  ;;  %v15345_v14 = vld [vmem:[%s15538_s9 + $0x28] sm:$0xff]  }
  0x56   : > { %13619 = vmatprep.mubr.msk.bf16.mxu0 %vm701_vm2, %v6029_v19  ;;  %v1169_v16 = vrot.slane %v15345_v14, 1 }
  0x5b   : > { %13108 = vmatmul.mubr.msk.bf16.gmra.mrb[28].mxu1 %vm701_vm2, %v684_v26 }
  0x5c   : > { %13111 = vmatprep.mubr.msk.bf16.mxu1 %vm701_vm2, %v692_v32 }
  0x5d   : > { %13620 = vmatmul.mubr.msk.bf16.gmra.mrb[8].mxu0 %vm701_vm2, %v6031_v39 }
  0x5e   : > { %13623 = vmatprep.mubr.msk.bf16.mxu0 %vm701_vm2, %v6033_v42 }
  0x63   : > { %13112 = vmatmul.mubr.msk.bf16.gmra.mrb[32].mxu1 %vm701_vm2, %v700_v27 }
  0x64   : > { %13117 = vmatprep.mubr.msk.bf16.mxu1 %vm701_vm2, %v15546_v9  ;;  %v15823_v9 = vld [vmem:[%s18226_s4 + $0x6] sm:$0x3] }
  0x65   : > { %13624 = vmatmul.mubr.msk.bf16.gmra.mrb[12].mxu0 %vm701_vm2, %v6035_v44  ;;  %v11884_v44 = vcombine.low %v1153_v41, %v15340_v43 }
  0x66   : > { %13627 = vmatprep.mubr.msk.bf16.mxu0 %vm701_vm2, %v6037_v45  ;;  %v15943_v45 = vld [vmem:[%s15554_s14 + $0x50] sm:$0xff]  }
  0x6b   : > { %13118 = vmatmul.mubr.msk.bf16.vlgmr.msra.gmra.mrb[0].mxu1 %vm701_vm2, %v15549_v10  ;;  %v6042_v10 = vrot.slane %v15150_v37, 2 }
  0x6c   : > { %13121 = vmatprep.mubr.msk.bf16.mxu1 %vm701_vm2, %v15557_v11  ;;  %13154 = vmatpush3.bf16.msra.mxu1 %v1252_v22  ;;  %v15152_v11 = vld [vmem:[%s15554_s14 + $0x78] sm:$0xff]   ;;  %v1160_v22 = vrot.slane %v11884_v44, 1 }
  0x6d   : > { %15044 = vmatprep.subr.msk.bf16.mxu1 %vm756_vm0, %v15823_v9  ;;  %13628 = vmatmul.mubr.msk.bf16.gmra.mrb[16].mxu0 %vm701_vm2, %v6039_v53  ;;  %v6043_v59 = vsel %vm2359_vm4, %v6040_v49, %v6042_v10  ;;  %v6045_v60 = vsel %vm2359_vm4, %v6042_v10, %v6044_v50  ;;  %v6046_v1 = vrot.slane %v15152_v11, 2  ;;  %v15950_v49 = vld [vmem:[%s15554_s14 + $0x58] sm:$0xff]   ;;  %v1163_v10 = vrot.slane %v15342_v21, 1 }
  0x6e   : > { %13631 = vmatprep.mubr.msk.bf16.mxu0 %vm701_vm2, %v6041_v6  ;;  %v6475_v37 = vrot.slane %v15950_v49, 2 }
  0x6f   : > { %v6047_v7 = vsel %vm2359_vm4, %v6044_v50, %v6046_v1  ;;  %v6049_v56 = vsel %vm2359_vm4, %v6046_v1, %v6048_v4  ;;  %v15960_v50 = vld [vmem:[%s15554_s14 + $0x60] sm:$0xff]  }
  0x70   : > { %v6477_v1 = vrot.slane %v15960_v50, 2 }
  0x72   : > { %v6478_v51 = vsel %vm2359_vm4, %v6475_v37, %v6477_v1 }
  0x73   : > { %13122 = vmatmul.mubr.msk.bf16.gmra.mrb[4].mxu1 %vm701_vm2, %v15585_v36  ;;  %v15154_v36 = vld [vmem:[%s15554_s14 + $0x88] sm:$0xff]  }
  0x74   : > { %13125 = vmatprep.mubr.msk.bf16.mxu1 %vm701_vm2, %v15597_v46  ;;  %v15155_v46 = vld [vmem:[%s15554_s14 + $0x90] sm:$0xff]   ;;  %v6050_v8 = vrot.slane %v15154_v36, 2 }
  0x75   : > { %13632 = vmatmul.mubr.msk.bf16.gmra.mrb[20].mxu0 %vm701_vm2, %v6043_v59  ;;  %v6052_v13 = vrot.slane %v15155_v46, 2  ;;  %v1691_v46 = vsel %vm756_vm0, %v15823_v9, 0  ;;  %v15991_v9 = vld [vmem:[%s15554_s14 + $0x78] sm:$0xff]  }
  0x76   : > { %13635 = vmatprep.mubr.msk.bf16.mxu0 %vm701_vm2, %v6045_v60 }
  0x77   : > { %v6053_v18 = vsel %vm2359_vm4, %v6050_v8, %v6052_v13  ;;  %v6055_v25 = vsel %vm2359_vm4, %v6052_v13, %v6054_v20  ;;  %v15986_v13 = vld [vmem:[%s18226_s4 + $0x8] sm:$0x3] }
  0x7b   : > { %13126 = vmatmul.mubr.msk.bf16.gmra.mrb[8].mxu1 %vm701_vm2, %v15610_v55  ;;  %v6051_v55 = vsel %vm2359_vm4, %v6048_v4, %v6050_v8  ;;  %v15344_v4 = vld [vmem:[%s15538_s9 + $0x20] sm:$0xff]   ;;  %v15981_v8 = vld [vmem:[%s15554_s14 + $0x70] sm:$0xff]  }
  0x7c   : > { %13129 = vmatprep.mubr.msk.bf16.mxu1 %vm701_vm2, %v15621_v61  ;;  %v15872_v61 = vld [vmem:[%s15554_s14 + $0x18] sm:$0xff]   ;;  %v1167_v36 = vrot.slane %v15344_v4, 1 }
  0x7d   : > { %13636 = vmatmul.mubr.msk.bf16.gmra.mrb[24].mxu0 %vm701_vm2, %v6047_v7  ;;  %v6459_v19 = vrot.slane %v15872_v61, 2  ;;  %v6783_v4 = vshll.u32 %v15872_v61, 16 }
  0x7e   : > { %13639 = vmatprep.mubr.msk.bf16.mxu0 %vm701_vm2, %v6049_v56 }
  0x7f   : > { %v6462_v32 = vsel %vm2359_vm4, %v6459_v19, %v6461_v30 }
  0x83   : > { %13130 = vmatmul.mubr.msk.bf16.gmra.mrb[12].mxu1 %vm701_vm2, %v15648_v28  ;;  %v6458_v28 = vrot.slane %v15875_v2, 2 }
  0x84   : > { %13133 = vmatprep.mubr.msk.bf16.mxu1 %vm701_vm2, %v15657_v38  ;;  %v15887_v38 = vld [vmem:[%s15554_s14 + $0x28] sm:$0xff]  }
  0x85   : > { %13640 = vmatmul.mubr.msk.bf16.gmra.mrb[28].mxu0 %vm701_vm2, %v6051_v55  ;;  %v6460_v26 = vsel %vm2359_vm4, %v6458_v28, %v6459_v19  ;;  %v6463_v31 = vrot.slane %v15887_v38, 2  ;;  %v1170_v28 = vsel %vm1159_vm5, %v1167_v36, %v1169_v16  ;;  %v15346_v19 = vld [vmem:[%s15538_s9 + $0x30] sm:$0xff]  }
  0x86   : > { %13643 = vmatprep.mubr.msk.bf16.mxu0 %vm701_vm2, %v6053_v18  ;;  %v6481_v18 = vrot.slane %v15981_v8, 2 }
  0x87   : > { %v6464_v34 = vsel %vm2359_vm4, %v6461_v30, %v6463_v31  ;;  %v16006_v30 = vld [vmem:[%s15554_s14 + $0x80] sm:$0xff]  }
  0x8b   : > { %13134 = vmatmul.mubr.msk.bf16.gmra.mrb[16].mxu1 %vm701_vm2, %v15677_v63  ;;  %v6996_v63 = vsel %vm756_vm0, %v15773_v0, 0  ;;  %v15914_v0 = vld [vmem:[%s18226_s4 + $0x22] sm:$0x3] }
  0x8c   : > { %13137 = vmatprep.mubr.msk.bf16.mxu1 %vm701_vm2, %v15682_v5  ;;  %v15905_v5 = vld [vmem:[%s15554_s14 + $0x38] sm:$0xff]  }
  0x8d   : > { %13644 = vmatmul.mubr.msk.bf16.gmra.mrb[32].mxu0 %vm701_vm2, %v6055_v25  ;;  %v6467_v39 = vrot.slane %v15905_v5, 2  ;;  %v1171_v25 = vrot.slane %v15346_v19, 1  ;;  %v6798_v19 = vshrl.u32 %v15887_v38, 16 }
  0x8e   : > { %13649 = vmatprep.mubr.msk.bf16.mxu0 %vm701_vm2, %v6460_v26  ;;  %v6483_v26 = vrot.slane %v15991_v9, 2 }
  0x8f   : > { %v1172_v41 = vsel %vm1159_vm5, %v1169_v16, %v1171_v25  ;;  %v6792_v16 = vshll.u32 %v15882_v23, 16 }
  0x93   : > { %13138 = vmatmul.mubr.msk.bf16.gmra.mrb[20].mxu1 %vm701_vm2, %v15702_v33  ;;  %v6465_v33 = vrot.slane %v15900_v17, 2 }
  0x94   : > { %13141 = vmatprep.mubr.msk.bf16.mxu1 %vm701_vm2, %v15717_v57  ;;  %v15923_v57 = vld [vmem:[%s15554_s14 + $0x40] sm:$0xff]  }
  0x95   : > { %13650 = vmatmul.mubr.msk.bf16.vlgmr.msra.gmra.mrb[0].mxu0 %vm701_vm2, %v6462_v32  ;;  %v6466_v42 = vsel %vm2359_vm4, %v6463_v31, %v6465_v33  ;;  %v6468_v27 = vsel %vm2359_vm4, %v6465_v33, %v6467_v39  ;;  %v6469_v48 = vrot.slane %v15923_v57, 2  ;;  %v15347_v31 = vld [vmem:[%s15538_s9 + $0x38] sm:$0xff]   ;;  %v16011_v32 = vld [vmem:[%s15554_s14 + $0x88] sm:$0xff]   ;;  %v6484_v33 = vsel %vm2359_vm4, %v6481_v18, %v6483_v26 }
  0x96   : > { %13686 = vmatpush3.bf16.msra.mxu0 %v6996_v63  ;;  %13653 = vmatprep.mubr.msk.bf16.mxu0 %vm701_vm2, %v6464_v34  ;;  %v1173_v63 = vrot.slane %v15347_v31, 1  ;;  %v6487_v43 = vrot.slane %v16011_v32, 2  ;;  %v6794_v31 = vrot.slane %v6792_v16, 3 }
  0x97   : > { %15059 = vmatprep.subr.msk.bf16.mxu0 %vm756_vm0, %v15914_v0  ;;  %v6470_v62 = vsel %vm2359_vm4, %v6467_v39, %v6469_v48  ;;  %v16018_v39 = vld [vmem:[%s15554_s14 + $0x90] sm:$0xff]  }
  0x98   : > { %v1174_v44 = vsel %vm1159_vm5, %v1171_v25, %v1173_v63  ;;  %v6801_v25 = vshll.u32 %v15887_v38, 16  ;;  %v6800_v38 = vrot.slane %v6798_v19, 2 }
  0x9b   : > { %13142 = vmatmul.mubr.msk.bf16.gmra.mrb[24].mxu1 %vm701_vm2, %v15724_v12  ;;  %v6471_v12 = vrot.slane %v15928_v40, 2 }
  0x9c   : > { %13145 = vmatprep.mubr.msk.bf16.mxu1 %vm701_vm2, %v15739_v29  ;;  %v15341_v29 = vld [vmem:[%s15538_s9 + $0x8] sm:$0xff]  }
  0x9d   : > { %13654 = vmatmul.mubr.msk.bf16.gmra.mrb[4].mxu0 %vm701_vm2, %v6466_v42  ;;  %v1161_v47 = vrot.slane %v15341_v29, 1  ;;  %v6472_v53 = vsel %vm2359_vm4, %v6469_v48, %v6471_v12  ;;  %v6485_v42 = vrot.slane %v16006_v30, 2 }
  0x9e   : > { %13657 = vmatprep.mubr.msk.bf16.mxu0 %vm701_vm2, %v6468_v27  ;;  %v15348_v27 = vld [vmem:[%s15538_s9 + $0x40] sm:$0xff]  }
  0x9f   : > { %v1162_v6 = vsel %vm1159_vm5, %v1160_v22, %v1161_v47  ;;  %v1164_v7 = vsel %vm1159_vm5, %v1161_v47, %v1163_v10  ;;  %v1175_v48 = vrot.slane %v15348_v27, 1  ;;  %v16028_v47 = vld [vmem:[%s15554_s14 + $0x98] sm:$0xff]   ;;  %v15350_v22 = vld [vmem:[%s15538_s9 + $0x50] sm:$0xff]   ;;  %v6803_v27 = vrot.slane %v6801_v25, 3  ;;  %v16104_v25 = vld [vmem:[%s15538_s9 + $0xc] sm:$0xf] }
  0xa0   : > { %v6491_v21 = vrot.slane %v16028_v47, 2 }
  0xa3   : > { %13146 = vmatmul.mubr.msk.bf16.gmra.mrb[28].mxu1 %vm701_vm2, %v15746_v35  ;;  %v6473_v35 = vrot.slane %v15943_v45, 2 }
  0xa4   : > { %13149 = vmatprep.mubr.msk.bf16.mxu1 %vm701_vm2, %v15760_v52  ;;  %v15343_v52 = vld [vmem:[%s15538_s9 + $0x18] sm:$0xff]  }
  0xa5   : > { %13658 = vmatmul.mubr.msk.bf16.gmra.mrb[8].mxu0 %vm701_vm2, %v6470_v62  ;;  %v1165_v11 = vrot.slane %v15343_v52, 1  ;;  %v6474_v59 = vsel %vm2359_vm4, %v6471_v12, %v6473_v35  ;;  %v6476_v60 = vsel %vm2359_vm4, %v6473_v35, %v6475_v37  ;;  %v15349_v12 = vld [vmem:[%s15538_s9 + $0x48] sm:$0xff]   ;;  %v6489_v62 = vrot.slane %v16018_v39, 2 }
  0xa6   : > { %13661 = vmatprep.mubr.msk.bf16.mxu0 %vm701_vm2, %v6472_v53  ;;  %v1177_v29 = vrot.slane %v15349_v12, 1  ;;  %v1179_v53 = vrot.slane %v15350_v22, 1  ;;  %v6486_v35 = vsel %vm2359_vm4, %v6483_v26, %v6485_v42  ;;  %v6488_v37 = vsel %vm2359_vm4, %v6485_v42, %v6487_v43 }
  0xa7   : > { %v1166_v56 = vsel %vm1159_vm5, %v1163_v10, %v1165_v11  ;;  %v1168_v20 = vsel %vm1159_vm5, %v1165_v11, %v1167_v36  ;;  %v15351_v10 = vld [vmem:[%s15538_s9 + $0x58] sm:$0xff]   ;;  %v6772_v11 = vshrl.u32 %v15875_v2, 16  ;;  %v6810_v42 = vshll.u32 %v15900_v17, 16 }
  0xa8   : > { %v1181_v52 = vrot.slane %v15351_v10, 1  ;;  %v1178_v36 = vsel %vm1159_vm5, %v1175_v48, %v1177_v29  ;;  %v6804_v10 = vor.u32 %v6803_v27, %v6800_v38  ;;  %v6855_v38 = vshll.u32 %v15950_v49, 16  ;;  %v15358_v27 = vld [vmem:[%s15538_s9 + $0x90] ss:$0 sps:$4 sm:$0x11]  }
  0xa9   : > { %v6774_v14 = vrot.slane %v6772_v11, 2  ;;  %v6825_v11 = vshrl.u32 %v15923_v57, 16 }
  0xaa   : > { %v1182_v26 = vsel %vm1159_vm5, %v1179_v53, %v1181_v52 }
  0xab   : > { %13150 = vmatmul.mubr.msk.bf16.gmra.mrb[32].mxu1 %vm701_vm2, %v15765_v54  ;;  %v6479_v54 = vrot.slane %v15966_v58, 2 }
  0xac   : > { %13155 = vmatprep.mubr.msk.bf16.mxu1 %vm701_vm2, %v1162_v6  ;;  %v15176_v6 = vld [vmem:[%s15554_s14 + $0xa0] ss:$0 sps:$4 sm:$0x33]  }
  0xad   : > { %13662 = vmatmul.mubr.msk.bf16.gmra.mrb[12].mxu0 %vm701_vm2, %v6474_v59  ;;  %v6480_v55 = vsel %vm2359_vm4, %v6477_v1, %v6479_v54  ;;  %v6482_v34 = vsel %vm2359_vm4, %v6479_v54, %v6481_v18  ;;  %v6775_v59 = vshll.u32 %v15875_v2, 16  ;;  %v6780_v1 = vshrl.u32 %v15872_v61, 16  ;;  %v15352_v54 = vld [vmem:[%s15538_s9 + $0x60] sm:$0xff]  }
  0xae   : > { %13665 = vmatprep.mubr.msk.bf16.mxu0 %vm701_vm2, %v6476_v60  ;;  %v1176_v60 = vsel %vm1159_vm5, %v1173_v63, %v1175_v48  ;;  %v6492_v18 = vsel %vm2359_vm4, %v6489_v62, %v6491_v21  ;;  %v15353_v63 = vld [vmem:[%s15538_s9 + $0x68] sm:$0xff]  }
  0xaf   : > { %v6777_v2 = vrot.slane %v6775_v59, 3  ;;  %v6782_v61 = vrot.slane %v6780_v1, 2  ;;  %v6828_v59 = vshll.u32 %v15923_v57, 16  ;;  %v6834_v57 = vshrl.u32 %v15928_v40, 16 }
  0xb3   : > { %13156 = vmatmul.mubr.msk.bf16.vlgmr.msra.gmra.mrb[0].mxu1 %vm701_vm2, %v1164_v7  ;;  %v6789_v7 = vshrl.u32 %v15882_v23, 16  ;;  %v1180_v23 = vsel %vm1159_vm5, %v1177_v29, %v1179_v53 }
  0xb4   : > { %13159 = vmatprep.mubr.msk.bf16.mxu1 %vm701_vm2, %v1166_v56  ;;  %13192 = vmatpush3.bf16.msra.mxu1 %v1691_v46  ;;  %v1183_v46 = vrot.slane %v15352_v54, 1  ;;  %v6493_v56 = vrot.slane %v15176_v6, 2 }
  0xb5   : > { %15045 = vmatprep.subr.msk.bf16.mxu1 %vm756_vm0, %v15986_v13  ;;  %13666 = vmatmul.mubr.msk.bf16.gmra.mrb[16].mxu0 %vm701_vm2, %v6478_v51  ;;  %v6490_v51 = vsel %vm2359_vm4, %v6487_v43, %v6489_v62  ;;  %v6816_v62 = vshrl.u32 %v15905_v5, 16 }
  0xb6   : > { %13669 = vmatprep.mubr.msk.bf16.mxu0 %vm701_vm2, %v6480_v55  ;;  %v6785_v55 = vrot.slane %v6783_v4, 3  ;;  %v6494_v48 = vsel %vm2359_vm4, %v6491_v21, %v6493_v56  ;;  %v1184_v22 = vsel %vm1159_vm5, %v1181_v52, %v1183_v46  ;;  %v16086_v4 = vld [vmem:[%s18226_s4 + $0x24] sm:$0x3] }
  0xbb   : > { %13160 = vmatmul.mubr.msk.bf16.gmra.mrb[4].mxu1 %vm701_vm2, %v1168_v20  ;;  %v6791_v20 = vrot.slane %v6789_v7, 2  ;;  %v15356_v7 = vld [vmem:[%s15538_s9 + $0x80] sm:$0xff]  }
  0xbc   : > { %13163 = vmatprep.mubr.msk.bf16.mxu1 %vm701_vm2, %v1170_v28  ;;  %v7309_v28 = vsel %vm756_vm0, %v15914_v0, 0  ;;  %v6807_v0 = vshrl.u32 %v15900_v17, 16  ;;  %v6819_v17 = vshll.u32 %v15905_v5, 16  ;;  %v1191_v56 = vrot.slane %v15356_v7, 1 }
  0xbd   : > { %13670 = vmatmul.mubr.msk.bf16.gmra.mrb[20].mxu0 %vm701_vm2, %v6482_v34  ;;  %v1185_v34 = vrot.slane %v15353_v63, 1  ;;  %v6795_v53 = vor.u32 %v6794_v31, %v6791_v20 }
  0xbe   : > { %13673 = vmatprep.mubr.msk.bf16.mxu0 %vm701_vm2, %v6484_v33  ;;  %v6778_v33 = vor.u32 %v6777_v2, %v6774_v14  ;;  %v6809_v29 = vrot.slane %v6807_v0, 2  ;;  %v6821_v5 = vrot.slane %v6819_v17, 3  ;;  %v6827_v14 = vrot.slane %v6825_v11, 2 }
  0xbf   : > { %v1186_v21 = vsel %vm1159_vm5, %v1183_v46, %v1185_v34  ;;  %v6805_v1 = vsel %vm3112_vm6, %v6795_v53, %v6804_v10 }
  0xc3   : > { %13164 = vmatmul.mubr.msk.bf16.gmra.mrb[8].mxu1 %vm701_vm2, %v1172_v41  ;;  %v6786_v41 = vor.u32 %v6785_v55, %v6782_v61  ;;  %v15357_v61 = vld [vmem:[%s15538_s9 + $0x88] sm:$0xff]  }
  0xc4   : > { %13167 = vmatprep.mubr.msk.bf16.mxu1 %vm701_vm2, %v1174_v44  ;;  %v15354_v44 = vld [vmem:[%s15538_s9 + $0x70] sm:$0xff]   ;;  %v1193_v55 = vrot.slane %v15357_v61, 1  ;;  %v2138_v61 = vsel %vm756_vm0, %v15986_v13, 0 }
  0xc5   : > { %13674 = vmatmul.mubr.msk.bf16.gmra.mrb[24].mxu0 %vm701_vm2, %v6486_v35  ;;  %v6787_v43 = vsel %vm3112_vm6, %v6778_v33, %v6786_v41  ;;  %v1187_v12 = vrot.slane %v15354_v44, 1  ;;  %v6812_v35 = vrot.slane %v6810_v42, 3  ;;  %v6796_v52 = vsel %vm3112_vm6, %v6786_v41, %v6795_v53  ;;  %v16112_v33 = vld [vmem:[%s15538_s9 + $0x10] sm:$0xff]  }
  0xc6   : > { %13677 = vmatprep.mubr.msk.bf16.mxu0 %vm701_vm2, %v6488_v37  ;;  %v15355_v37 = vld [vmem:[%s15538_s9 + $0x78] sm:$0xff]   ;;  %v1194_v41 = vsel %vm1159_vm5, %v1191_v56, %v1193_v55  ;;  %v6852_v42 = vshrl.u32 %v15950_v49, 16 }
  0xc7   : > { %v1189_v6 = vrot.slane %v15355_v37, 1  ;;  %v1188_v54 = vsel %vm1159_vm5, %v1185_v34, %v1187_v12  ;;  %v6813_v46 = vor.u32 %v6812_v35, %v6809_v29  ;;  %v6846_v34 = vshll.u32 %v15943_v45, 16  ;;  %v16129_v49 = vld [vmem:[%s15538_s9 + $0x18] sm:$0xff]  }
  0xc8   : > { %v6854_v17 = vrot.slane %v6852_v42, 2  ;;  %v6861_v37 = vshrl.u32 %v15960_v50, 16  ;;  %v6897_v42 = vshrl.u32 %v16006_v30, 16 }
  0xc9   : > { %v1190_v2 = vsel %vm1159_vm5, %v1187_v12, %v1189_v6  ;;  %v6814_v20 = vsel %vm3112_vm6, %v6804_v10, %v6813_v46  ;;  %v6848_v12 = vrot.slane %v6846_v34, 3 }
  0xcb   : > { %13168 = vmatmul.mubr.msk.bf16.gmra.mrb[12].mxu1 %vm701_vm2, %v1176_v60  ;;  %v6818_v60 = vrot.slane %v6816_v62, 2  ;;  %v1600_v62 = vrot.slane %v16112_v33, 1 }
  0xcc   : > { %13171 = vmatprep.mubr.msk.bf16.mxu1 %vm701_vm2, %v1178_v36  ;;  %v6837_v36 = vshll.u32 %v15928_v40, 16  ;;  %v6836_v40 = vrot.slane %v6834_v57, 2 }
  0xcd   : > { %13678 = vmatmul.mubr.msk.bf16.gmra.mrb[28].mxu0 %vm701_vm2, %v6490_v51  ;;  %v6822_v16 = vor.u32 %v6821_v5, %v6818_v60  ;;  %v6830_v51 = vrot.slane %v6828_v59, 3  ;;  %v6870_v59 = vshrl.u32 %v15966_v58, 16  ;;  %v6873_v60 = vshll.u32 %v15966_v58, 16 }
  0xce   : > { %13681 = vmatprep.mubr.msk.bf16.mxu0 %vm701_vm2, %v6492_v18  ;;  %v6839_v18 = vrot.slane %v6837_v36, 3  ;;  %v1602_v5 = vrot.slane %v16129_v49, 1 }
  0xcf   : > { %v6823_v19 = vsel %vm3112_vm6, %v6813_v46, %v6822_v16  ;;  %v6831_v31 = vor.u32 %v6830_v51, %v6827_v14  ;;  %v6875_v46 = vrot.slane %v6873_v60, 3  ;;  %v16152_v14 = vld [vmem:[%s15538_s9 + $0x28] sm:$0xff]   ;;  %v6918_v60 = vshll.u32 %v16018_v39, 16 }
  0xd0   : > { %v6840_v63 = vor.u32 %v6839_v18, %v6836_v40  ;;  %v1603_v58 = vsel %vm1159_vm5, %v1600_v62, %v1602_v5  ;;  %v6888_v40 = vshrl.u32 %v15991_v9, 16  ;;  %v6891_v18 = vshll.u32 %v15991_v9, 16 }
  0xd1   : > { %v1606_v13 = vrot.slane %v16152_v14, 1 }
  0xd3   : > { %13172 = vmatmul.mubr.msk.bf16.gmra.mrb[16].mxu1 %vm701_vm2, %v1180_v23  ;;  %v6843_v23 = vshrl.u32 %v15943_v45, 16  ;;  %v6841_v45 = vsel %vm3112_vm6, %v6831_v31, %v6840_v63 }
  0xd4   : > { %13175 = vmatprep.mubr.msk.bf16.mxu1 %vm701_vm2, %v1182_v26  ;;  %v1192_v26 = vsel %vm1159_vm5, %v1189_v6, %v1191_v56  ;;  %v6864_v6 = vshll.u32 %v15960_v50, 16 }
  0xd5   : > { %13682 = vmatmul.mubr.msk.bf16.gmra.mrb[32].mxu0 %vm701_vm2, %v6494_v48  ;;  %v1195_v48 = vrot.slane %v15358_v27, 1  ;;  %v6845_v44 = vrot.slane %v6843_v23, 2 }
  0xd6   : > { %13687 = vmatprep.mubr.msk.bf16.mxu0 %vm701_vm2, %v6787_v43  ;;  %v6832_v43 = vsel %vm3112_vm6, %v6822_v16, %v6831_v31  ;;  %v6866_v50 = vrot.slane %v6864_v6, 3  ;;  %v6882_v16 = vshll.u32 %v15981_v8, 16  ;;  %v6893_v31 = vrot.slane %v6891_v18, 3  ;;  %v16223_v18 = vld [vmem:[%s15538_s9 + $0x58] sm:$0xff]  }
  0xd7   : > { %v1196_v53 = vsel %vm1159_vm5, %v1193_v55, %v1195_v48  ;;  %v6849_v35 = vor.u32 %v6848_v12, %v6845_v44  ;;  %v16159_v55 = vld [vmem:[%s15538_s9 + $0x30] sm:$0xff]   ;;  %v6909_v44 = vshll.u32 %v16011_v32, 16 }
  0xd8   : > { %v1608_v23 = vrot.slane %v16159_v55, 1 }
  0xda   : > { %v1609_v27 = vsel %vm1159_vm5, %v1606_v13, %v1608_v23 }
  0xdb   : > { %13176 = vmatmul.mubr.msk.bf16.gmra.mrb[20].mxu1 %vm701_vm2, %v1184_v22  ;;  %v6857_v22 = vrot.slane %v6855_v38, 3  ;;  %v6900_v38 = vshll.u32 %v16006_v30, 16 }
  0xdc   : > { %13179 = vmatprep.mubr.msk.bf16.mxu1 %vm701_vm2, %v1186_v21  ;;  %v16136_v21 = vld [vmem:[%s15538_s9 + $0x20] sm:$0xff]  }
  0xdd   : > { %13688 = vmatmul.mubr.msk.bf16.vlgmr.msra.gmra.mrb[0].mxu0 %vm701_vm2, %v6796_v52  ;;  %v6858_v11 = vor.u32 %v6857_v22, %v6854_v17  ;;  %v6850_v52 = vsel %vm3112_vm6, %v6840_v63, %v6849_v35  ;;  %v1604_v57 = vrot.slane %v16136_v21, 1  ;;  %v6902_v17 = vrot.slane %v6900_v38, 3 }
  0xde   : > { %13724 = vmatpush3.bf16.msra.mxu0 %v7309_v28  ;;  %13691 = vmatprep.mubr.msk.bf16.mxu0 %vm701_vm2, %v6805_v1  ;;  %v1467_v28 = vld [vmem:[%s15538_s9 + $0x8] sm:$0xe]  ;;  %v6863_v1 = vrot.slane %v6861_v37, 2  ;;  %v6911_v37 = vrot.slane %v6909_v44, 3 }
  0xdf   : > { %15060 = vmatprep.subr.msk.bf16.mxu0 %vm756_vm0, %v16086_v4  ;;  %v16116_v0 = vcombine.low %v1467_v28, %v16104_v25  ;;  %v6859_v36 = vsel %vm3112_vm6, %v6849_v35, %v6858_v11  ;;  %v1605_v56 = vsel %vm1159_vm5, %v1602_v5, %v1604_v57  ;;  %v1607_v63 = vsel %vm1159_vm5, %v1604_v57, %v1606_v13 }
  0xe0   : > { %v6867_v7 = vor.u32 %v6866_v50, %v6863_v1  ;;  %v16206_v1 = vld [vmem:[%s15538_s9 + $0x50] sm:$0xff]   ;;  %v6924_v50 = vshrl.u32 %v16028_v47, 16  ;;  %v6927_v57 = vshll.u32 %v16028_v47, 16 }
  0xe1   : > { %v1599_v29 = vrot.slane %v16116_v0, 1 }
  0xe3   : > { %13180 = vmatmul.mubr.msk.bf16.gmra.mrb[24].mxu1 %vm701_vm2, %v1188_v54  ;;  %v1601_v10 = vsel %vm1159_vm5, %v1599_v29, %v1600_v62  ;;  %v6872_v54 = vrot.slane %v6870_v59, 2  ;;  %v6899_v62 = vrot.slane %v6897_v42, 2  ;;  %v6915_v59 = vshrl.u32 %v16018_v39, 16 }
  0xe4   : > { %13183 = vmatprep.mubr.msk.bf16.mxu1 %vm701_vm2, %v1190_v2  ;;  %v6879_v2 = vshrl.u32 %v15981_v8, 16  ;;  %v6868_v8 = vsel %vm3112_vm6, %v6858_v11, %v6867_v7  ;;  %v16200_v11 = vld [vmem:[%s15538_s9 + $0x48] sm:$0xff]  }
  0xe5   : > { %13692 = vmatmul.mubr.msk.bf16.gmra.mrb[4].mxu0 %vm701_vm2, %v6814_v20  ;;  %v6876_v51 = vor.u32 %v6875_v46, %v6872_v54  ;;  %v16166_v20 = vld [vmem:[%s18226_s4 + $0xa] sm:$0x3]  ;;  %v1614_v54 = vrot.slane %v16200_v11, 1  ;;  %v6917_v46 = vrot.slane %v6915_v59, 2 }
  0xe6   : > { %13695 = vmatprep.mubr.msk.bf16.mxu0 %vm701_vm2, %v6823_v19  ;;  %v6881_v28 = vrot.slane %v6879_v2, 2  ;;  %v6884_v19 = vrot.slane %v6882_v16, 3  ;;  %v1616_v2 = vrot.slane %v16206_v1, 1  ;;  %v6926_v16 = vrot.slane %v6924_v50, 2 }
  0xe7   : > { %v6877_v9 = vsel %vm3112_vm6, %v6867_v7, %v6876_v51  ;;  %v16215_v7 = vld [vmem:[%s15554_s14 + $0xa0] ss:$0 sps:$4 sm:$0x77]  }
  0xe8   : > { %v6885_v34 = vor.u32 %v6884_v19, %v6881_v28  ;;  %v6936_v13 = vshll.u32 %v16215_v7, 16  ;;  %v1617_v28 = vsel %vm1159_vm5, %v1614_v54, %v1616_v2 }
  0xea   : > { %v6886_v12 = vsel %vm3112_vm6, %v6876_v51, %v6885_v34  ;;  %v6929_v51 = vrot.slane %v6927_v57, 3  ;;  %v15362_v57 = vld [vmem:[%s15554_s14 + $0x28] sm:$0xff]  }
  0xeb   : > { %13184 = vmatmul.mubr.msk.bf16.gmra.mrb[28].mxu1 %vm701_vm2, %v1192_v26  ;;  %v6890_v26 = vrot.slane %v6888_v40, 2 }
  0xec   : > { %13187 = vmatprep.mubr.msk.bf16.mxu1 %vm701_vm2, %v1194_v41  ;;  %v16180_v41 = vld [vmem:[%s15538_s9 + $0x38] sm:$0xff]   ;;  %v6930_v19 = vor.u32 %v6929_v51, %v6926_v16  ;;  %v16279_v51 = vld [vmem:[%s18226_s4 + $0x26] sm:$0x3] }
  0xed   : > { %13696 = vmatmul.mubr.msk.bf16.gmra.mrb[8].mxu0 %vm701_vm2, %v6832_v43  ;;  %v6894_v48 = vor.u32 %v6893_v31, %v6890_v26  ;;  %v16186_v43 = vld [vmem:[%s15538_s9 + $0x40] sm:$0xff]   ;;  %v1610_v29 = vrot.slane %v16180_v41, 1  ;;  %v1618_v31 = vrot.slane %v16223_v18, 1 }
  0xee   : > { %13699 = vmatprep.mubr.msk.bf16.mxu0 %vm701_vm2, %v6841_v45  ;;  %v6906_v45 = vshrl.u32 %v16011_v32, 16 }
  0xef   : > { %v6895_v22 = vsel %vm3112_vm6, %v6885_v34, %v6894_v48  ;;  %v1611_v6 = vsel %vm1159_vm5, %v1608_v23, %v1610_v29  ;;  %v7211_v23 = vld [vmem:[%s15554_s14 + $0x10] sm:$0x8]  ;;  %v6938_v34 = vrot.slane %v6936_v13, 3  ;;  %v16286_v13 = vld [vmem:[%s15538_s9 + $0x88] sm:$0xff]  }
  0xf0   : > { %v6908_v35 = vrot.slane %v6906_v45, 2  ;;  %v1619_v45 = vsel %vm1159_vm5, %v1616_v2, %v1618_v31 }
  0xf3   : > { %13188 = vmatmul.mubr.msk.bf16.gmra.mrb[32].mxu1 %vm701_vm2, %v1196_v53  ;;  %v1612_v53 = vrot.slane %v16186_v43, 1 }
  0xf4   : > { %13193 = vmatprep.mubr.msk.bf16.mxu1 %vm701_vm2, %v1601_v10  ;;  %v6903_v10 = vor.u32 %v6902_v17, %v6899_v62  ;;  %v15360_v17 = vld [vmem:[%s15554_s14 + $0x18] sm:$0xff]  }
  0xf5   : > { %13700 = vmatmul.mubr.msk.bf16.gmra.mrb[12].mxu0 %vm701_vm2, %v6850_v52  ;;  %v1613_v5 = vsel %vm1159_vm5, %v1610_v29, %v1612_v53  ;;  %v6912_v52 = vor.u32 %v6911_v37, %v6908_v35 }
  0xf6   : > { %13703 = vmatprep.mubr.msk.bf16.mxu0 %vm701_vm2, %v6859_v36  ;;  %v6904_v36 = vsel %vm3112_vm6, %v6894_v48, %v6903_v10 }
  0xfb   : > { %13194 = vmatmul.mubr.msk.bf16.vlgmr.msra.gmra.mrb[0].mxu1 %vm701_vm2, %v1603_v58  ;;  %v6920_v58 = vrot.slane %v6918_v60, 3  ;;  %v15361_v60 = vld [vmem:[%s15554_s14 + $0x20] sm:$0xff]  }
  0xfc   : > { %13197 = vmatprep.mubr.msk.bf16.mxu1 %vm701_vm2, %v1605_v56  ;;  %13230 = vmatpush3.bf16.msra.mxu1 %v2138_v61  ;;  %v6913_v56 = vsel %vm3112_vm6, %v6903_v10, %v6912_v52  ;;  %v1615_v61 = vsel %vm1159_vm5, %v1612_v53, %v1614_v54  ;;  %v16248_v53 = vld [vmem:[%s15538_s9 + $0x70] sm:$0xff]   ;;  %v16266_v54 = vld [vmem:[%s15538_s9 + $0x80] sm:$0xff]  }
  0xfd   : > { %15046 = vmatprep.subr.msk.bf16.mxu1 %vm756_vm0, %v16166_v20  ;;  %13704 = vmatmul.mubr.msk.bf16.gmra.mrb[16].mxu0 %vm701_vm2, %v6868_v8  ;;  %v6921_v40 = vor.u32 %v6920_v58, %v6917_v46  ;;  %v6933_v8 = vshrl.u32 %v16215_v7, 16  ;;  %v1624_v10 = vrot.slane %v16248_v53, 1  ;;  %v1628_v16 = vrot.slane %v16266_v54, 1 }
  0xfe   : > { %13707 = vmatprep.mubr.msk.bf16.mxu0 %vm701_vm2, %v6877_v9  ;;  %v16229_v9 = vld [vmem:[%s15538_s9 + $0x60] sm:$0xff]  }
  0xff   : > { %v6922_v26 = vsel %vm3112_vm6, %v6912_v52, %v6921_v40  ;;  %v6931_v42 = vsel %vm3112_vm6, %v6921_v40, %v6930_v19  ;;  %v1620_v38 = vrot.slane %v16229_v9, 1  ;;  %v16261_v52 = vld [vmem:[%s15538_s9 + $0x78] sm:$0xff]   ;;  %v15363_v40 = vld [vmem:[%s15554_s14 + $0x30] sm:$0xff]  }
 0x100   : > { %v1626_v58 = vrot.slane %v16261_v52, 1 }
 0x101   : > { %v1621_v29 = vsel %vm1159_vm5, %v1618_v31, %v1620_v38  ;;  %v1630_v31 = vrot.slane %v16286_v13, 1 }
 0x103   : > { %13198 = vmatmul.mubr.msk.bf16.gmra.mrb[4].mxu1 %vm701_vm2, %v1607_v63  ;;  %v6935_v63 = vrot.slane %v6933_v8, 2  ;;  %v7224_v8 = vrot.slane %v15363_v40, 3 }
 0x104   : > { %13201 = vmatprep.mubr.msk.bf16.mxu1 %vm701_vm2, %v1609_v27  ;;  %v15359_v27 = vld [vmem:[%s15554_s14 + $0x14] sm:$0xf] }
 0x105   : > { %13708 = vmatmul.mubr.msk.bf16.gmra.mrb[20].mxu0 %vm701_vm2, %v6886_v12  ;;  %v12291_v48 = vcombine.low %v7211_v23, %v15359_v27  ;;  %v6939_v44 = vor.u32 %v6938_v34, %v6935_v63  ;;  %v16243_v12 = vld [vmem:[%s15538_s9 + $0x68] sm:$0xff]   ;;  %v1629_v23 = vsel %vm1159_vm5, %v1626_v58, %v1628_v16  ;;  %v1922_v27 = vshrl.u32 %v16112_v33, 16 }
 0x106   : > { %13711 = vmatprep.mubr.msk.bf16.mxu0 %vm701_vm2, %v6895_v22  ;;  %v7218_v22 = vrot.slane %v15360_v17, 3  ;;  %v1622_v37 = vrot.slane %v16243_v12, 1  ;;  %v15197_v17 = vld [vmem:[%s15538_s9 + $0x98] ss:$0 sps:$4 sm:$0x11]  }
 0x107   : > { %v7217_v62 = vrot.slane %v12291_v48, 3  ;;  %v6940_v35 = vsel %vm3112_vm6, %v6930_v19, %v6939_v44  ;;  %v16290_v19 = vld [vmem:[%s15538_s9 + $0x90] sm:$0xff]   ;;  %v1925_v48 = vshll.u32 %v16112_v33, 16 }
 0x108   : > { %v1623_v59 = vsel %vm1159_vm5, %v1620_v38, %v1622_v37  ;;  %v1625_v50 = vsel %vm1159_vm5, %v1622_v37, %v1624_v10  ;;  %v1632_v34 = vrot.slane %v16290_v19, 1  ;;  %v1917_v38 = vshll.u32 %v16116_v0, 16 }
 0x10b   : > { %13202 = vmatmul.mubr.msk.bf16.gmra.mrb[8].mxu1 %vm701_vm2, %v1611_v6  ;;  %v7219_v6 = vsel %vm3559_vm7, %v7217_v62, %v7218_v22  ;;  %v1633_v62 = vsel %vm1159_vm5, %v1630_v31, %v1632_v34 }
 0x10c   : > { %13205 = vmatprep.mubr.msk.bf16.mxu1 %vm701_vm2, %v1613_v5  ;;  %v7220_v5 = vrot.slane %v15361_v60, 3  ;;  %v1634_v60 = vrot.slane %v15197_v17, 1 }
 0x10d   : > { %13712 = vmatmul.mubr.msk.bf16.gmra.mrb[24].mxu0 %vm701_vm2, %v6904_v36  ;;  %v7222_v36 = vrot.slane %v15362_v57, 3  ;;  %v1934_v57 = vshll.u32 %v16129_v49, 16 }
 0x10e   : > { %13715 = vmatprep.mubr.msk.bf16.mxu0 %vm701_vm2, %v6913_v56  ;;  %v7221_v46 = vsel %vm3559_vm7, %v7218_v22, %v7220_v5  ;;  %v7707_v56 = vsel %vm756_vm0, %v16086_v4, 0  ;;  %v15364_v4 = vld [vmem:[%s15554_s14 + $0x38] sm:$0xff]   ;;  %v15366_v22 = vld [vmem:[%s15554_s14 + $0x48] sm:$0xff]  }
 0x10f   : > { %v7223_v2 = vsel %vm3559_vm7, %v7220_v5, %v7222_v36 }
 0x113   : > { %13206 = vmatmul.mubr.msk.bf16.gmra.mrb[12].mxu1 %vm701_vm2, %v1615_v61  ;;  %v1627_v61 = vsel %vm1159_vm5, %v1624_v10, %v1626_v58  ;;  %v1927_v10 = vrot.slane %v1925_v48, 2  ;;  %v1940_v58 = vshrl.u32 %v16136_v21, 16 }
 0x114   : > { %13209 = vmatprep.mubr.msk.bf16.mxu1 %vm701_vm2, %v1617_v28  ;;  %v7226_v28 = vrot.slane %v15364_v4, 3 }
 0x115   : > { %13716 = vmatmul.mubr.msk.bf16.gmra.mrb[28].mxu0 %vm701_vm2, %v6922_v26  ;;  %v7225_v26 = vsel %vm3559_vm7, %v7222_v36, %v7224_v8 }
 0x116   : > { %13719 = vmatprep.mubr.msk.bf16.mxu0 %vm701_vm2, %v6931_v42  ;;  %v7227_v63 = vsel %vm3559_vm7, %v7224_v8, %v7226_v28  ;;  %v1914_v42 = vshrl.u32 %v16116_v0, 16  ;;  %v1924_v0 = vrot.slane %v1922_v27, 1  ;;  %v1936_v8 = vrot.slane %v1934_v57, 2 }
 0x118   : > { %v1916_v37 = vrot.slane %v1914_v42, 1  ;;  %v1949_v42 = vshrl.u32 %v16152_v14, 16 }
 0x11b   : > { %13210 = vmatmul.mubr.msk.bf16.gmra.mrb[16].mxu1 %vm701_vm2, %v1619_v45  ;;  %v15365_v45 = vld [vmem:[%s15554_s14 + $0x40] sm:$0xff]  }
 0x11c   : > { %13213 = vmatprep.mubr.msk.bf16.mxu1 %vm701_vm2, %v1621_v29  ;;  %v7228_v44 = vrot.slane %v15365_v45, 3  ;;  %v1631_v29 = vsel %vm1159_vm5, %v1628_v16, %v1630_v31  ;;  %v15367_v16 = vld [vmem:[%s15554_s14 + $0x50] sm:$0xff]   ;;  %v1958_v45 = vshrl.u32 %v16159_v55, 16 }
 0x11d   : > { %13720 = vmatmul.mubr.msk.bf16.gmra.mrb[32].mxu0 %vm701_vm2, %v6940_v35  ;;  %v7230_v35 = vrot.slane %v15366_v22, 3  ;;  %v1951_v22 = vrot.slane %v1949_v42, 1 }
 0x11e   : > { %13725 = vmatprep.mubr.msk.bf16.mxu0 %vm701_vm2, %v7219_v6  ;;  %v1919_v6 = vrot.slane %v1917_v38, 2  ;;  %v1952_v38 = vshll.u32 %v16152_v14, 16 }
 0x11f   : > { %v7231_v5 = vsel %vm3559_vm7, %v7228_v44, %v7230_v35 }
 0x120   : > { %v1920_v36 = vor.u32 %v1919_v6, %v1916_v37  ;;  %v15370_v37 = vld [vmem:[%s15554_s14 + $0x68] sm:$0xff]  }
 0x121   : > { %v7238_v6 = vrot.slane %v15370_v37, 3 }
 0x123   : > { %13214 = vmatmul.mubr.msk.bf16.gmra.mrb[20].mxu1 %vm701_vm2, %v1623_v59  ;;  %v7229_v59 = vsel %vm3559_vm7, %v7226_v28, %v7228_v44  ;;  %v15368_v28 = vld [vmem:[%s15554_s14 + $0x58] sm:$0xff]   ;;  %v1961_v44 = vshll.u32 %v16159_v55, 16 }
 0x124   : > { %13217 = vmatprep.mubr.msk.bf16.mxu1 %vm701_vm2, %v1625_v50  ;;  %v1931_v50 = vshrl.u32 %v16129_v49, 16 }
 0x125   : > { %13726 = vmatmul.mubr.msk.bf16.vlgmr.msra.gmra.mrb[0].mxu0 %vm701_vm2, %v7221_v46  ;;  %v1928_v46 = vor.u32 %v1927_v10, %v1924_v0  ;;  %v2452_v10 = vsel %vm756_vm0, %v16166_v20, 0  ;;  %v1970_v20 = vshll.u32 %v16180_v41, 16 }
 0x126   : > { %13762 = vmatpush3.bf16.msra.mxu0 %v7707_v56  ;;  %13729 = vmatprep.mubr.msk.bf16.mxu0 %vm701_vm2, %v7223_v2  ;;  %v1943_v56 = vshll.u32 %v16136_v21, 16  ;;  %v1635_v2 = vsel %vm1159_vm5, %v1632_v34, %v1634_v60  ;;  %v1933_v40 = vrot.slane %v1931_v50, 1  ;;  %v1963_v60 = vrot.slane %v1961_v44, 2 }
 0x127   : > { %15061 = vmatprep.subr.msk.bf16.mxu0 %vm756_vm0, %v16279_v51  ;;  %v1929_v4 = vsel %vm1912_vm3, %v1920_v36, %v1928_v46  ;;  %v1967_v36 = vshrl.u32 %v16180_v41, 16  ;;  %v1994_v44 = vshrl.u32 %v16206_v1, 16 }
 0x128   : > { %v1945_v31 = vrot.slane %v1943_v56, 2  ;;  %v1937_v34 = vor.u32 %v1936_v8, %v1933_v40  ;;  %v1976_v56 = vshrl.u32 %v16186_v43, 16 }
 0x129   : > { %v1969_v8 = vrot.slane %v1967_v36, 1 }
 0x12a   : > { %v1938_v17 = vsel %vm1912_vm3, %v1928_v46, %v1937_v34 }
 0x12b   : > { %13218 = vmatmul.mubr.msk.bf16.gmra.mrb[24].mxu1 %vm701_vm2, %v1627_v61  ;;  %v7232_v61 = vrot.slane %v15367_v16, 3 }
 0x12c   : > { %13221 = vmatprep.mubr.msk.bf16.mxu1 %vm701_vm2, %v1629_v23  ;;  %v7234_v23 = vrot.slane %v15368_v28, 3 }
 0x12d   : > { %13730 = vmatmul.mubr.msk.bf16.gmra.mrb[4].mxu0 %vm701_vm2, %v7225_v26  ;;  %v1942_v26 = vrot.slane %v1940_v58, 1 }
 0x12e   : > { %13733 = vmatprep.mubr.msk.bf16.mxu0 %vm701_vm2, %v7227_v63  ;;  %v7233_v63 = vsel %vm3559_vm7, %v7230_v35, %v7232_v61  ;;  %v7235_v27 = vsel %vm3559_vm7, %v7232_v61, %v7234_v23  ;;  %v1954_v35 = vrot.slane %v1952_v38, 2  ;;  %v15371_v61 = vld [vmem:[%s15554_s14 + $0x70] sm:$0xff]   ;;  %v1985_v38 = vshrl.u32 %v16200_v11, 16 }
 0x12f   : > { %v1946_v48 = vor.u32 %v1945_v31, %v1942_v26  ;;  %v7240_v40 = vrot.slane %v15371_v61, 3  ;;  %v1978_v31 = vrot.slane %v1976_v56, 1  ;;  %v7250_v61 = vrot.slane %v16028_v47, 3 }
 0x130   : > { %v1955_v57 = vor.u32 %v1954_v35, %v1951_v22  ;;  %v1987_v22 = vrot.slane %v1985_v38, 1  ;;  %v2033_v47 = vshll.u32 %v16248_v53, 16 }
 0x131   : > { %v1947_v0 = vsel %vm1912_vm3, %v1937_v34, %v1946_v48  ;;  %v7241_v34 = vsel %vm3559_vm7, %v7238_v6, %v7240_v40 }
 0x132   : > { %v1956_v16 = vsel %vm1912_vm3, %v1946_v48, %v1955_v57 }
 0x133   : > { %13222 = vmatmul.mubr.msk.bf16.gmra.mrb[28].mxu1 %vm701_vm2, %v1631_v29  ;;  %v15369_v29 = vld [vmem:[%s15554_s14 + $0x60] sm:$0xff]  }
 0x134   : > { %13225 = vmatprep.mubr.msk.bf16.mxu1 %vm701_vm2, %v1633_v62  ;;  %v7236_v62 = vrot.slane %v15369_v29, 3  ;;  %v1997_v29 = vshll.u32 %v16206_v1, 16 }
 0x135   : > { %13734 = vmatmul.mubr.msk.bf16.gmra.mrb[8].mxu0 %vm701_vm2, %v7229_v59  ;;  %v1960_v59 = vrot.slane %v1958_v45, 1 }
 0x136   : > { %13737 = vmatprep.mubr.msk.bf16.mxu0 %vm701_vm2, %v7231_v5  ;;  %v16345_v5 = vld [vmem:[%s18226_s4 + $0xc] sm:$0x3]  ;;  %v7237_v50 = vsel %vm3559_vm7, %v7234_v23, %v7236_v62  ;;  %v7239_v46 = vsel %vm3559_vm7, %v7236_v62, %v7238_v6  ;;  %v15372_v23 = vld [vmem:[%s15554_s14 + $0x78] sm:$0xff]   ;;  %v7246_v6 = vrot.slane %v16011_v32, 3  ;;  %v2015_v32 = vshll.u32 %v16229_v9, 16 }
 0x137   : > { %v1964_v58 = vor.u32 %v1963_v60, %v1960_v59  ;;  %v7242_v26 = vrot.slane %v15372_v23, 3  ;;  %v2021_v23 = vshrl.u32 %v16243_v12, 16 }
 0x139   : > { %v1965_v28 = vsel %vm1912_vm3, %v1955_v57, %v1964_v58  ;;  %v7243_v48 = vsel %vm3559_vm7, %v7240_v40, %v7242_v26  ;;  %v2006_v57 = vshll.u32 %v16223_v18, 16  ;;  %v2023_v38 = vrot.slane %v2021_v23, 1 }
 0x13b   : > { %13226 = vmatmul.mubr.msk.bf16.gmra.mrb[32].mxu1 %vm701_vm2, %v1635_v2  ;;  %v1979_v2 = vshll.u32 %v16186_v43, 16 }
 0x13c   : > { %13231 = vmatprep.mubr.msk.bf16.mxu1 %vm701_vm2, %v1929_v4  ;;  %v1972_v4 = vrot.slane %v1970_v20, 2  ;;  %v2012_v20 = vshrl.u32 %v16229_v9, 16 }
 0x13d   : > { %13738 = vmatmul.mubr.msk.bf16.gmra.mrb[12].mxu0 %vm701_vm2, %v7233_v63  ;;  %v1981_v63 = vrot.slane %v1979_v2, 2  ;;  %v2008_v2 = vrot.slane %v2006_v57, 2 }
 0x13e   : > { %13741 = vmatprep.mubr.msk.bf16.mxu0 %vm701_vm2, %v7235_v27  ;;  %v1973_v42 = vor.u32 %v1972_v4, %v1969_v8  ;;  %v1988_v27 = vshll.u32 %v16200_v11, 16  ;;  %v2014_v40 = vrot.slane %v2012_v20, 1  ;;  %v2017_v8 = vrot.slane %v2015_v32, 2  ;;  %v15200_v20 = vld [vmem:[%s15852_s16 + $0x10] sm:$0xff]  }
 0x13f   : > { %v1982_v45 = vor.u32 %v1981_v63, %v1978_v31  ;;  %v2030_v63 = vshrl.u32 %v16248_v53, 16  ;;  %v2057_v32 = vshrl.u32 %v16286_v13, 16 }
 0x140   : > { %v1974_v62 = vsel %vm1912_vm3, %v1964_v58, %v1973_v42  ;;  %v1990_v35 = vrot.slane %v1988_v27, 2  ;;  %v7248_v58 = vrot.slane %v16018_v39, 3  ;;  %v2018_v31 = vor.u32 %v2017_v8, %v2014_v40 }
 0x141   : > { %v1983_v37 = vsel %vm1912_vm3, %v1973_v42, %v1982_v45  ;;  %v7252_v42 = vrot.slane %v16215_v7, 3 }
 0x142   : > { %v1991_v60 = vor.u32 %v1990_v35, %v1987_v22  ;;  %v7249_v4 = vsel %vm3559_vm7, %v7246_v6, %v7248_v58  ;;  %v7251_v39 = vsel %vm3559_vm7, %v7248_v58, %v7250_v61  ;;  %v2039_v22 = vshrl.u32 %v16261_v52, 16 }
 0x143   : > { %13232 = vmatmul.mubr.msk.bf16.vlgmr.msra.gmra.mrb[0].mxu1 %vm701_vm2, %v1938_v17  ;;  %v7244_v17 = vrot.slane %v16006_v30, 3  ;;  %v2042_v35 = vshll.u32 %v16261_v52, 16  ;;  %v8257_v58 = vsel %vm756_vm0, %v16279_v51, 0  ;;  %v2059_v51 = vrot.slane %v2057_v32, 1  ;;  %v15212_v32 = vld [vmem:[%s15852_s16 + $0x60] sm:$0xff]  }
 0x144   : > { %13235 = vmatprep.mubr.msk.bf16.mxu1 %vm701_vm2, %v1947_v0  ;;  %13268 = vmatpush3.bf16.msra.mxu1 %v2452_v10  ;;  %v1996_v0 = vrot.slane %v1994_v44, 1  ;;  %v1999_v10 = vrot.slane %v1997_v29, 2  ;;  %v2035_v44 = vrot.slane %v2033_v47, 2  ;;  %v7253_v29 = vsel %vm3559_vm7, %v7250_v61, %v7252_v42  ;;  %v16429_v61 = vld [vmem:[%s18226_s4 + $0x28] sm:$0x3] }
 0x145   : > { %15047 = vmatprep.subr.msk.bf16.mxu1 %vm756_vm0, %v16345_v5  ;;  %13742 = vmatmul.mubr.msk.bf16.gmra.mrb[16].mxu0 %vm701_vm2, %v7237_v50  ;;  %v7245_v59 = vsel %vm3559_vm7, %v7242_v26, %v7244_v17  ;;  %v2003_v50 = vshrl.u32 %v16223_v18, 16  ;;  %v7247_v30 = vsel %vm3559_vm7, %v7244_v17, %v7246_v6  ;;  %v2024_v26 = vshll.u32 %v16243_v12, 16  ;;  %v15198_v17 = vld [vmem:[%s15852_s16] sm:$0xff]  }
 0x146   : > { %13745 = vmatprep.mubr.msk.bf16.mxu0 %vm701_vm2, %v7239_v46  ;;  %v2000_v36 = vor.u32 %v1999_v10, %v1996_v0  ;;  %v1992_v46 = vsel %vm1912_vm3, %v1982_v45, %v1991_v60  ;;  %v2032_v45 = vrot.slane %v2030_v63, 1  ;;  %v2051_v6 = vshll.u32 %v16266_v54, 16  ;;  %v15202_v63 = vld [vmem:[%s15852_s16 + $0x20] sm:$0xff]  }
 0x147   : > { %v2005_v56 = vrot.slane %v2003_v50, 1  ;;  %v2026_v27 = vrot.slane %v2024_v26, 2  ;;  %v2041_v10 = vrot.slane %v2039_v22, 1  ;;  %v15205_v22 = vld [vmem:[%s15852_s16 + $0x30] sm:$0xff]  }
 0x148   : > { %v2036_v7 = vor.u32 %v2035_v44, %v2032_v45  ;;  %v2053_v57 = vrot.slane %v2051_v6, 2  ;;  %v15206_v6 = vld [vmem:[%s15852_s16 + $0x38] sm:$0xff]  }
 0x14b   : > { %13236 = vmatmul.mubr.msk.bf16.gmra.mrb[4].mxu1 %vm701_vm2, %v1956_v16  ;;  %v2001_v16 = vsel %vm1912_vm3, %v1991_v60, %v2000_v36 }
 0x14c   : > { %13239 = vmatprep.mubr.msk.bf16.mxu1 %vm701_vm2, %v1965_v28  ;;  %v2009_v28 = vor.u32 %v2008_v2, %v2005_v56  ;;  %v2066_v2 = vshrl.u32 %v16290_v19, 16 }
 0x14d   : > { %13746 = vmatmul.mubr.msk.bf16.gmra.mrb[20].mxu0 %vm701_vm2, %v7241_v34 }
 0x14e   : > { %13749 = vmatprep.mubr.msk.bf16.mxu0 %vm701_vm2, %v7243_v48  ;;  %v2010_v34 = vsel %vm1912_vm3, %v2000_v36, %v2009_v28  ;;  %v2019_v48 = vsel %vm1912_vm3, %v2009_v28, %v2018_v31  ;;  %v2068_v23 = vrot.slane %v2066_v2, 1  ;;  %v7922_v2 = vld [vmem:[%s15852_s16] sm:$0xf] }
 0x153   : > { %13240 = vmatmul.mubr.msk.bf16.gmra.mrb[8].mxu1 %vm701_vm2, %v1974_v62  ;;  %v2027_v62 = vor.u32 %v2026_v27, %v2023_v38  ;;  %v2353_v38 = vld [vmem:[%s15538_s9 + $0x8] sm:$0xc] }
 0x154   : > { %13243 = vmatprep.mubr.msk.bf16.mxu1 %vm701_vm2, %v1983_v37  ;;  %v2048_v37 = vshrl.u32 %v16266_v54, 16 }
 0x155   : > { %13750 = vmatmul.mubr.msk.bf16.gmra.mrb[24].mxu0 %vm701_vm2, %v7245_v59  ;;  %v2028_v0 = vsel %vm1912_vm3, %v2018_v31, %v2027_v62  ;;  %v2044_v59 = vrot.slane %v2042_v35, 2  ;;  %v2037_v60 = vsel %vm1912_vm3, %v2027_v62, %v2036_v7  ;;  %v15203_v62 = vld [vmem:[%s15852_s16 + $0x28] sm:$0xff]  }
 0x156   : > { %13753 = vmatprep.mubr.msk.bf16.mxu0 %vm701_vm2, %v7247_v30  ;;  %v2050_v50 = vrot.slane %v2048_v37, 1  ;;  %v15199_v30 = vld [vmem:[%s15852_s16 + $0x8] sm:$0xff]  }
 0x157   : > { %v2045_v36 = vor.u32 %v2044_v59, %v2041_v10  ;;  %v15208_v10 = vld [vmem:[%s15852_s16 + $0x40] sm:$0xff]  }
 0x158   : > { %v2054_v56 = vor.u32 %v2053_v57, %v2050_v50  ;;  %v2891_v50 = vsel %vm756_vm0, %v16345_v5, 0  ;;  %v16476_v57 = vld [vmem:[%s18226_s4 + $0xe] sm:$0x3] }
 0x159   : > { %v2046_v40 = vsel %vm1912_vm3, %v2036_v7, %v2045_v36  ;;  %v2361_v7 = vrot.slane %v16112_v33, 2  ;;  %v2365_v33 = vrot.slane %v16136_v21, 2  ;;  %v2367_v21 = vrot.slane %v16152_v14, 2  ;;  %v15211_v14 = vld [vmem:[%s15852_s16 + $0x58] sm:$0xff]  }
 0x15a   : > { %v2055_v28 = vsel %vm1912_vm3, %v2045_v36, %v2054_v56  ;;  %v2369_v36 = vrot.slane %v16159_v55, 2  ;;  %v2371_v55 = vrot.slane %v16180_v41, 2  ;;  %v2375_v41 = vrot.slane %v16200_v11, 2  ;;  %v15215_v11 = vld [vmem:[%s15852_s16 + $0x78] sm:$0xff]  }
 0x15b   : > { %13244 = vmatmul.mubr.msk.bf16.gmra.mrb[12].mxu1 %vm701_vm2, %v1992_v46  ;;  %v2060_v46 = vshll.u32 %v16286_v13, 16  ;;  %v2368_v5 = vsel %vm2359_vm4, %v2365_v33, %v2367_v21 }
 0x15c   : > { %13247 = vmatprep.mubr.msk.bf16.mxu1 %vm701_vm2, %v2001_v16  ;;  %v2069_v16 = vshll.u32 %v16290_v19, 16 }
 0x15d   : > { %13754 = vmatmul.mubr.msk.bf16.gmra.mrb[28].mxu0 %vm701_vm2, %v7249_v4  ;;  %v2062_v8 = vrot.slane %v2060_v46, 2  ;;  %v16435_v4 = vld [vmem:[%s15538_s9 + $0x98] ss:$0 sps:$4 sm:$0x33]   ;;  %v2373_v46 = vrot.slane %v16186_v43, 2  ;;  %v15214_v43 = vld [vmem:[%s15852_s16 + $0x70] sm:$0xff]  }
 0x15e   : > { %13757 = vmatprep.mubr.msk.bf16.mxu0 %vm701_vm2, %v7251_v39  ;;  %v2071_v26 = vrot.slane %v2069_v16, 2  ;;  %v15201_v39 = vld [vmem:[%s15852_s16 + $0x18] sm:$0xff]   ;;  %v2075_v47 = vshrl.u32 %v16435_v4, 16  ;;  %v16502_v16 = vld [vmem:[%s15852_s16 + $0x4] sm:$0xf] }
 0x15f   : > { %v2063_v31 = vor.u32 %v2062_v8, %v2059_v51  ;;  %v2377_v51 = vrot.slane %v16206_v1, 2  ;;  %v12348_v8 = vcombine.low %v7922_v2, %v16502_v16  ;;  %v2379_v1 = vrot.slane %v16223_v18, 2 }
 0x160   : > { %v2072_v42 = vor.u32 %v2071_v26, %v2068_v23  ;;  %v16516_v26 = vld [vmem:[%s15852_s16 + $0x8] sm:$0xff]  }
 0x161   : > { %v2064_v27 = vsel %vm1912_vm3, %v2054_v56, %v2063_v31  ;;  %v2374_v56 = vsel %vm2359_vm4, %v2371_v55, %v2373_v46  ;;  %v2378_v23 = vsel %vm2359_vm4, %v2375_v41, %v2377_v51 }
 0x162   : > { %v2073_v44 = vsel %vm1912_vm3, %v2063_v31, %v2072_v42  ;;  %v15216_v31 = vld [vmem:[%s15852_s16 + $0x80] sm:$0xff]  }
 0x163   : > { %13248 = vmatmul.mubr.msk.bf16.gmra.mrb[16].mxu1 %vm701_vm2, %v2010_v34  ;;  %v2078_v34 = vshll.u32 %v16435_v4, 16 }
 0x164   : > { %13251 = vmatprep.mubr.msk.bf16.mxu1 %vm701_vm2, %v2019_v48  ;;  %v2077_v48 = vrot.slane %v2075_v47, 1  ;;  %v8055_v47 = vshrl.u32 %v12348_v8, 16 }
 0x165   : > { %13758 = vmatmul.mubr.msk.bf16.gmra.mrb[32].mxu0 %vm701_vm2, %v7253_v29  ;;  %v2080_v45 = vrot.slane %v2078_v34, 2  ;;  %v11962_v29 = vcombine.low %v2353_v38, %v16104_v25  ;;  %v16527_v38 = vld [vmem:[%s15852_s16 + $0x10] sm:$0xff]  }
 0x166   : > { %13763 = vmatprep.mubr.msk.bf16.mxu0 %vm701_vm2, %v15198_v17 }
 0x167   : > { %v2081_v17 = vor.u32 %v2080_v45, %v2077_v48  ;;  %v2360_v35 = vrot.slane %v11962_v29, 2  ;;  %v8070_v29 = vshll.u32 %v16527_v38, 16 }
 0x169   : > { %v2082_v37 = vsel %vm1912_vm3, %v2072_v42, %v2081_v17  ;;  %v2362_v25 = vsel %vm2359_vm4, %v2360_v35, %v2361_v7  ;;  %v8062_v42 = vshll.u32 %v16516_v26, 16  ;;  %v8066_v17 = vshrl.u32 %v16516_v26, 16 }
 0x16a   : > { %v2385_v35 = vrot.slane %v16248_v53, 2  ;;  %v16553_v53 = vld [vmem:[%s15852_s16 + $0x28] sm:$0xff]  }
 0x16b   : > { %13252 = vmatmul.mubr.msk.bf16.gmra.mrb[20].mxu1 %vm701_vm2, %v2028_v0  ;;  %v2363_v0 = vrot.slane %v16129_v49, 2  ;;  %v15209_v49 = vld [vmem:[%s15852_s16 + $0x48] sm:$0xff]   ;;  %v8064_v18 = vrot.slane %v8062_v42, 1 }
 0x16c   : > { %13255 = vmatprep.mubr.msk.bf16.mxu1 %vm701_vm2, %v2037_v60 }
 0x16d   : > { %13764 = vmatmul.mubr.msk.bf16.vlgmr.msra.gmra.mrb[0].mxu0 %vm701_vm2, %v15199_v30  ;;  %v2364_v59 = vsel %vm2359_vm4, %v2361_v7, %v2363_v0  ;;  %v2366_v60 = vsel %vm2359_vm4, %v2363_v0, %v2365_v33  ;;  %v15210_v30 = vld [vmem:[%s15852_s16 + $0x50] sm:$0xff]   ;;  %v8074_v7 = vshrl.u32 %v16527_v38, 16 }
 0x16e   : > { %13800 = vmatpush3.bf16.msra.mxu0 %v8257_v58  ;;  %13767 = vmatprep.mubr.msk.bf16.mxu0 %vm701_vm2, %v15200_v20  ;;  %v2370_v20 = vsel %vm2359_vm4, %v2367_v21, %v2369_v36  ;;  %v2372_v58 = vsel %vm2359_vm4, %v2369_v36, %v2371_v55  ;;  %v8570_v21 = vsel %vm756_vm0, %v16429_v61, 0  ;;  %v16568_v55 = vld [vmem:[%s15852_s16 + $0x30] sm:$0xff]  }
 0x16f   : > { %15062 = vmatprep.subr.msk.bf16.mxu0 %vm756_vm0, %v16429_v61 }
 0x173   : > { %13256 = vmatmul.mubr.msk.bf16.gmra.mrb[24].mxu1 %vm701_vm2, %v2046_v40  ;;  %v15213_v40 = vld [vmem:[%s15852_s16 + $0x68] sm:$0xff]  }
 0x174   : > { %13259 = vmatprep.mubr.msk.bf16.mxu1 %vm701_vm2, %v2055_v28  ;;  %v2376_v28 = vsel %vm2359_vm4, %v2373_v46, %v2375_v41 }
 0x175   : > { %13768 = vmatmul.mubr.msk.bf16.gmra.mrb[4].mxu0 %vm701_vm2, %v15201_v39  ;;  %v8057_v39 = vshll.u32 %v12348_v8, 16  ;;  %v8106_v8 = vshrl.u32 %v16568_v55, 16 }
 0x176   : > { %13771 = vmatprep.mubr.msk.bf16.mxu0 %vm701_vm2, %v15202_v63  ;;  %v2381_v63 = vrot.slane %v16229_v9, 2  ;;  %v15217_v9 = vld [vmem:[%s15852_s16 + $0x88] sm:$0xff]  }
 0x177   : > { %v8059_v34 = vrot.slane %v8057_v39, 1  ;;  %v2393_v39 = vrot.slane %v16290_v19, 2  ;;  %v16609_v19 = vld [vmem:[%s15538_s9 + $0x18] sm:$0xff]  }
 0x178   : > { %v2382_v48 = vsel %vm2359_vm4, %v2379_v1, %v2381_v63 }
 0x179   : > { %v8060_v45 = vor.u32 %v8059_v34, %v8055_v47 }
 0x17b   : > { %13260 = vmatmul.mubr.msk.bf16.gmra.mrb[28].mxu1 %vm701_vm2, %v2064_v27  ;;  %v2380_v27 = vsel %vm2359_vm4, %v2377_v51, %v2379_v1  ;;  %v8098_v51 = vshrl.u32 %v16553_v53, 16  ;;  %v2667_v1 = vld [vmem:[%s15538_s9 + $0x10] sm:$0xc] }
 0x17c   : > { %13263 = vmatprep.mubr.msk.bf16.mxu1 %vm701_vm2, %v2073_v44  ;;  %v16533_v44 = vld [vmem:[%s15852_s16 + $0x18] sm:$0xff]  }
 0x17d   : > { %13772 = vmatmul.mubr.msk.bf16.gmra.mrb[8].mxu0 %vm701_vm2, %v15203_v62  ;;  %v2383_v62 = vrot.slane %v16243_v12, 2 }
 0x17e   : > { %13775 = vmatprep.mubr.msk.bf16.mxu0 %vm701_vm2, %v15205_v22  ;;  %v8065_v22 = vsel %vm552_vm1, %v8060_v45, %v8064_v18  ;;  %v16612_v45 = vld [vmem:[%s15852_s16 + $0x48] sm:$0xff]  }
 0x17f   : > { %v2384_v0 = vsel %vm2359_vm4, %v2381_v63, %v2383_v62  ;;  %v2386_v12 = vsel %vm2359_vm4, %v2383_v62, %v2385_v35  ;;  %v16600_v63 = vld [vmem:[%s15852_s16 + $0x40] sm:$0xff]  }
 0x183   : > { %13264 = vmatmul.mubr.msk.bf16.gmra.mrb[32].mxu1 %vm701_vm2, %v2082_v37  ;;  %v8078_v37 = vshll.u32 %v16533_v44, 16 }
 0x184   : > { %13269 = vmatprep.mubr.msk.bf16.mxu1 %vm701_vm2, %v2362_v25  ;;  %v8072_v25 = vrot.slane %v8070_v29, 1  ;;  %v2395_v29 = vrot.slane %v16435_v4, 2 }
 0x185   : > { %13776 = vmatmul.mubr.msk.bf16.gmra.mrb[12].mxu0 %vm701_vm2, %v15206_v6  ;;  %v16547_v6 = vld [vmem:[%s15852_s16 + $0x20] sm:$0xff]  }
 0x186   : > { %13779 = vmatprep.mubr.msk.bf16.mxu0 %vm701_vm2, %v15208_v10  ;;  %v8068_v10 = vor.u32 %v8066_v17, %v8064_v18  ;;  %v8076_v33 = vor.u32 %v8074_v7, %v8072_v25  ;;  %v8118_v18 = vshll.u32 %v16600_v63, 16  ;;  %v8122_v7 = vshrl.u32 %v16600_v63, 16 }
 0x187   : > { %v2396_v4 = vsel %vm2359_vm4, %v2393_v39, %v2395_v29 }
 0x18b   : > { %13270 = vmatmul.mubr.msk.bf16.vlgmr.msra.gmra.mrb[0].mxu1 %vm701_vm2, %v2364_v59  ;;  %v8080_v59 = vrot.slane %v8078_v37, 1  ;;  %v8126_v37 = vshll.u32 %v16612_v45, 16 }
 0x18c   : > { %13273 = vmatprep.mubr.msk.bf16.mxu1 %vm701_vm2, %v2366_v60  ;;  %13306 = vmatpush3.bf16.msra.mxu1 %v2891_v50  ;;  %v8082_v60 = vshrl.u32 %v16533_v44, 16  ;;  %v8086_v50 = vshll.u32 %v16547_v6, 16 }
 0x18d   : > { %15048 = vmatprep.subr.msk.bf16.mxu1 %vm756_vm0, %v16476_v57  ;;  %13780 = vmatmul.mubr.msk.bf16.gmra.mrb[16].mxu0 %vm701_vm2, %v15209_v49  ;;  %v8073_v49 = vsel %vm552_vm1, %v8068_v10, %v8072_v25  ;;  %v8081_v36 = vsel %vm552_vm1, %v8076_v33, %v8080_v59  ;;  %v8120_v25 = vrot.slane %v8118_v18, 1 }
 0x18e   : > { %13783 = vmatprep.mubr.msk.bf16.mxu0 %vm701_vm2, %v15210_v30  ;;  %v2387_v30 = vrot.slane %v16261_v52, 2  ;;  %v8084_v61 = vor.u32 %v8082_v60, %v8080_v59  ;;  %v8088_v46 = vrot.slane %v8086_v50, 1  ;;  %v8128_v60 = vrot.slane %v8126_v37, 1  ;;  %v16636_v50 = vld [vmem:[%s15538_s9 + $0x28] sm:$0xff]  }
 0x18f   : > { %v8124_v59 = vor.u32 %v8122_v7, %v8120_v25  ;;  %v16697_v37 = vld [vmem:[%s15538_s9 + $0x48] sm:$0xff]  }
 0x190   : > { %v2388_v52 = vsel %vm2359_vm4, %v2385_v35, %v2387_v30  ;;  %v8089_v41 = vsel %vm552_vm1, %v8084_v61, %v8088_v46  ;;  %v2800_v35 = vrot.slane %v16609_v19, 2 }
 0x193   : > { %13274 = vmatmul.mubr.msk.bf16.gmra.mrb[4].mxu1 %vm701_vm2, %v2368_v5  ;;  %v2389_v5 = vrot.slane %v16266_v54, 2  ;;  %v16579_v54 = vld [vmem:[%s15852_s16 + $0x38] sm:$0xff]  }
 0x194   : > { %13277 = vmatprep.mubr.msk.bf16.mxu1 %vm701_vm2, %v2370_v20  ;;  %v8090_v20 = vshrl.u32 %v16547_v6, 16  ;;  %v8114_v17 = vshrl.u32 %v16579_v54, 16 }
 0x195   : > { %13784 = vmatmul.mubr.msk.bf16.gmra.mrb[20].mxu0 %vm701_vm2, %v15211_v14  ;;  %v8094_v14 = vshll.u32 %v16553_v53, 16 }
 0x196   : > { %13787 = vmatprep.mubr.msk.bf16.mxu0 %vm701_vm2, %v15212_v32  ;;  %v16573_v32 = vld [vmem:[%s18226_s4 + $0x2a] sm:$0x3] }
 0x197   : > { %v8096_v2 = vrot.slane %v8094_v14, 1  ;;  %v2804_v14 = vrot.slane %v16636_v50, 2 }
 0x199   : > { %v8100_v47 = vor.u32 %v8098_v51, %v8096_v2 }
 0x19b   : > { %13278 = vmatmul.mubr.msk.bf16.gmra.mrb[8].mxu1 %vm701_vm2, %v2372_v58  ;;  %v2390_v58 = vsel %vm2359_vm4, %v2387_v30, %v2389_v5 }
 0x19c   : > { %13281 = vmatprep.mubr.msk.bf16.mxu1 %vm701_vm2, %v2374_v56  ;;  %v8092_v56 = vor.u32 %v8090_v20, %v8088_v46  ;;  %v8129_v20 = vsel %vm552_vm1, %v8124_v59, %v8128_v60 }
 0x19d   : > { %13788 = vmatmul.mubr.msk.bf16.gmra.mrb[24].mxu0 %vm701_vm2, %v15213_v40  ;;  %v8102_v40 = vshll.u32 %v16568_v55, 16 }
 0x19e   : > { %13791 = vmatprep.mubr.msk.bf16.mxu0 %vm701_vm2, %v15214_v43  ;;  %v2391_v43 = vrot.slane %v16286_v13, 2 }
 0x1a0   : > { %v2392_v13 = vsel %vm2359_vm4, %v2389_v5, %v2391_v43  ;;  %v8130_v5 = vshrl.u32 %v16612_v45, 16 }
 0x1a3   : > { %13282 = vmatmul.mubr.msk.bf16.gmra.mrb[12].mxu1 %vm701_vm2, %v2376_v28  ;;  %v8110_v28 = vshll.u32 %v16579_v54, 16 }
 0x1a4   : > { %13285 = vmatprep.mubr.msk.bf16.mxu1 %vm701_vm2, %v2378_v23  ;;  %v8097_v23 = vsel %vm552_vm1, %v8092_v56, %v8096_v2  ;;  %v8132_v2 = vor.u32 %v8130_v5, %v8128_v60 }
 0x1a5   : > { %13792 = vmatmul.mubr.msk.bf16.gmra.mrb[28].mxu0 %vm701_vm2, %v15215_v11  ;;  %v8104_v11 = vrot.slane %v8102_v40, 1  ;;  %v8112_v42 = vrot.slane %v8110_v28, 1  ;;  %v16658_v40 = vld [vmem:[%s15538_s9 + $0x30] sm:$0xff]   ;;  %v16664_v28 = vld [vmem:[%s15538_s9 + $0x38] sm:$0xff]  }
 0x1a6   : > { %13795 = vmatprep.mubr.msk.bf16.mxu0 %vm701_vm2, %v15216_v31  ;;  %v16596_v31 = vld [vmem:[%s15538_s9 + $0x14] sm:$0xf] }
 0x1a7   : > { %v8108_v34 = vor.u32 %v8106_v8, %v8104_v11  ;;  %v8116_v10 = vor.u32 %v8114_v17, %v8112_v42  ;;  %v3338_v8 = vsel %vm756_vm0, %v16476_v57, 0  ;;  %v2806_v57 = vrot.slane %v16658_v40, 2  ;;  %v16693_v17 = vld [vmem:[%s15538_s9 + $0x40] sm:$0xff]  }
 0x1a9   : > { %v8113_v62 = vsel %vm552_vm1, %v8108_v34, %v8112_v42  ;;  %v8121_v30 = vsel %vm552_vm1, %v8116_v10, %v8120_v25  ;;  %v2808_v34 = vrot.slane %v16664_v28, 2  ;;  %v2807_v29 = vsel %vm2359_vm4, %v2804_v14, %v2806_v57  ;;  %v16700_v25 = vld [vmem:[%s15852_s16 + $0x78] sm:$0xff]  }
 0x1ab   : > { %13286 = vmatmul.mubr.msk.bf16.gmra.mrb[16].mxu1 %vm701_vm2, %v2380_v27  ;;  %v2394_v27 = vsel %vm2359_vm4, %v2391_v43, %v2393_v39  ;;  %v16672_v39 = vld [vmem:[%s18226_s4 + $0x10] sm:$0x3] }
 0x1ac   : > { %13289 = vmatprep.mubr.msk.bf16.mxu1 %vm701_vm2, %v2382_v48  ;;  %v16606_v48 = vcombine.low %v2667_v1, %v16596_v31 }
 0x1ad   : > { %13796 = vmatmul.mubr.msk.bf16.gmra.mrb[32].mxu0 %vm701_vm2, %v15217_v9  ;;  %v8105_v9 = vsel %vm552_vm1, %v8100_v47, %v8104_v11 }
 0x1ae   : > { %13801 = vmatprep.mubr.msk.bf16.mxu0 %vm701_vm2, %v8065_v22  ;;  %v2799_v22 = vrot.slane %v16606_v48, 2 }
 0x1b0   : > { %v2801_v33 = vsel %vm2359_vm4, %v2799_v22, %v2800_v35  ;;  %v2809_v22 = vsel %vm2359_vm4, %v2806_v57, %v2808_v34 }
 0x1b3   : > { %13290 = vmatmul.mubr.msk.bf16.gmra.mrb[20].mxu1 %vm701_vm2, %v2384_v0  ;;  %v16627_v0 = vld [vmem:[%s15852_s16 + $0x50] sm:$0xff]  }
 0x1b4   : > { %13293 = vmatprep.mubr.msk.bf16.mxu1 %vm701_vm2, %v2386_v12  ;;  %v16632_v12 = vld [vmem:[%s15538_s9 + $0x20] sm:$0xff]   ;;  %v8138_v61 = vshrl.u32 %v16627_v0, 16 }
 0x1b5   : > { %13802 = vmatmul.mubr.msk.bf16.vlgmr.msra.gmra.mrb[0].mxu0 %vm701_vm2, %v8073_v49  ;;  %v16639_v49 = vld [vmem:[%s15852_s16 + $0x58] sm:$0xff]  }
 0x1b6   : > { %13838 = vmatpush3.bf16.msra.mxu0 %v8570_v21  ;;  %13805 = vmatprep.mubr.msk.bf16.mxu0 %vm701_vm2, %v8081_v36  ;;  %v8134_v21 = vshll.u32 %v16627_v0, 16  ;;  %v2802_v36 = vrot.slane %v16632_v12, 2  ;;  %v8142_v46 = vshll.u32 %v16639_v49, 16 }
 0x1b7   : > { %15063 = vmatprep.subr.msk.bf16.mxu0 %vm756_vm0, %v16573_v32 }
 0x1b8   : > { %v2803_v56 = vsel %vm2359_vm4, %v2800_v35, %v2802_v36  ;;  %v8144_v51 = vrot.slane %v8142_v46, 1  ;;  %v16719_v46 = vld [vmem:[%s15538_s9 + $0x50] sm:$0xff]  }
 0x1bb   : > { %13294 = vmatmul.mubr.msk.bf16.gmra.mrb[24].mxu1 %vm701_vm2, %v2388_v52  ;;  %v8136_v52 = vrot.slane %v8134_v21, 1  ;;  %v2812_v21 = vrot.slane %v16697_v37, 2 }
 0x1bc   : > { %13297 = vmatprep.mubr.msk.bf16.mxu1 %vm701_vm2, %v2390_v58  ;;  %v16653_v58 = vld [vmem:[%s15852_s16 + $0x60] sm:$0xff]  }
 0x1bd   : > { %13806 = vmatmul.mubr.msk.bf16.gmra.mrb[4].mxu0 %vm701_vm2, %v8089_v41  ;;  %v2805_v41 = vsel %vm2359_vm4, %v2802_v36, %v2804_v14  ;;  %v8140_v43 = vor.u32 %v8138_v61, %v8136_v52  ;;  %v8150_v11 = vshll.u32 %v16653_v58, 16  ;;  %v8137_v1 = vsel %vm552_vm1, %v8132_v2, %v8136_v52 }
 0x1be   : > { %13809 = vmatprep.mubr.msk.bf16.mxu0 %vm701_vm2, %v8097_v23  ;;  %v16667_v23 = vld [vmem:[%s15852_s16 + $0x68] sm:$0xff]   ;;  %v8154_v42 = vshrl.u32 %v16653_v58, 16  ;;  %v8174_v36 = vshll.u32 %v16700_v25, 16 }
 0x1bf   : > { %v8145_v47 = vsel %vm552_vm1, %v8140_v43, %v8144_v51  ;;  %v8152_v18 = vrot.slane %v8150_v11, 1  ;;  %v8162_v59 = vshrl.u32 %v16667_v23, 16  ;;  %v16726_v43 = vld [vmem:[%s15852_s16 + $0x88] sm:$0xff]   ;;  %v2814_v11 = vrot.slane %v16719_v46, 2 }
 0x1c0   : > { %v8176_v2 = vrot.slane %v8174_v36, 1 }
 0x1c1   : > { %v8156_v35 = vor.u32 %v8154_v42, %v8152_v18 }
 0x1c3   : > { %13298 = vmatmul.mubr.msk.bf16.gmra.mrb[28].mxu1 %vm701_vm2, %v2392_v13  ;;  %v8146_v13 = vshrl.u32 %v16639_v49, 16 }
 0x1c4   : > { %13301 = vmatprep.mubr.msk.bf16.mxu1 %vm701_vm2, %v2394_v27  ;;  %v8158_v27 = vshll.u32 %v16667_v23, 16 }
 0x1c5   : > { %13810 = vmatmul.mubr.msk.bf16.gmra.mrb[8].mxu0 %vm701_vm2, %v8105_v9  ;;  %v16688_v9 = vld [vmem:[%s15852_s16 + $0x70] sm:$0xff]  }
 0x1c6   : > { %13813 = vmatprep.mubr.msk.bf16.mxu0 %vm701_vm2, %v8113_v62  ;;  %v8148_v62 = vor.u32 %v8146_v13, %v8144_v51  ;;  %v8160_v7 = vrot.slane %v8158_v27, 1  ;;  %v2815_v27 = vsel %vm2359_vm4, %v2812_v21, %v2814_v11 }
 0x1c8   : > { %v8153_v10 = vsel %vm552_vm1, %v8148_v62, %v8152_v18  ;;  %v8161_v60 = vsel %vm552_vm1, %v8156_v35, %v8160_v7  ;;  %v8164_v61 = vor.u32 %v8162_v59, %v8160_v7  ;;  %v16745_v62 = vld [vmem:[%s15852_s16 + $0x90] ss:$0 sps:$4 sm:$0x11]  }
 0x1cb   : > { %13302 = vmatmul.mubr.msk.bf16.gmra.mrb[32].mxu1 %vm701_vm2, %v2396_v4  ;;  %v8166_v4 = vshll.u32 %v16688_v9, 16 }
 0x1cc   : > { %13307 = vmatprep.mubr.msk.bf16.mxu1 %vm701_vm2, %v2801_v33  ;;  %v2810_v33 = vrot.slane %v16693_v17, 2 }
 0x1cd   : > { %13814 = vmatmul.mubr.msk.bf16.gmra.mrb[12].mxu0 %vm701_vm2, %v8121_v30  ;;  %v8170_v30 = vshrl.u32 %v16688_v9, 16  ;;  %v8168_v5 = vrot.slane %v8166_v4, 1  ;;  %v16749_v4 = vld [vmem:[%s15538_s9 + $0x68] sm:$0xff]  }
 0x1ce   : > { %13817 = vmatprep.mubr.msk.bf16.mxu0 %vm701_vm2, %v8129_v20  ;;  %v16714_v20 = vld [vmem:[%s15852_s16 + $0x80] sm:$0xff]   ;;  %v2811_v14 = vsel %vm2359_vm4, %v2808_v34, %v2810_v33  ;;  %v2813_v52 = vsel %vm2359_vm4, %v2810_v33, %v2812_v21  ;;  %v8190_v34 = vshll.u32 %v16726_v43, 16  ;;  %v8198_v21 = vshll.u32 %v16745_v62, 16 }
 0x1cf   : > { %v8182_v51 = vshll.u32 %v16714_v20, 16  ;;  %v2820_v36 = vrot.slane %v16749_v4, 2 }
 0x1d0   : > { %v8192_v7 = vrot.slane %v8190_v34, 1  ;;  %v16783_v34 = vld [vmem:[%s15538_s9 + $0x80] sm:$0xff]  }
 0x1d1   : > { %v8184_v42 = vrot.slane %v8182_v51, 1 }
 0x1d3   : > { %13308 = vmatmul.mubr.msk.bf16.vlgmr.msra.gmra.mrb[0].mxu1 %vm701_vm2, %v2803_v56  ;;  %v8172_v56 = vor.u32 %v8170_v30, %v8168_v5 }
 0x1d4   : > { %13311 = vmatprep.mubr.msk.bf16.mxu1 %vm701_vm2, %v2805_v41  ;;  %13344 = vmatpush3.bf16.msra.mxu1 %v3338_v8  ;;  %v16723_v41 = vld [vmem:[%s15538_s9 + $0x58] sm:$0xff]   ;;  %v8169_v8 = vsel %vm552_vm1, %v8164_v61, %v8168_v5 }
 0x1d5   : > { %15049 = vmatprep.subr.msk.bf16.mxu1 %vm756_vm0, %v16672_v39  ;;  %13818 = vmatmul.mubr.msk.bf16.gmra.mrb[16].mxu0 %vm701_vm2, %v8137_v1  ;;  %v8178_v1 = vshrl.u32 %v16700_v25, 16  ;;  %v8177_v57 = vsel %vm552_vm1, %v8172_v56, %v8176_v2  ;;  %v2816_v13 = vrot.slane %v16723_v41, 2  ;;  %v16765_v56 = vld [vmem:[%s15538_s9 + $0x70] sm:$0xff]  }
 0x1d6   : > { %13821 = vmatprep.mubr.msk.bf16.mxu0 %vm701_vm2, %v8145_v47  ;;  %v8186_v47 = vshrl.u32 %v16714_v20, 16 }
 0x1d7   : > { %v8180_v18 = vor.u32 %v8178_v1, %v8176_v2  ;;  %v2822_v1 = vrot.slane %v16765_v56, 2 }
 0x1d8   : > { %v8188_v35 = vor.u32 %v8186_v47, %v8184_v42 }
 0x1d9   : > { %v8185_v33 = vsel %vm552_vm1, %v8180_v18, %v8184_v42  ;;  %v2823_v47 = vsel %vm2359_vm4, %v2820_v36, %v2822_v1  ;;  %v16788_v18 = vld [vmem:[%s15538_s9 + $0x88] sm:$0xff]  }
 0x1da   : > { %v8193_v30 = vsel %vm552_vm1, %v8188_v35, %v8192_v7  ;;  %v2826_v35 = vrot.slane %v16783_v34, 2 }
 0x1db   : > { %13312 = vmatmul.mubr.msk.bf16.gmra.mrb[4].mxu1 %vm701_vm2, %v2807_v29  ;;  %v16742_v29 = vld [vmem:[%s15538_s9 + $0x60] sm:$0xff]  }
 0x1dc   : > { %13315 = vmatprep.mubr.msk.bf16.mxu1 %vm701_vm2, %v2809_v22  ;;  %v2817_v22 = vsel %vm2359_vm4, %v2814_v11, %v2816_v13  ;;  %v2818_v59 = vrot.slane %v16742_v29, 2  ;;  %v16770_v11 = vld [vmem:[%s15538_s9 + $0x78] sm:$0xff]  }
 0x1dd   : > { %13822 = vmatmul.mubr.msk.bf16.gmra.mrb[20].mxu0 %vm701_vm2, %v8153_v10  ;;  %v8472_v10 = vld [vmem:[%s15852_s16] sm:$0xe] }
 0x1de   : > { %13825 = vmatprep.mubr.msk.bf16.mxu0 %vm701_vm2, %v8161_v60  ;;  %v8194_v60 = vshrl.u32 %v16726_v43, 16  ;;  %v12386_v5 = vcombine.low %v8472_v10, %v16502_v16  ;;  %v2821_v2 = vsel %vm2359_vm4, %v2818_v59, %v2820_v36  ;;  %v2828_v10 = vrot.slane %v16788_v18, 2 }
 0x1e0   : > { %v8196_v61 = vor.u32 %v8194_v60, %v8192_v7  ;;  %v8478_v51 = vrot.slane %v12386_v5, 1  ;;  %v16808_v60 = vld [vmem:[%s15538_s9 + $0x90] sm:$0xff]  }
 0x1e3   : > { %13316 = vmatmul.mubr.msk.bf16.gmra.mrb[8].mxu1 %vm701_vm2, %v2811_v14  ;;  %v2819_v14 = vsel %vm2359_vm4, %v2816_v13, %v2818_v59  ;;  %v2824_v13 = vrot.slane %v16770_v11, 2  ;;  %v8485_v59 = vrot.slane %v16547_v6, 1  ;;  %v2830_v6 = vrot.slane %v16808_v60, 2 }
 0x1e4   : > { %13319 = vmatprep.mubr.msk.bf16.mxu1 %vm701_vm2, %v2813_v52  ;;  %v8200_v52 = vrot.slane %v8198_v21, 1  ;;  %v16812_v21 = vld [vmem:[%s15538_s9 + $0x98] sm:$0xff]  }
 0x1e5   : > { %13826 = vmatmul.mubr.msk.bf16.gmra.mrb[24].mxu0 %vm701_vm2, %v8169_v8  ;;  %v8479_v8 = vrot.slane %v16516_v26, 1  ;;  %v8481_v26 = vrot.slane %v16527_v38, 1  ;;  %v2825_v42 = vsel %vm2359_vm4, %v2822_v1, %v2824_v13  ;;  %v9009_v38 = vsel %vm756_vm0, %v16573_v32, 0  ;;  %v15256_v1 = vld [vmem:[%s15538_s9 + $0xa0] ss:$0 sps:$4 sm:$0x33]  }
 0x1e6   : > { %13829 = vmatprep.mubr.msk.bf16.mxu0 %vm701_vm2, %v8177_v57  ;;  %v8201_v16 = vsel %vm552_vm1, %v8196_v61, %v8200_v52  ;;  %v8487_v32 = vrot.slane %v16553_v53, 1  ;;  %v2832_v53 = vrot.slane %v16812_v21, 2  ;;  %v3117_v61 = vshll.u32 %v16606_v48, 16 }
 0x1e7   : > { %v8480_v57 = vsel %vm1159_vm5, %v8478_v51, %v8479_v8  ;;  %v3122_v52 = vshrl.u32 %v16609_v19, 16  ;;  %v8489_v51 = vrot.slane %v16568_v55, 1  ;;  %v2834_v55 = vrot.slane %v15256_v1, 2 }
 0x1e8   : > { %v8488_v5 = vsel %vm1159_vm5, %v8485_v59, %v8487_v32 }
 0x1eb   : > { %13320 = vmatmul.mubr.msk.bf16.gmra.mrb[12].mxu1 %vm701_vm2, %v2815_v27  ;;  %v8483_v27 = vrot.slane %v16533_v44, 1  ;;  %v16801_v44 = vld [vmem:[%s18226_s4 + $0x2c] sm:$0x3] }
 0x1ec   : > { %13323 = vmatprep.mubr.msk.bf16.mxu1 %vm701_vm2, %v2817_v22  ;;  %v8482_v22 = vsel %vm1159_vm5, %v8479_v8, %v8481_v26  ;;  %v2831_v8 = vsel %vm2359_vm4, %v2828_v10, %v2830_v6 }
 0x1ed   : > { %13830 = vmatmul.mubr.msk.bf16.gmra.mrb[28].mxu0 %vm701_vm2, %v8185_v33  ;;  %v8484_v7 = vsel %vm1159_vm5, %v8481_v26, %v8483_v27  ;;  %v2827_v33 = vsel %vm2359_vm4, %v2824_v13, %v2826_v35  ;;  %v8486_v36 = vsel %vm1159_vm5, %v8483_v27, %v8485_v59  ;;  %v8493_v59 = vrot.slane %v16600_v63, 1 }
 0x1ee   : > { %13833 = vmatprep.mubr.msk.bf16.mxu0 %vm701_vm2, %v8193_v30  ;;  %v2829_v30 = vsel %vm2359_vm4, %v2826_v35, %v2828_v10  ;;  %v3134_v35 = vshll.u32 %v16632_v12, 16  ;;  %v3143_v10 = vshll.u32 %v16636_v50, 16 }
 0x1f3   : > { %13324 = vmatmul.mubr.msk.bf16.gmra.mrb[16].mxu1 %vm701_vm2, %v2819_v14  ;;  %v3114_v14 = vshrl.u32 %v16606_v48, 16  ;;  %v3124_v48 = vrot.slane %v3122_v52, 2 }
 0x1f4   : > { %13327 = vmatprep.mubr.msk.bf16.mxu1 %vm701_vm2, %v2821_v2  ;;  %v3125_v2 = vshll.u32 %v16609_v19, 16 }
 0x1f5   : > { %13834 = vmatmul.mubr.msk.bf16.gmra.mrb[32].mxu0 %vm701_vm2, %v8201_v16  ;;  %v2833_v16 = vsel %vm2359_vm4, %v2830_v6, %v2832_v53  ;;  %v3116_v13 = vrot.slane %v3114_v14, 2  ;;  %v8495_v6 = vrot.slane %v16612_v45, 1  ;;  %v3145_v14 = vrot.slane %v3143_v10, 3 }
 0x1f6   : > { %13839 = vmatprep.mubr.msk.bf16.mxu0 %vm701_vm2, %v8480_v57  ;;  %v8491_v57 = vrot.slane %v16579_v54, 1  ;;  %v3127_v26 = vrot.slane %v3125_v2, 3  ;;  %v3140_v54 = vshrl.u32 %v16636_v50, 16  ;;  %v3152_v2 = vshll.u32 %v16658_v40, 16 }
 0x1f7   : > { %v8496_v63 = vsel %vm1159_vm5, %v8493_v59, %v8495_v6  ;;  %v3161_v45 = vshll.u32 %v16664_v28, 16 }
 0x1f8   : > { %v8492_v27 = vsel %vm1159_vm5, %v8489_v51, %v8491_v57 }
 0x1fb   : > { %13328 = vmatmul.mubr.msk.bf16.gmra.mrb[20].mxu1 %vm701_vm2, %v2823_v47  ;;  %v3119_v47 = vrot.slane %v3117_v61, 3  ;;  %v8494_v61 = vsel %vm1159_vm5, %v8491_v57, %v8493_v59 }
 0x1fc   : > { %13331 = vmatprep.mubr.msk.bf16.mxu1 %vm701_vm2, %v2825_v42  ;;  %v8490_v42 = vsel %vm1159_vm5, %v8487_v32, %v8489_v51 }
 0x1fd   : > { %13840 = vmatmul.mubr.msk.bf16.vlgmr.msra.gmra.mrb[0].mxu0 %vm701_vm2, %v8482_v22  ;;  %v3131_v22 = vshrl.u32 %v16632_v12, 16 }
 0x1fe   : > { %13876 = vmatpush3.bf16.msra.mxu0 %v9009_v38  ;;  %13843 = vmatprep.mubr.msk.bf16.mxu0 %vm701_vm2, %v8484_v7  ;;  %v3120_v38 = vor.u32 %v3119_v47, %v3116_v13  ;;  %v3128_v7 = vor.u32 %v3127_v26, %v3124_v48  ;;  %v3154_v13 = vrot.slane %v3152_v2, 3  ;;  %v8499_v47 = vrot.slane %v16639_v49, 1 }
 0x1ff   : > { %15064 = vmatprep.subr.msk.bf16.mxu0 %vm756_vm0, %v16801_v44  ;;  %v3133_v32 = vrot.slane %v3131_v22, 2  ;;  %v3652_v26 = vsel %vm756_vm0, %v16672_v39, 0  ;;  %v3167_v49 = vshrl.u32 %v16693_v17, 16 }
 0x201   : > { %v3169_v59 = vrot.slane %v3167_v49, 2  ;;  %v8509_v49 = vrot.slane %v16714_v20, 1 }
 0x203   : > { %13332 = vmatmul.mubr.msk.bf16.gmra.mrb[24].mxu1 %vm701_vm2, %v2827_v33  ;;  %v2835_v33 = vsel %vm2359_vm4, %v2832_v53, %v2834_v55  ;;  %v3149_v53 = vshrl.u32 %v16658_v40, 16  ;;  %v3163_v55 = vrot.slane %v3161_v45, 3 }
 0x204   : > { %13335 = vmatprep.mubr.msk.bf16.mxu1 %vm701_vm2, %v2829_v30  ;;  %v3136_v30 = vrot.slane %v3134_v35, 3  ;;  %v3170_v35 = vshll.u32 %v16693_v17, 16 }
 0x205   : > { %13844 = vmatmul.mubr.msk.bf16.gmra.mrb[4].mxu0 %vm701_vm2, %v8486_v36  ;;  %v3129_v36 = vsel %vm3112_vm6, %v3120_v38, %v3128_v7  ;;  %v3151_v57 = vrot.slane %v3149_v53, 2  ;;  %v3188_v53 = vshll.u32 %v16719_v46, 16 }
 0x206   : > { %13847 = vmatprep.mubr.msk.bf16.mxu0 %vm701_vm2, %v8488_v5  ;;  %v3142_v5 = vrot.slane %v3140_v54, 2  ;;  %v3137_v52 = vor.u32 %v3136_v30, %v3133_v32  ;;  %v3179_v54 = vshll.u32 %v16697_v37, 16  ;;  %v3172_v32 = vrot.slane %v3170_v35, 3 }
 0x207   : > { %v3155_v22 = vor.u32 %v3154_v13, %v3151_v57  ;;  %v8507_v57 = vrot.slane %v16700_v25, 1  ;;  %v3212_v25 = vshrl.u32 %v16749_v4, 16 }
 0x208   : > { %v3146_v51 = vor.u32 %v3145_v14, %v3142_v5  ;;  %v3138_v1 = vsel %vm3112_vm6, %v3128_v7, %v3137_v52  ;;  %v3176_v7 = vshrl.u32 %v16697_v37, 16  ;;  %v3181_v5 = vrot.slane %v3179_v54, 3 }
 0x209   : > { %v8510_v20 = vsel %vm1159_vm5, %v8507_v57, %v8509_v49 }
 0x20a   : > { %v3147_v48 = vsel %vm3112_vm6, %v3137_v52, %v3146_v51  ;;  %v3156_v10 = vsel %vm3112_vm6, %v3146_v51, %v3155_v22  ;;  %v3185_v52 = vshrl.u32 %v16719_v46, 16 }
 0x20b   : > { %13336 = vmatmul.mubr.msk.bf16.gmra.mrb[28].mxu1 %vm701_vm2, %v2831_v8  ;;  %v3158_v8 = vshrl.u32 %v16664_v28, 16 }
 0x20c   : > { %13339 = vmatprep.mubr.msk.bf16.mxu1 %vm701_vm2, %v2833_v16  ;;  %v8497_v16 = vrot.slane %v16627_v0, 1  ;;  %v3187_v45 = vrot.slane %v3185_v52, 2  ;;  %v3230_v52 = vshrl.u32 %v16770_v11, 16 }
 0x20d   : > { %13848 = vmatmul.mubr.msk.bf16.gmra.mrb[8].mxu0 %vm701_vm2, %v8490_v42  ;;  %v3160_v42 = vrot.slane %v3158_v8, 2  ;;  %v8505_v8 = vrot.slane %v16688_v9, 1  ;;  %v3206_v9 = vshll.u32 %v16742_v29, 16 }
 0x20e   : > { %13851 = vmatprep.mubr.msk.bf16.mxu0 %vm701_vm2, %v8492_v27  ;;  %v16867_v27 = vld [vmem:[%s18226_s4 + $0x12] sm:$0x3]  ;;  %v8498_v0 = vsel %vm1159_vm5, %v8495_v6, %v8497_v16  ;;  %v8500_v39 = vsel %vm1159_vm5, %v8497_v16, %v8499_v47  ;;  %v3178_v6 = vrot.slane %v3176_v7, 2  ;;  %v3190_v16 = vrot.slane %v3188_v53, 3 }
 0x20f   : > { %v3164_v38 = vor.u32 %v3163_v55, %v3160_v42  ;;  %v3203_v42 = vshrl.u32 %v16742_v29, 16  ;;  %v8508_v55 = vsel %vm1159_vm5, %v8505_v8, %v8507_v57  ;;  %v8511_v7 = vrot.slane %v16726_v43, 1  ;;  %v16940_v57 = vld [vmem:[%s15852_s16 + $0x18] sm:$0xff]  }
 0x210   : > { %v3182_v2 = vor.u32 %v3181_v5, %v3178_v6  ;;  %v3224_v6 = vshll.u32 %v16765_v56, 16  ;;  %v3233_v53 = vshll.u32 %v16770_v11, 16 }
 0x211   : > { %v3165_v30 = vsel %vm3112_vm6, %v3155_v22, %v3164_v38  ;;  %v3215_v22 = vshll.u32 %v16749_v4, 16  ;;  %v8512_v5 = vsel %vm1159_vm5, %v8509_v49, %v8511_v7 }
 0x213   : > { %13340 = vmatmul.mubr.msk.bf16.gmra.mrb[32].mxu1 %vm701_vm2, %v2835_v33  ;;  %v8501_v33 = vrot.slane %v16653_v58, 1 }
 0x214   : > { %13345 = vmatprep.mubr.msk.bf16.mxu1 %vm701_vm2, %v3129_v36  ;;  %v8503_v36 = vrot.slane %v16667_v23, 1  ;;  %v3197_v23 = vshll.u32 %v16723_v41, 16 }
 0x215   : > { %13852 = vmatmul.mubr.msk.bf16.gmra.mrb[12].mxu0 %vm701_vm2, %v8494_v61  ;;  %v8502_v14 = vsel %vm1159_vm5, %v8499_v47, %v8501_v33  ;;  %v3173_v61 = vor.u32 %v3172_v32, %v3169_v59  ;;  %v8785_v59 = vld [vmem:[%s15852_s16 + $0x8] sm:$0xe]  ;;  %v16915_v32 = vld [vmem:[%s15852_s16 + $0xc] sm:$0xf] }
 0x216   : > { %13855 = vmatprep.mubr.msk.bf16.mxu0 %vm701_vm2, %v8496_v63  ;;  %v8504_v58 = vsel %vm1159_vm5, %v8501_v33, %v8503_v36  ;;  %v3194_v63 = vshrl.u32 %v16723_v41, 16  ;;  %v3199_v47 = vrot.slane %v3197_v23, 3  ;;  %v3217_v33 = vrot.slane %v3215_v22, 3 }
 0x217   : > { %v3174_v51 = vsel %vm3112_vm6, %v3164_v38, %v3173_v61  ;;  %v3208_v38 = vrot.slane %v3206_v9, 3  ;;  %v16923_v43 = vcombine.low %v8785_v59, %v16915_v32  ;;  %v3226_v23 = vrot.slane %v3224_v6, 3  ;;  %v16948_v9 = vld [vmem:[%s15852_s16 + $0x20] sm:$0xff]  }
 0x218   : > { %v3196_v13 = vrot.slane %v3194_v63, 2 }
 0x21b   : > { %13346 = vmatmul.mubr.msk.bf16.vlgmr.msra.gmra.mrb[0].mxu1 %vm701_vm2, %v3138_v1  ;;  %v3183_v1 = vsel %vm3112_vm6, %v3173_v61, %v3182_v2  ;;  %v16927_v61 = vld [vmem:[%s15852_s16 + $0x10] sm:$0xff]  }
 0x21c   : > { %13349 = vmatprep.mubr.msk.bf16.mxu1 %vm701_vm2, %v3147_v48  ;;  %13382 = vmatpush3.bf16.msra.mxu1 %v3652_v26  ;;  %v8506_v48 = vsel %vm1159_vm5, %v8503_v36, %v8505_v8  ;;  %v3191_v26 = vor.u32 %v3190_v16, %v3187_v45  ;;  %v3221_v36 = vshrl.u32 %v16765_v56, 16  ;;  %v8918_v45 = vrot.slane %v16927_v61, 1 }
 0x21d   : > { %15050 = vmatprep.subr.msk.bf16.mxu1 %vm756_vm0, %v16867_v27  ;;  %13856 = vmatmul.mubr.msk.bf16.gmra.mrb[16].mxu0 %vm701_vm2, %v8498_v0  ;;  %v3200_v0 = vor.u32 %v3199_v47, %v3196_v13  ;;  %v3232_v16 = vrot.slane %v3230_v52, 2  ;;  %v3239_v47 = vshrl.u32 %v16783_v34, 16  ;;  %v3266_v52 = vshrl.u32 %v16812_v21, 16 }
 0x21e   : > { %13859 = vmatprep.mubr.msk.bf16.mxu0 %vm701_vm2, %v8500_v39  ;;  %v3192_v35 = vsel %vm3112_vm6, %v3182_v2, %v3191_v26  ;;  %v3205_v39 = vrot.slane %v3203_v42, 2  ;;  %v3223_v63 = vrot.slane %v3221_v36, 2  ;;  %v3260_v36 = vshll.u32 %v16808_v60, 16 }
 0x21f   : > { %v3201_v54 = vsel %vm3112_vm6, %v3191_v26, %v3200_v0  ;;  %v3241_v49 = vrot.slane %v3239_v47, 2  ;;  %v16994_v47 = vld [vmem:[%s15852_s16 + $0x38] sm:$0xff]  }
 0x220   : > { %v3227_v13 = vor.u32 %v3226_v23, %v3223_v63  ;;  %v3262_v23 = vrot.slane %v3260_v36, 3 }
 0x223   : > { %13350 = vmatmul.mubr.msk.bf16.gmra.mrb[4].mxu1 %vm701_vm2, %v3156_v10  ;;  %v3214_v10 = vrot.slane %v3212_v25, 2  ;;  %v8920_v25 = vrot.slane %v16940_v57, 1 }
 0x224   : > { %13353 = vmatprep.mubr.msk.bf16.mxu1 %vm701_vm2, %v3165_v30  ;;  %v3209_v30 = vor.u32 %v3208_v38, %v3205_v39  ;;  %v8922_v38 = vrot.slane %v16948_v9, 1 }
 0x225   : > { %13860 = vmatmul.mubr.msk.bf16.gmra.mrb[20].mxu0 %vm701_vm2, %v8502_v14  ;;  %v3218_v14 = vor.u32 %v3217_v33, %v3214_v10  ;;  %v8921_v10 = vsel %vm1159_vm5, %v8918_v45, %v8920_v25  ;;  %v9455_v33 = vsel %vm756_vm0, %v16801_v44, 0  ;;  %v16977_v44 = vld [vmem:[%s18226_s4 + $0x2e] sm:$0x3] }
 0x226   : > { %13863 = vmatprep.mubr.msk.bf16.mxu0 %vm701_vm2, %v8504_v58  ;;  %v8513_v58 = vrot.slane %v16745_v62, 1  ;;  %v3210_v2 = vsel %vm3112_vm6, %v3200_v0, %v3209_v30  ;;  %v3251_v0 = vshll.u32 %v16788_v18, 16  ;;  %v8923_v6 = vsel %vm1159_vm5, %v8920_v25, %v8922_v38  ;;  %v3553_v25 = vld [vmem:[%s15538_s9 + $0x10] sm:$0x8] }
 0x227   : > { %v3219_v8 = vsel %vm3112_vm6, %v3209_v30, %v3218_v14  ;;  %v3228_v22 = vsel %vm3112_vm6, %v3218_v14, %v3227_v13  ;;  %v3257_v30 = vshrl.u32 %v16808_v60, 16  ;;  %v16970_v14 = vld [vmem:[%s15852_s16 + $0x30] sm:$0xff]  }
 0x228   : > { %v8514_v62 = vsel %vm1159_vm5, %v8511_v7, %v8513_v58 }
 0x229   : > { %v3259_v63 = vrot.slane %v3257_v30, 2 }
 0x22b   : > { %13354 = vmatmul.mubr.msk.bf16.gmra.mrb[8].mxu1 %vm701_vm2, %v3174_v51  ;;  %v8917_v51 = vrot.slane %v16923_v43, 1 }
 0x22c   : > { %13357 = vmatprep.mubr.msk.bf16.mxu1 %vm701_vm2, %v3183_v1  ;;  %v3235_v1 = vrot.slane %v3233_v53, 3  ;;  %v3269_v53 = vshll.u32 %v16812_v21, 16 }
 0x22d   : > { %13864 = vmatmul.mubr.msk.bf16.gmra.mrb[24].mxu0 %vm701_vm2, %v8506_v48  ;;  %v3242_v48 = vshll.u32 %v16783_v34, 16  ;;  %v8919_v26 = vsel %vm1159_vm5, %v8917_v51, %v8918_v45  ;;  %v16984_v51 = vld [vmem:[%s15538_s9 + $0xa0] ss:$0 sps:$4 sm:$0x77]   ;;  %v8926_v45 = vrot.slane %v16970_v14, 1  ;;  %s417_s9 = scalar_lea.vmem %s18229_s7, %s11826_s12 }
 0x22e   : > { %13867 = vmatprep.mubr.msk.bf16.mxu0 %vm701_vm2, %v8508_v55  ;;  %v3236_v42 = vor.u32 %v3235_v1, %v3232_v16  ;;  %v3248_v55 = vshrl.u32 %v16788_v18, 16  ;;  %v3268_v16 = vrot.slane %v3266_v52, 2  ;;  %v3271_v1 = vrot.slane %v3269_v53, 3 }
 0x230   : > { %v3237_v39 = vsel %vm3112_vm6, %v3227_v13, %v3236_v42  ;;  %v3250_v7 = vrot.slane %v3248_v55, 2  ;;  %v3263_v13 = vor.u32 %v3262_v23, %v3259_v63  ;;  %v3272_v55 = vor.u32 %v3271_v1, %v3268_v16  ;;  %v17032_v63 = vld [vmem:[%s15852_s16 + $0x58] sm:$0xff]  }
 0x231   : > { %v8936_v1 = vrot.slane %v17032_v63, 1 }
 0x233   : > { %13358 = vmatmul.mubr.msk.bf16.gmra.mrb[12].mxu1 %vm701_vm2, %v3192_v35  ;;  %v3244_v35 = vrot.slane %v3242_v48, 3  ;;  %v3275_v48 = vshrl.u32 %v16984_v51, 16 }
 0x234   : > { %13361 = vmatprep.mubr.msk.bf16.mxu1 %vm701_vm2, %v3201_v54  ;;  %v3253_v54 = vrot.slane %v3251_v0, 3  ;;  %v17000_v0 = vld [vmem:[%s15852_s16 + $0x40] sm:$0xff]  }
 0x235   : > { %13868 = vmatmul.mubr.msk.bf16.gmra.mrb[28].mxu0 %vm701_vm2, %v8510_v20  ;;  %v3245_v59 = vor.u32 %v3244_v35, %v3241_v49  ;;  %v16964_v20 = vld [vmem:[%s15852_s16 + $0x28] sm:$0xff]   ;;  %v8928_v49 = vrot.slane %v16994_v47, 1  ;;  %v3277_v35 = vrot.slane %v3275_v48, 2 }
 0x236   : > { %13871 = vmatprep.mubr.msk.bf16.mxu0 %vm701_vm2, %v8512_v5  ;;  %v3254_v5 = vor.u32 %v3253_v54, %v3250_v7  ;;  %v8930_v7 = vrot.slane %v17000_v0, 1  ;;  %v12040_v54 = vcombine.low %v3553_v25, %v16596_v31  ;;  %v17062_v25 = vld [vmem:[%s15852_s16 + $0x70] sm:$0xff]  }
 0x237   : > { %v3246_v58 = vsel %vm3112_vm6, %v3236_v42, %v3245_v59 }
 0x238   : > { %v8931_v30 = vsel %vm1159_vm5, %v8928_v49, %v8930_v7  ;;  %v3560_v36 = vrot.slane %v12040_v54, 3  ;;  %v3573_v54 = vrot.slane %v16697_v37, 3  ;;  %v3575_v37 = vrot.slane %v16719_v46, 3 }
 0x23b   : > { %13362 = vmatmul.mubr.msk.bf16.gmra.mrb[16].mxu1 %vm701_vm2, %v3210_v2  ;;  %v8924_v2 = vrot.slane %v16964_v20, 1 }
 0x23c   : > { %13365 = vmatprep.mubr.msk.bf16.mxu1 %vm701_vm2, %v3219_v8  ;;  %v3255_v8 = vsel %vm3112_vm6, %v3245_v59, %v3254_v5  ;;  %v17014_v59 = vld [vmem:[%s15852_s16 + $0x48] sm:$0xff]  }
 0x23d   : > { %13872 = vmatmul.mubr.msk.bf16.gmra.mrb[32].mxu0 %vm701_vm2, %v8514_v62  ;;  %v8925_v62 = vsel %vm1159_vm5, %v8922_v38, %v8924_v2  ;;  %v8927_v42 = vsel %vm1159_vm5, %v8924_v2, %v8926_v45  ;;  %v3273_v38 = vsel %vm3112_vm6, %v3263_v13, %v3272_v55  ;;  %v8932_v52 = vrot.slane %v17014_v59, 1 }
 0x23e   : > { %13877 = vmatprep.mubr.msk.bf16.mxu0 %vm701_vm2, %v8919_v26  ;;  %v3278_v26 = vshll.u32 %v16984_v51, 16 }
 0x23f   : > { %v8933_v2 = vsel %vm1159_vm5, %v8930_v7, %v8932_v52 }
 0x243   : > { %13366 = vmatmul.mubr.msk.bf16.gmra.mrb[20].mxu1 %vm701_vm2, %v3228_v22  ;;  %v3264_v22 = vsel %vm3112_vm6, %v3254_v5, %v3263_v13  ;;  %v17019_v5 = vld [vmem:[%s15852_s16 + $0x50] sm:$0xff]   ;;  %v4050_v13 = vsel %vm756_vm0, %v16867_v27, 0  ;;  %v3569_v27 = vrot.slane %v16664_v28, 3 }
 0x244   : > { %13369 = vmatprep.mubr.msk.bf16.mxu1 %vm701_vm2, %v3237_v39  ;;  %v3280_v39 = vrot.slane %v3278_v26, 3  ;;  %v3567_v26 = vrot.slane %v16658_v40, 3 }
 0x245   : > { %13878 = vmatmul.mubr.msk.bf16.vlgmr.msra.gmra.mrb[0].mxu0 %vm701_vm2, %v8921_v10  ;;  %v8929_v10 = vsel %vm1159_vm5, %v8926_v45, %v8928_v49  ;;  %v17037_v45 = vld [vmem:[%s15852_s16 + $0x60] sm:$0xff]  }
 0x246   : > { %13914 = vmatpush3.bf16.msra.mxu0 %v9455_v33  ;;  %13881 = vmatprep.mubr.msk.bf16.mxu0 %vm701_vm2, %v8923_v6  ;;  %v3281_v33 = vor.u32 %v3280_v39, %v3277_v35  ;;  %v3561_v6 = vrot.slane %v16609_v19, 3  ;;  %v3563_v19 = vrot.slane %v16632_v12, 3  ;;  %v3570_v49 = vsel %vm3559_vm7, %v3567_v26, %v3569_v27 }
 0x247   : > { %15065 = vmatprep.subr.msk.bf16.mxu0 %vm756_vm0, %v16977_v44  ;;  %v8942_v35 = vrot.slane %v17062_v25, 1  ;;  %v3571_v39 = vrot.slane %v16693_v17, 3 }
 0x248   : > { %v3282_v31 = vsel %vm3112_vm6, %v3272_v55, %v3281_v33  ;;  %v3562_v53 = vsel %vm3559_vm7, %v3560_v36, %v3561_v6  ;;  %v3564_v16 = vsel %vm3559_vm7, %v3561_v6, %v3563_v19 }
 0x249   : > { %v3572_v33 = vsel %vm3559_vm7, %v3569_v27, %v3571_v39  ;;  %v3574_v36 = vsel %vm3559_vm7, %v3571_v39, %v3573_v54 }
 0x24b   : > { %13370 = vmatmul.mubr.msk.bf16.gmra.mrb[24].mxu1 %vm701_vm2, %v3246_v58  ;;  %v8934_v58 = vrot.slane %v17019_v5, 1 }
 0x24c   : > { %13373 = vmatprep.mubr.msk.bf16.mxu1 %vm701_vm2, %v3255_v8  ;;  %v3565_v8 = vrot.slane %v16636_v50, 3  ;;  %v17050_v50 = vld [vmem:[%s18226_s4 + $0x14] sm:$0x3] }
 0x24d   : > { %13882 = vmatmul.mubr.msk.bf16.gmra.mrb[4].mxu0 %vm701_vm2, %v8925_v62  ;;  %v8935_v23 = vsel %vm1159_vm5, %v8932_v52, %v8934_v58  ;;  %v8938_v62 = vrot.slane %v17037_v45, 1  ;;  %v8937_v48 = vsel %vm1159_vm5, %v8934_v58, %v8936_v1  ;;  %v3577_v52 = vrot.slane %v16723_v41, 3 }
 0x24e   : > { %13885 = vmatprep.mubr.msk.bf16.mxu0 %vm701_vm2, %v8927_v42  ;;  %v3566_v12 = vsel %vm3559_vm7, %v3563_v19, %v3565_v8  ;;  %v17057_v42 = vld [vmem:[%s15852_s16 + $0x68] sm:$0xff]   ;;  %v9234_v41 = vshll.u32 %v16923_v43, 16 }
 0x24f   : > { %v8939_v55 = vsel %vm1159_vm5, %v8936_v1, %v8938_v62  ;;  %v8940_v40 = vrot.slane %v17057_v42, 1  ;;  %v9242_v1 = vshll.u32 %v16927_v61, 16 }
 0x250   : > { %v9236_v27 = vrot.slane %v9234_v41, 2  ;;  %v9275_v41 = vshrl.u32 %v16970_v14, 16 }
 0x251   : > { %v8941_v28 = vsel %vm1159_vm5, %v8938_v62, %v8940_v40  ;;  %v8943_v7 = vsel %vm1159_vm5, %v8940_v40, %v8942_v35  ;;  %v3579_v62 = vrot.slane %v16742_v29, 3  ;;  %v9248_v40 = vshrl.u32 %v16940_v57, 16 }
 0x253   : > { %13374 = vmatmul.mubr.msk.bf16.gmra.mrb[28].mxu1 %vm701_vm2, %v3264_v22  ;;  %v3568_v22 = vsel %vm3559_vm7, %v3565_v8, %v3567_v26  ;;  %v9231_v8 = vshrl.u32 %v16923_v43, 16  ;;  %v3581_v26 = vrot.slane %v16749_v4, 3  ;;  %v9257_v4 = vshrl.u32 %v16948_v9, 16 }
 0x254   : > { %13377 = vmatprep.mubr.msk.bf16.mxu1 %vm701_vm2, %v3273_v38  ;;  %v17077_v38 = vld [vmem:[%s15852_s16 + $0x78] sm:$0xff]  }
 0x255   : > { %13886 = vmatmul.mubr.msk.bf16.gmra.mrb[8].mxu0 %vm701_vm2, %v8929_v10  ;;  %v17082_v10 = vld [vmem:[%s15852_s16 + $0x80] sm:$0xff]  }
 0x256   : > { %13889 = vmatprep.mubr.msk.bf16.mxu0 %vm701_vm2, %v8931_v30  ;;  %v8944_v30 = vrot.slane %v17077_v38, 1  ;;  %v8946_v17 = vrot.slane %v17082_v10, 1 }
 0x258   : > { %v8945_v6 = vsel %vm1159_vm5, %v8942_v35, %v8944_v30  ;;  %v8947_v58 = vsel %vm1159_vm5, %v8944_v30, %v8946_v17  ;;  %v3580_v35 = vsel %vm3559_vm7, %v3577_v52, %v3579_v62 }
 0x25b   : > { %13378 = vmatmul.mubr.msk.bf16.gmra.mrb[32].mxu1 %vm701_vm2, %v3282_v31  ;;  %v17095_v31 = vld [vmem:[%s15852_s16 + $0x88] sm:$0xff]  }
 0x25c   : > { %13383 = vmatprep.mubr.msk.bf16.mxu1 %vm701_vm2, %v3562_v53  ;;  %v17099_v53 = vld [vmem:[%s15852_s16 + $0x90] sm:$0xff]   ;;  %v8948_v19 = vrot.slane %v17095_v31, 1 }
 0x25d   : > { %13890 = vmatmul.mubr.msk.bf16.gmra.mrb[12].mxu0 %vm701_vm2, %v8933_v2  ;;  %v3576_v2 = vsel %vm3559_vm7, %v3573_v54, %v3575_v37  ;;  %v8950_v46 = vrot.slane %v17099_v53, 1  ;;  %v9260_v54 = vshll.u32 %v16948_v9, 16 }
 0x25e   : > { %13893 = vmatprep.mubr.msk.bf16.mxu0 %vm701_vm2, %v8935_v23  ;;  %v3578_v23 = vsel %vm3559_vm7, %v3575_v37, %v3577_v52  ;;  %v3585_v37 = vrot.slane %v16770_v11, 3  ;;  %v9259_v52 = vrot.slane %v9257_v4, 1  ;;  %v9278_v11 = vshll.u32 %v16970_v14, 16 }
 0x263   : > { %13384 = vmatmul.mubr.msk.bf16.vlgmr.msra.gmra.mrb[0].mxu1 %vm701_vm2, %v3564_v16  ;;  %v9239_v16 = vshrl.u32 %v16927_v61, 16 }
 0x264   : > { %13387 = vmatprep.mubr.msk.bf16.mxu1 %vm701_vm2, %v3566_v12  ;;  %13420 = vmatpush3.bf16.msra.mxu1 %v4050_v13  ;;  %v8949_v12 = vsel %vm1159_vm5, %v8946_v17, %v8948_v19  ;;  %v8951_v13 = vsel %vm1159_vm5, %v8948_v19, %v8950_v46  ;;  %v3583_v17 = vrot.slane %v16765_v56, 3 }
 0x265   : > { %15051 = vmatprep.subr.msk.bf16.mxu1 %vm756_vm0, %v17050_v50  ;;  %13894 = vmatmul.mubr.msk.bf16.gmra.mrb[16].mxu0 %vm701_vm2, %v8937_v48  ;;  %v15277_v48 = vld [vmem:[%s15852_s16 + $0x98] ss:$0 sps:$4 sm:$0x11]   ;;  %v9241_v43 = vrot.slane %v9239_v16, 1 }
 0x266   : > { %13897 = vmatprep.mubr.msk.bf16.mxu0 %vm701_vm2, %v8939_v55  ;;  %v9233_v55 = vrot.slane %v9231_v8, 1  ;;  %v8952_v29 = vrot.slane %v15277_v48, 1  ;;  %v3584_v19 = vsel %vm3559_vm7, %v3581_v26, %v3583_v17  ;;  %v3586_v8 = vsel %vm3559_vm7, %v3583_v17, %v3585_v37 }
 0x268   : > { %v9237_v39 = vor.u32 %v9236_v27, %v9233_v55  ;;  %v9277_v55 = vrot.slane %v9275_v41, 1  ;;  %v9280_v27 = vrot.slane %v9278_v11, 2 }
 0x26b   : > { %13388 = vmatmul.mubr.msk.bf16.gmra.mrb[4].mxu1 %vm701_vm2, %v3568_v22  ;;  %v9244_v22 = vrot.slane %v9242_v1, 2  ;;  %v9768_v1 = vsel %vm756_vm0, %v16977_v44, 0 }
 0x26c   : > { %13391 = vmatprep.mubr.msk.bf16.mxu1 %vm701_vm2, %v3570_v49  ;;  %v9251_v49 = vshll.u32 %v16940_v57, 16 }
 0x26d   : > { %13898 = vmatmul.mubr.msk.bf16.gmra.mrb[20].mxu0 %vm701_vm2, %v8941_v28  ;;  %v3582_v28 = vsel %vm3559_vm7, %v3579_v62, %v3581_v26  ;;  %v3589_v26 = vrot.slane %v16788_v18, 3 }
 0x26e   : > { %13901 = vmatprep.mubr.msk.bf16.mxu0 %vm701_vm2, %v8943_v7  ;;  %v9245_v7 = vor.u32 %v9244_v22, %v9241_v43  ;;  %v9253_v30 = vrot.slane %v9251_v49, 2  ;;  %v17152_v43 = vld [vmem:[%s18226_s4 + $0x30] sm:$0x3]  ;;  %v9284_v22 = vshrl.u32 %v16994_v47, 16  ;;  %v9281_v49 = vor.u32 %v9280_v27, %v9277_v55 }
 0x273   : > { %13392 = vmatmul.mubr.msk.bf16.gmra.mrb[8].mxu1 %vm701_vm2, %v3572_v33  ;;  %v9250_v33 = vrot.slane %v9248_v40, 1  ;;  %v9287_v40 = vshll.u32 %v16994_v47, 16 }
 0x274   : > { %13395 = vmatprep.mubr.msk.bf16.mxu1 %vm701_vm2, %v3574_v36  ;;  %v8953_v36 = vsel %vm1159_vm5, %v8950_v46, %v8952_v29  ;;  %v9269_v46 = vshll.u32 %v16964_v20, 16  ;;  %v9296_v29 = vshll.u32 %v17000_v0, 16 }
 0x275   : > { %13902 = vmatmul.mubr.msk.bf16.gmra.mrb[24].mxu0 %vm701_vm2, %v8945_v6  ;;  %v9246_v6 = vsel %vm1912_vm3, %v9237_v39, %v9245_v7  ;;  %v3591_v39 = vrot.slane %v16808_v60, 3  ;;  %v9289_v4 = vrot.slane %v9287_v40, 2 }
 0x276   : > { %13905 = vmatprep.mubr.msk.bf16.mxu0 %vm701_vm2, %v8947_v58  ;;  %v9262_v58 = vrot.slane %v9260_v54, 2 }
 0x277   : > { %v3592_v17 = vsel %vm3559_vm7, %v3589_v26, %v3591_v39 }
 0x278   : > { %v9263_v56 = vor.u32 %v9262_v58, %v9259_v52  ;;  %v9305_v52 = vshll.u32 %v17014_v59, 16 }
 0x27b   : > { %13396 = vmatmul.mubr.msk.bf16.gmra.mrb[12].mxu1 %vm701_vm2, %v3576_v2  ;;  %v9254_v2 = vor.u32 %v9253_v30, %v9250_v33  ;;  %v3593_v33 = vrot.slane %v16812_v21, 3  ;;  %v9314_v21 = vshll.u32 %v17019_v5, 16 }
 0x27c   : > { %13399 = vmatprep.mubr.msk.bf16.mxu1 %vm701_vm2, %v3578_v23  ;;  %v9266_v23 = vshrl.u32 %v16964_v20, 16 }
 0x27d   : > { %13906 = vmatmul.mubr.msk.bf16.gmra.mrb[28].mxu0 %vm701_vm2, %v8949_v12  ;;  %v9255_v16 = vsel %vm1912_vm3, %v9245_v7, %v9254_v2  ;;  %v3587_v12 = vrot.slane %v16783_v34, 3  ;;  %v9264_v48 = vsel %vm1912_vm3, %v9254_v2, %v9263_v56  ;;  %v9286_v7 = vrot.slane %v9284_v22, 1 }
 0x27e   : > { %13909 = vmatprep.mubr.msk.bf16.mxu0 %vm701_vm2, %v8951_v13  ;;  %v9268_v62 = vrot.slane %v9266_v23, 1  ;;  %v9271_v13 = vrot.slane %v9269_v46, 2  ;;  %v3594_v60 = vsel %vm3559_vm7, %v3591_v39, %v3593_v33  ;;  %v9311_v2 = vshrl.u32 %v17019_v5, 16 }
 0x27f   : > { %v3588_v44 = vsel %vm3559_vm7, %v3585_v37, %v3587_v12  ;;  %v3590_v18 = vsel %vm3559_vm7, %v3587_v12, %v3589_v26  ;;  %v9302_v37 = vshrl.u32 %v17014_v59, 16  ;;  %v3595_v23 = vrot.slane %v16984_v51, 3  ;;  %v15278_v12 = vld [vmem:[%s15554_s14] sm:$0xff]  }
 0x280   : > { %v9272_v34 = vor.u32 %v9271_v13, %v9268_v62  ;;  %v9313_v41 = vrot.slane %v9311_v2, 1  ;;  %v9316_v11 = vrot.slane %v9314_v21, 2  ;;  %v9320_v62 = vshrl.u32 %v17032_v63, 16 }
 0x281   : > { %v9304_v46 = vrot.slane %v9302_v37, 1  ;;  %v9323_v13 = vshll.u32 %v17032_v63, 16  ;;  %v9332_v26 = vshll.u32 %v17037_v45, 16  ;;  %v9356_v2 = vshrl.u32 %v17077_v38, 16 }
 0x282   : > { %v9282_v54 = vsel %vm1912_vm3, %v9272_v34, %v9281_v49  ;;  %v9317_v51 = vor.u32 %v9316_v11, %v9313_v41  ;;  %v9322_v27 = vrot.slane %v9320_v62, 1  ;;  %v9359_v21 = vshll.u32 %v17077_v38, 16 }
 0x283   : > { %13400 = vmatmul.mubr.msk.bf16.gmra.mrb[16].mxu1 %vm701_vm2, %v3580_v35  ;;  %v9293_v35 = vshrl.u32 %v17000_v0, 16  ;;  %v9334_v40 = vrot.slane %v9332_v26, 2 }
 0x284   : > { %13403 = vmatprep.mubr.msk.bf16.mxu1 %vm701_vm2, %v3582_v28  ;;  %v9273_v28 = vsel %vm1912_vm3, %v9263_v56, %v9272_v34  ;;  %v9361_v41 = vrot.slane %v9359_v21, 2  ;;  %v9677_v21 = vrot.slane %v16927_v61, 2  ;;  %v15292_v61 = vld [vmem:[%s15554_s14 + $0x60] sm:$0xff]  }
 0x285   : > { %13910 = vmatmul.mubr.msk.bf16.gmra.mrb[32].mxu0 %vm701_vm2, %v8953_v36  ;;  %v9295_v30 = vrot.slane %v9293_v35, 1  ;;  %v9298_v36 = vrot.slane %v9296_v29, 2  ;;  %v15280_v35 = vld [vmem:[%s15554_s14 + $0x10] sm:$0xff]   ;;  %v9338_v29 = vshrl.u32 %v17057_v42, 16 }
 0x286   : > { %13915 = vmatprep.mubr.msk.bf16.mxu0 %vm701_vm2, %v9246_v6  ;;  %v9290_v6 = vor.u32 %v9289_v4, %v9286_v7  ;;  %v4600_v7 = vsel %vm756_vm0, %v17050_v50, 0  ;;  %v9347_v4 = vshrl.u32 %v17062_v25, 16 }
 0x287   : > { %v9299_v58 = vor.u32 %v9298_v36, %v9295_v30  ;;  %v9340_v36 = vrot.slane %v9338_v29, 1  ;;  %v15285_v29 = vld [vmem:[%s15554_s14 + $0x38] sm:$0xff]  }
 0x289   : > { %v9300_v56 = vsel %vm1912_vm3, %v9290_v6, %v9299_v58 }
 0x28b   : > { %13404 = vmatmul.mubr.msk.bf16.gmra.mrb[20].mxu1 %vm701_vm2, %v3584_v19  ;;  %v9291_v19 = vsel %vm1912_vm3, %v9281_v49, %v9290_v6  ;;  %v9349_v6 = vrot.slane %v9347_v4, 1 }
 0x28c   : > { %13407 = vmatprep.mubr.msk.bf16.mxu1 %vm701_vm2, %v3586_v8  ;;  %v9307_v8 = vrot.slane %v9305_v52, 2  ;;  %v15281_v52 = vld [vmem:[%s15554_s14 + $0x18] sm:$0xff]  }
 0x28d   : > { %13916 = vmatmul.mubr.msk.bf16.vlgmr.msra.gmra.mrb[0].mxu0 %vm701_vm2, %v9255_v16  ;;  %v3596_v16 = vsel %vm3559_vm7, %v3593_v33, %v3595_v23  ;;  %v17208_v33 = vld [vmem:[%s18226_s4 + $0x16] sm:$0x3]  ;;  %v9365_v23 = vshrl.u32 %v17082_v10, 16 }
 0x28e   : > { %13952 = vmatpush3.bf16.msra.mxu0 %v9768_v1  ;;  %13919 = vmatprep.mubr.msk.bf16.mxu0 %vm701_vm2, %v9264_v48  ;;  %v9308_v1 = vor.u32 %v9307_v8, %v9304_v46  ;;  %v9329_v48 = vshrl.u32 %v17037_v45, 16  ;;  %v9368_v46 = vshll.u32 %v17082_v10, 16 }
 0x28f   : > { %15066 = vmatprep.subr.msk.bf16.mxu0 %vm756_vm0, %v17152_v43 }
 0x290   : > { %v9309_v55 = vsel %vm1912_vm3, %v9299_v58, %v9308_v1  ;;  %v9318_v34 = vsel %vm1912_vm3, %v9308_v1, %v9317_v51  ;;  %v9331_v22 = vrot.slane %v9329_v48, 1  ;;  %v15282_v58 = vld [vmem:[%s15554_s14 + $0x20] sm:$0xff]   ;;  %v9370_v1 = vrot.slane %v9368_v46, 2 }
 0x291   : > { %v9377_v48 = vshll.u32 %v17095_v31, 16  ;;  %v9679_v46 = vrot.slane %v16940_v57, 2  ;;  %v17283_v57 = vld [vmem:[%s18226_s4 + $0x32] sm:$0x3] }
 0x292   : > { %v9335_v39 = vor.u32 %v9334_v40, %v9331_v22  ;;  %v17240_v40 = vld [vmem:[%s15852_s16 + $0x98] ss:$0 sps:$4 sm:$0x33]  }
 0x293   : > { %13408 = vmatmul.mubr.msk.bf16.gmra.mrb[24].mxu1 %vm701_vm2, %v3588_v44  ;;  %v9325_v44 = vrot.slane %v9323_v13, 2  ;;  %v15284_v13 = vld [vmem:[%s15554_s14 + $0x30] sm:$0xff]   ;;  %v9379_v22 = vrot.slane %v9377_v48, 2  ;;  %v9395_v4 = vshll.u32 %v17240_v40, 16 }
 0x294   : > { %13411 = vmatprep.mubr.msk.bf16.mxu1 %vm701_vm2, %v3590_v18  ;;  %v15279_v18 = vld [vmem:[%s15554_s14 + $0x8] sm:$0xff]  }
 0x295   : > { %13920 = vmatmul.mubr.msk.bf16.gmra.mrb[4].mxu0 %vm701_vm2, %v9273_v28  ;;  %v9326_v49 = vor.u32 %v9325_v44, %v9322_v27  ;;  %v9341_v28 = vshll.u32 %v17057_v42, 16  ;;  %v9386_v27 = vshll.u32 %v17099_v53, 16 }
 0x296   : > { %13923 = vmatprep.mubr.msk.bf16.mxu0 %vm701_vm2, %v9282_v54  ;;  %v9350_v54 = vshll.u32 %v17062_v25, 16 }
 0x297   : > { %v9327_v30 = vsel %vm1912_vm3, %v9317_v51, %v9326_v49  ;;  %v9336_v50 = vsel %vm1912_vm3, %v9326_v49, %v9335_v39  ;;  %v9374_v51 = vshrl.u32 %v17095_v31, 16 }
 0x298   : > { %v9352_v37 = vrot.slane %v9350_v54, 2 }
 0x29b   : > { %13412 = vmatmul.mubr.msk.bf16.gmra.mrb[28].mxu1 %vm701_vm2, %v3592_v17  ;;  %v9343_v17 = vrot.slane %v9341_v28, 2 }
 0x29c   : > { %13415 = vmatprep.mubr.msk.bf16.mxu1 %vm701_vm2, %v3594_v60 }
 0x29d   : > { %13924 = vmatmul.mubr.msk.bf16.gmra.mrb[8].mxu0 %vm701_vm2, %v9291_v19  ;;  %v9344_v60 = vor.u32 %v9343_v17, %v9340_v36  ;;  %v9353_v19 = vor.u32 %v9352_v37, %v9349_v6 }
 0x29e   : > { %13927 = vmatprep.mubr.msk.bf16.mxu0 %vm701_vm2, %v9300_v56  ;;  %v9358_v56 = vrot.slane %v9356_v2, 1 }
 0x29f   : > { %v9345_v8 = vsel %vm1912_vm3, %v9335_v39, %v9344_v60  ;;  %v9354_v11 = vsel %vm1912_vm3, %v9344_v60, %v9353_v19  ;;  %v15286_v39 = vld [vmem:[%s15554_s14 + $0x40] sm:$0xff]  }
 0x2a0   : > { %v9362_v62 = vor.u32 %v9361_v41, %v9358_v56  ;;  %v9680_v56 = vsel %vm2359_vm4, %v9677_v21, %v9679_v46  ;;  %v10207_v41 = vsel %vm756_vm0, %v17152_v43, 0  ;;  %v9683_v43 = vrot.slane %v16964_v20, 2 }
 0x2a2   : > { %v9363_v44 = vsel %vm1912_vm3, %v9353_v19, %v9362_v62 }
 0x2a3   : > { %13416 = vmatmul.mubr.msk.bf16.gmra.mrb[32].mxu1 %vm701_vm2, %v3596_v16  ;;  %v9367_v16 = vrot.slane %v9365_v23, 1  ;;  %v15290_v23 = vld [vmem:[%s15554_s14 + $0x58] sm:$0xff]  }
 0x2a4   : > { %13421 = vmatprep.mubr.msk.bf16.mxu1 %vm701_vm2, %v15278_v12  ;;  %v15283_v12 = vld [vmem:[%s15554_s14 + $0x28] sm:$0xff]  }
 0x2a5   : > { %13928 = vmatmul.mubr.msk.bf16.gmra.mrb[12].mxu0 %vm701_vm2, %v9309_v55  ;;  %v9371_v26 = vor.u32 %v9370_v1, %v9367_v16  ;;  %v9383_v55 = vshrl.u32 %v17099_v53, 16  ;;  %v4265_v16 = vld [vmem:[%s15554_s14] sm:$0xf]  ;;  %v17278_v1 = vld [vmem:[%s15554_s14 + $0x4] sm:$0xf] }
 0x2a6   : > { %13931 = vmatprep.mubr.msk.bf16.mxu0 %vm701_vm2, %v9318_v34  ;;  %v9376_v34 = vrot.slane %v9374_v51, 1 }
 0x2a7   : > { %v9385_v49 = vrot.slane %v9383_v55, 1  ;;  %v9687_v55 = vrot.slane %v16994_v47, 2 }
 0x2a8   : > { %v9380_v28 = vor.u32 %v9379_v22, %v9376_v34 }
 0x2aa   : > { %v9381_v36 = vsel %vm1912_vm3, %v9371_v26, %v9380_v28 }
 0x2ab   : > { %13422 = vmatmul.mubr.msk.bf16.vlgmr.msra.gmra.mrb[0].mxu1 %vm701_vm2, %v15279_v18  ;;  %v9372_v18 = vsel %vm1912_vm3, %v9362_v62, %v9371_v26  ;;  %v9685_v62 = vrot.slane %v16970_v14, 2  ;;  %v17299_v26 = vld [vmem:[%s15554_s14 + $0x8] sm:$0xff]   ;;  %v15295_v14 = vld [vmem:[%s15554_s14 + $0x78] sm:$0xff]  }
 0x2ac   : > { %13425 = vmatprep.mubr.msk.bf16.mxu1 %vm701_vm2, %v15280_v35  ;;  %13458 = vmatpush3.bf16.msra.mxu1 %v4600_v7  ;;  %v9388_v35 = vrot.slane %v9386_v27, 2  ;;  %v9392_v7 = vshrl.u32 %v17240_v40, 16  ;;  %v15296_v27 = vld [vmem:[%s15554_s14 + $0x80] sm:$0xff]  }
 0x2ad   : > { %15052 = vmatprep.subr.msk.bf16.mxu1 %vm756_vm0, %v17208_v33  ;;  %13932 = vmatmul.mubr.msk.bf16.gmra.mrb[16].mxu0 %vm701_vm2, %v9327_v30  ;;  %v9670_v30 = vld [vmem:[%s15852_s16 + $0x8] sm:$0xc]  ;;  %v9686_v48 = vsel %vm2359_vm4, %v9683_v43, %v9685_v62 }
 0x2ae   : > { %13935 = vmatprep.mubr.msk.bf16.mxu0 %vm701_vm2, %v9336_v50  ;;  %v9389_v54 = vor.u32 %v9388_v35, %v9385_v49  ;;  %v9394_v17 = vrot.slane %v9392_v7, 1  ;;  %v9397_v50 = vrot.slane %v9395_v4, 2  ;;  %v12464_v37 = vcombine.low %v9670_v30, %v16915_v32  ;;  %v17309_v49 = vld [vmem:[%s15554_s14 + $0x10] sm:$0xff]   ;;  %v15297_v7 = vld [vmem:[%s15554_s14 + $0x88] sm:$0xff]  }
 0x2af   : > { %v9688_v35 = vsel %vm2359_vm4, %v9685_v62, %v9687_v55  ;;  %v9691_v4 = vrot.slane %v17014_v59, 2  ;;  %v4417_v30 = vshrl.u32 %v17309_v49, 16  ;;  %v17363_v62 = vld [vmem:[%s15554_s14 + $0x38] sm:$0xff]  }
 0x2b0   : > { %v9390_v6 = vsel %vm1912_vm3, %v9380_v28, %v9389_v54  ;;  %v9398_v60 = vor.u32 %v9397_v50, %v9394_v17  ;;  %v9676_v2 = vrot.slane %v12464_v37, 2  ;;  %v9693_v50 = vrot.slane %v17019_v5, 2  ;;  %v17330_v37 = vld [vmem:[%s15554_s14 + $0x20] sm:$0xff]  }
 0x2b1   : > { %v4429_v5 = vshll.u32 %v17330_v37, 16 }
 0x2b2   : > { %v9399_v19 = vsel %vm1912_vm3, %v9389_v54, %v9398_v60  ;;  %v9678_v32 = vsel %vm2359_vm4, %v9676_v2, %v9677_v21  ;;  %v4409_v54 = vshrl.u32 %v17299_v26, 16  ;;  %v9694_v2 = vsel %vm2359_vm4, %v9691_v4, %v9693_v50  ;;  %v17336_v21 = vld [vmem:[%s15554_s14 + $0x28] sm:$0xff]  }
 0x2b3   : > { %13426 = vmatmul.mubr.msk.bf16.gmra.mrb[4].mxu1 %vm701_vm2, %v15281_v52  ;;  %v15287_v52 = vld [vmem:[%s15554_s14 + $0x48] sm:$0xff]  }
 0x2b4   : > { %13429 = vmatprep.mubr.msk.bf16.mxu1 %vm701_vm2, %v15282_v58  ;;  %v15289_v58 = vld [vmem:[%s15554_s14 + $0x50] sm:$0xff]  }
 0x2b5   : > { %13936 = vmatmul.mubr.msk.bf16.gmra.mrb[20].mxu0 %vm701_vm2, %v9345_v8  ;;  %v9681_v8 = vrot.slane %v16948_v9, 2  ;;  %v15293_v9 = vld [vmem:[%s15554_s14 + $0x68] sm:$0xff]  }
 0x2b6   : > { %13939 = vmatprep.mubr.msk.bf16.mxu0 %vm701_vm2, %v9354_v11 }
 0x2b7   : > { %v9682_v11 = vsel %vm2359_vm4, %v9679_v46, %v9681_v8  ;;  %v9684_v51 = vsel %vm2359_vm4, %v9681_v8, %v9683_v43  ;;  %v4913_v8 = vsel %vm756_vm0, %v17208_v33, 0 }
 0x2bb   : > { %13430 = vmatmul.mubr.msk.bf16.gmra.mrb[8].mxu1 %vm701_vm2, %v15283_v12  ;;  %v15294_v12 = vld [vmem:[%s15554_s14 + $0x70] sm:$0xff]  }
 0x2bc   : > { %13433 = vmatprep.mubr.msk.bf16.mxu1 %vm701_vm2, %v15284_v13  ;;  %v12097_v13 = vcombine.low %v4265_v16, %v17278_v1  ;;  %v17357_v16 = vld [vmem:[%s15554_s14 + $0x30] sm:$0xff]  }
 0x2bd   : > { %13940 = vmatmul.mubr.msk.bf16.gmra.mrb[24].mxu0 %vm701_vm2, %v9363_v44  ;;  %v9689_v44 = vrot.slane %v17000_v0, 2  ;;  %v4413_v0 = vshll.u32 %v17309_v49, 16 }
 0x2be   : > { %13943 = vmatprep.mubr.msk.bf16.mxu0 %vm701_vm2, %v9372_v18  ;;  %v4400_v20 = vshll.u32 %v12097_v13, 16  ;;  %v4398_v34 = vshrl.u32 %v12097_v13, 16  ;;  %v4405_v18 = vshll.u32 %v17299_v26, 16  ;;  %v4445_v13 = vshll.u32 %v17357_v16, 16 }
 0x2bf   : > { %v9690_v47 = vsel %vm2359_vm4, %v9687_v55, %v9689_v44  ;;  %v9701_v55 = vrot.slane %v17062_v25, 2  ;;  %v17385_v25 = vld [vmem:[%s15554_s14 + $0x48] sm:$0xff]  }
 0x2c0   : > { %v4402_v22 = vrot.slane %v4400_v20, 1  ;;  %v4441_v20 = vshrl.u32 %v17336_v21, 16 }
 0x2c2   : > { %v4403_v28 = vor.u32 %v4402_v22, %v4398_v34  ;;  %v4447_v34 = vrot.slane %v4445_v13, 1  ;;  %v17379_v22 = vld [vmem:[%s15554_s14 + $0x40] sm:$0xff]  }
 0x2c3   : > { %13434 = vmatmul.mubr.msk.bf16.gmra.mrb[12].mxu1 %vm701_vm2, %v15285_v29  ;;  %v17315_v29 = vld [vmem:[%s15554_s14 + $0x18] sm:$0xff]  }
 0x2c4   : > { %13437 = vmatprep.mubr.msk.bf16.mxu1 %vm701_vm2, %v15286_v39  ;;  %v4407_v39 = vrot.slane %v4405_v18, 1  ;;  %v4425_v46 = vshrl.u32 %v17315_v29, 16 }
 0x2c5   : > { %13944 = vmatmul.mubr.msk.bf16.gmra.mrb[28].mxu0 %vm701_vm2, %v9381_v36  ;;  %v4421_v36 = vshll.u32 %v17315_v29, 16 }
 0x2c6   : > { %13947 = vmatprep.mubr.msk.bf16.mxu0 %vm701_vm2, %v9390_v6  ;;  %v4408_v17 = vsel %vm552_vm1, %v4403_v28, %v4407_v39  ;;  %v4415_v6 = vrot.slane %v4413_v0, 1  ;;  %v4411_v60 = vor.u32 %v4409_v54, %v4407_v39  ;;  %v4461_v39 = vshll.u32 %v17379_v22, 16 }
 0x2c8   : > { %v4419_v59 = vor.u32 %v4417_v30, %v4415_v6  ;;  %v9705_v30 = vrot.slane %v17082_v10, 2 }
 0x2cb   : > { %13438 = vmatmul.mubr.msk.bf16.gmra.mrb[16].mxu1 %vm701_vm2, %v15287_v52  ;;  %v9692_v52 = vsel %vm2359_vm4, %v9689_v44, %v9691_v4  ;;  %v4453_v44 = vshll.u32 %v17363_v62, 16  ;;  %v4457_v4 = vshrl.u32 %v17363_v62, 16 }
 0x2cc   : > { %13441 = vmatprep.mubr.msk.bf16.mxu1 %vm701_vm2, %v15289_v58  ;;  %v4423_v58 = vrot.slane %v4421_v36, 1  ;;  %v4465_v36 = vshrl.u32 %v17379_v22, 16 }
 0x2cd   : > { %13948 = vmatmul.mubr.msk.bf16.gmra.mrb[32].mxu0 %vm701_vm2, %v9399_v19  ;;  %v4416_v19 = vsel %vm552_vm1, %v4411_v60, %v4415_v6  ;;  %v4455_v28 = vrot.slane %v4453_v44, 1  ;;  %v4463_v6 = vrot.slane %v4461_v39, 1  ;;  %v17404_v60 = vld [vmem:[%s15554_s14 + $0x58] sm:$0xff]   ;;  %v17455_v39 = vld [vmem:[%s15852_s16 + $0x20] sm:$0xff]  }
 0x2ce   : > { %13953 = vmatprep.mubr.msk.bf16.mxu0 %vm701_vm2, %v9678_v32  ;;  %v9695_v32 = vrot.slane %v17032_v63, 2  ;;  %v4431_v63 = vrot.slane %v4429_v5, 1  ;;  %v9707_v5 = vrot.slane %v17095_v31, 2  ;;  %v17423_v31 = vld [vmem:[%s15554_s14 + $0x60] sm:$0xff]  }
 0x2d3   : > { %13442 = vmatmul.mubr.msk.bf16.gmra.mrb[20].mxu1 %vm701_vm2, %v15290_v23  ;;  %v4424_v23 = vsel %vm552_vm1, %v4419_v59, %v4423_v58  ;;  %v4467_v59 = vor.u32 %v4465_v36, %v4463_v6 }
 0x2d4   : > { %13445 = vmatprep.mubr.msk.bf16.mxu1 %vm701_vm2, %v15292_v61  ;;  %v9697_v61 = vrot.slane %v17037_v45, 2  ;;  %v4427_v45 = vor.u32 %v4425_v46, %v4423_v58  ;;  %v4485_v46 = vshll.u32 %v17404_v60, 16 }
 0x2d5   : > { %13954 = vmatmul.mubr.msk.bf16.vlgmr.msra.gmra.mrb[0].mxu0 %vm701_vm2, %v9680_v56  ;;  %v4433_v56 = vshrl.u32 %v17330_v37, 16 }
 0x2d6   : > { %13990 = vmatpush3.bf16.msra.mxu0 %v10207_v41  ;;  %13957 = vmatprep.mubr.msk.bf16.mxu0 %vm701_vm2, %v9682_v11  ;;  %v4437_v41 = vshll.u32 %v17336_v21, 16  ;;  %v17353_v11 = vld [vmem:[%s18226_s4 + $0x18] sm:$0x3]  ;;  %v9698_v33 = vsel %vm2359_vm4, %v9695_v32, %v9697_v61 }
 0x2d7   : > { %15067 = vmatprep.subr.msk.bf16.mxu0 %vm756_vm0, %v17283_v57  ;;  %v4435_v43 = vor.u32 %v4433_v56, %v4431_v63 }
 0x2db   : > { %13446 = vmatmul.mubr.msk.bf16.gmra.mrb[24].mxu1 %vm701_vm2, %v15293_v9  ;;  %v9696_v9 = vsel %vm2359_vm4, %v9693_v50, %v9695_v32  ;;  %v17398_v50 = vld [vmem:[%s15554_s14 + $0x50] sm:$0xff]   ;;  %v4473_v32 = vshrl.u32 %v17385_v25, 16 }
 0x2dc   : > { %13449 = vmatprep.mubr.msk.bf16.mxu1 %vm701_vm2, %v15294_v12  ;;  %v4439_v12 = vrot.slane %v4437_v41, 1  ;;  %v9983_v41 = vld [vmem:[%s15852_s16 + $0x10] sm:$0xc] }
 0x2dd   : > { %13958 = vmatmul.mubr.msk.bf16.gmra.mrb[4].mxu0 %vm701_vm2, %v9684_v51  ;;  %v4432_v51 = vsel %vm552_vm1, %v4427_v45, %v4431_v63  ;;  %v17419_v63 = vld [vmem:[%s15852_s16 + $0x14] sm:$0xf] }
 0x2de   : > { %13961 = vmatprep.mubr.msk.bf16.mxu0 %vm701_vm2, %v9686_v48  ;;  %v9699_v48 = vrot.slane %v17057_v42, 2  ;;  %v4443_v42 = vor.u32 %v4441_v20, %v4439_v12  ;;  %v17429_v13 = vcombine.low %v9983_v41, %v17419_v63  ;;  %v17487_v41 = vld [vmem:[%s15852_s16 + $0x38] sm:$0xff]  }
 0x2e0   : > { %v9700_v18 = vsel %vm2359_vm4, %v9697_v61, %v9699_v48  ;;  %v4448_v0 = vsel %vm552_vm1, %v4443_v42, %v4447_v34  ;;  %v10115_v44 = vrot.slane %v17429_v13, 2 }
 0x2e3   : > { %13450 = vmatmul.mubr.msk.bf16.gmra.mrb[28].mxu1 %vm701_vm2, %v15295_v14  ;;  %v4440_v14 = vsel %vm552_vm1, %v4435_v43, %v4439_v12  ;;  %v4487_v43 = vrot.slane %v4485_v46, 1  ;;  %v10653_v46 = vsel %vm756_vm0, %v17283_v57, 0 }
 0x2e4   : > { %13453 = vmatprep.mubr.msk.bf16.mxu1 %vm701_vm2, %v15296_v27  ;;  %v4449_v27 = vshrl.u32 %v17357_v16, 16 }
 0x2e5   : > { %13962 = vmatmul.mubr.msk.bf16.gmra.mrb[8].mxu0 %vm701_vm2, %v9688_v35  ;;  %v9702_v35 = vsel %vm2359_vm4, %v9699_v48, %v9701_v55  ;;  %v4493_v48 = vshll.u32 %v17423_v31, 16 }
 0x2e6   : > { %13965 = vmatprep.mubr.msk.bf16.mxu0 %vm701_vm2, %v9690_v47  ;;  %v4451_v47 = vor.u32 %v4449_v27, %v4447_v34  ;;  %v4489_v27 = vshrl.u32 %v17404_v60, 16 }
 0x2e8   : > { %v4456_v54 = vsel %vm552_vm1, %v4451_v47, %v4455_v28  ;;  %v17450_v47 = vld [vmem:[%s15554_s14 + $0x70] sm:$0xff]  }
 0x2e9   : > { %v4509_v36 = vshll.u32 %v17450_v47, 16 }
 0x2eb   : > { %13454 = vmatmul.mubr.msk.bf16.gmra.mrb[32].mxu1 %vm701_vm2, %v15297_v7  ;;  %v9703_v7 = vrot.slane %v17077_v38, 2  ;;  %v4459_v38 = vor.u32 %v4457_v4, %v4455_v28  ;;  %v4491_v28 = vor.u32 %v4489_v27, %v4487_v43 }
 0x2ec   : > { %13459 = vmatprep.mubr.msk.bf16.mxu1 %vm701_vm2, %v4408_v17  ;;  %v4469_v17 = vshll.u32 %v17385_v25, 16 }
 0x2ed   : > { %13966 = vmatmul.mubr.msk.bf16.gmra.mrb[12].mxu0 %vm701_vm2, %v9692_v52  ;;  %v9704_v52 = vsel %vm2359_vm4, %v9701_v55, %v9703_v7  ;;  %v9706_v10 = vsel %vm2359_vm4, %v9703_v7, %v9705_v30 }
 0x2ee   : > { %13969 = vmatprep.mubr.msk.bf16.mxu0 %vm701_vm2, %v9694_v2  ;;  %v4471_v58 = vrot.slane %v4469_v17, 1  ;;  %v4477_v2 = vshll.u32 %v17398_v50, 16 }
 0x2f0   : > { %v4472_v61 = vsel %vm552_vm1, %v4467_v59, %v4471_v58  ;;  %v4479_v56 = vrot.slane %v4477_v2, 1  ;;  %v4475_v45 = vor.u32 %v4473_v32, %v4471_v58  ;;  %v4513_v59 = vshrl.u32 %v17450_v47, 16 }
 0x2f1   : > { %v4511_v2 = vrot.slane %v4509_v36, 1 }
 0x2f2   : > { %v4480_v20 = vsel %vm552_vm1, %v4475_v45, %v4479_v56  ;;  %v17495_v45 = vld [vmem:[%s18226_s4 + $0x34] sm:$0x3] }
 0x2f3   : > { %13460 = vmatmul.mubr.msk.bf16.vlgmr.msra.gmra.mrb[0].mxu1 %vm701_vm2, %v4416_v19  ;;  %v4464_v19 = vsel %vm552_vm1, %v4459_v38, %v4463_v6  ;;  %v10118_v6 = vrot.slane %v17455_v39, 2 }
 0x2f4   : > { %13463 = vmatprep.mubr.msk.bf16.mxu1 %vm701_vm2, %v4424_v23  ;;  %13496 = vmatpush3.bf16.msra.mxu1 %v4913_v8  ;;  %v4481_v23 = vshrl.u32 %v17398_v50, 16  ;;  %v9709_v8 = vrot.slane %v17099_v53, 2  ;;  %v17432_v53 = vld [vmem:[%s15852_s16 + $0x18] sm:$0xff]  }
 0x2f5   : > { %15053 = vmatprep.subr.msk.bf16.mxu1 %vm756_vm0, %v17353_v11  ;;  %13970 = vmatmul.mubr.msk.bf16.gmra.mrb[16].mxu0 %vm701_vm2, %v9696_v9  ;;  %v9708_v9 = vsel %vm2359_vm4, %v9705_v30, %v9707_v5  ;;  %v10116_v34 = vrot.slane %v17432_v53, 2  ;;  %v17462_v30 = vld [vmem:[%s15554_s14 + $0x78] sm:$0xff]  }
 0x2f6   : > { %13973 = vmatprep.mubr.msk.bf16.mxu0 %vm701_vm2, %v9698_v33  ;;  %v4483_v33 = vor.u32 %v4481_v23, %v4479_v56  ;;  %v9710_v12 = vsel %vm2359_vm4, %v9707_v5, %v9709_v8  ;;  %v4517_v58 = vshll.u32 %v17462_v30, 16  ;;  %v17476_v5 = vld [vmem:[%s15554_s14 + $0x80] sm:$0xff]   ;;  %v17481_v23 = vld [vmem:[%s15852_s16 + $0x30] sm:$0xff]  }
 0x2f8   : > { %v4488_v55 = vsel %vm552_vm1, %v4483_v33, %v4487_v43  ;;  %v4519_v56 = vrot.slane %v4517_v58, 1  ;;  %v4525_v33 = vshll.u32 %v17476_v5, 16  ;;  %v10122_v43 = vrot.slane %v17481_v23, 2 }
 0x2fa   : > { %v4527_v27 = vrot.slane %v4525_v33, 1 }
 0x2fb   : > { %13464 = vmatmul.mubr.msk.bf16.gmra.mrb[4].mxu1 %vm701_vm2, %v4432_v51  ;;  %v17435_v51 = vld [vmem:[%s15554_s14 + $0x68] sm:$0xff]  }
 0x2fc   : > { %13467 = vmatprep.mubr.msk.bf16.mxu1 %vm701_vm2, %v4440_v14  ;;  %v9711_v14 = vrot.slane %v17240_v40, 2  ;;  %v4501_v42 = vshll.u32 %v17435_v51, 16 }
 0x2fd   : > { %13974 = vmatmul.mubr.msk.bf16.gmra.mrb[20].mxu0 %vm701_vm2, %v9700_v18  ;;  %v4497_v18 = vshrl.u32 %v17423_v31, 16 }
 0x2fe   : > { %13977 = vmatprep.mubr.msk.bf16.mxu0 %vm701_vm2, %v9702_v35  ;;  %v4495_v35 = vrot.slane %v4493_v48, 1  ;;  %v9712_v40 = vsel %vm2359_vm4, %v9709_v8, %v9711_v14  ;;  %v4503_v4 = vrot.slane %v4501_v42, 1  ;;  %v4515_v8 = vor.u32 %v4513_v59, %v4511_v2  ;;  %v17516_v42 = vld [vmem:[%s15554_s14 + $0x90] ss:$0 sps:$4 sm:$0x11]  }
 0x2ff   : > { %v4529_v14 = vshrl.u32 %v17476_v5, 16 }
 0x300   : > { %v4499_v7 = vor.u32 %v4497_v18, %v4495_v35  ;;  %v4496_v17 = vsel %vm552_vm1, %v4491_v28, %v4495_v35  ;;  %v4520_v48 = vsel %vm552_vm1, %v4515_v8, %v4519_v56  ;;  %v17513_v18 = vld [vmem:[%s15852_s16 + $0x40] sm:$0xff]   ;;  %v17541_v8 = vld [vmem:[%s15852_s16 + $0x58] sm:$0xff]  }
 0x301   : > { %v10126_v36 = vrot.slane %v17513_v18, 2 }
 0x302   : > { %v4504_v38 = vsel %vm552_vm1, %v4499_v7, %v4503_v4  ;;  %v4815_v7 = vld [vmem:[%s15554_s14] sm:$0xe] }
 0x303   : > { %13468 = vmatmul.mubr.msk.bf16.gmra.mrb[8].mxu1 %vm701_vm2, %v4448_v0  ;;  %v10117_v0 = vsel %vm2359_vm4, %v10115_v44, %v10116_v34 }
 0x304   : > { %13471 = vmatprep.mubr.msk.bf16.mxu1 %vm701_vm2, %v4456_v54  ;;  %v17459_v54 = vld [vmem:[%s15852_s16 + $0x28] sm:$0xff]  }
 0x305   : > { %13978 = vmatmul.mubr.msk.bf16.gmra.mrb[24].mxu0 %vm701_vm2, %v9704_v52  ;;  %v4505_v52 = vshrl.u32 %v17435_v51, 16 }
 0x306   : > { %13981 = vmatprep.mubr.msk.bf16.mxu0 %vm701_vm2, %v9706_v10  ;;  %v10120_v10 = vrot.slane %v17459_v54, 2 }
 0x307   : > { %v4507_v32 = vor.u32 %v4505_v52, %v4503_v4 }
 0x308   : > { %v10123_v44 = vsel %vm2359_vm4, %v10120_v10, %v10122_v43 }
 0x309   : > { %v4512_v57 = vsel %vm552_vm1, %v4507_v32, %v4511_v2 }
 0x30b   : > { %13472 = vmatmul.mubr.msk.bf16.gmra.mrb[12].mxu1 %vm701_vm2, %v4464_v19  ;;  %v10119_v19 = vsel %vm2359_vm4, %v10116_v34, %v10118_v6 }
 0x30c   : > { %13475 = vmatprep.mubr.msk.bf16.mxu1 %vm701_vm2, %v4472_v61  ;;  %v10121_v61 = vsel %vm2359_vm4, %v10118_v6, %v10120_v10  ;;  %v4541_v6 = vshll.u32 %v17516_v42, 16  ;;  %v12135_v10 = vcombine.low %v4815_v7, %v17278_v1  ;;  %v4830_v7 = vrot.slane %v17336_v21, 1 }
 0x30d   : > { %13982 = vmatmul.mubr.msk.bf16.gmra.mrb[28].mxu0 %vm701_vm2, %v9708_v9  ;;  %v17490_v9 = vld [vmem:[%s15554_s14 + $0x88] sm:$0xff]  }
 0x30e   : > { %13985 = vmatprep.mubr.msk.bf16.mxu0 %vm701_vm2, %v9710_v12  ;;  %v4521_v12 = vshrl.u32 %v17462_v30, 16  ;;  %v4543_v2 = vrot.slane %v4541_v6, 1  ;;  %v15432_v6 = vmov 0  }
 0x30f   : > { %15116 = vset.pattern.permute.xlu0 %v15432_v6  ;;  %15117 = vset.pattern.permute.xlu1 %v15432_v6 }
 0x310   : > { %v4523_v34 = vor.u32 %v4521_v12, %v4519_v56  ;;  %v17554_v12 = vld [vmem:[%s15852_s16 + $0x60] sm:$0xff]  }
 0x312   : > { %v4528_v4 = vsel %vm552_vm1, %v4523_v34, %v4527_v27  ;;  %v5352_v34 = vsel %vm756_vm0, %v17353_v11, 0  ;;  %v15373_v11 = vld [vmem:[%s18226_s4 + $0x1a] sm:$0x3] }
 0x313   : > { %13476 = vmatmul.mubr.msk.bf16.gmra.mrb[16].mxu1 %vm701_vm2, %v4480_v20  ;;  %v10124_v20 = vrot.slane %v17487_v41, 2 }
 0x314   : > { %13479 = vmatprep.mubr.msk.bf16.mxu1 %vm701_vm2, %v4488_v55  ;;  %v4533_v55 = vshll.u32 %v17490_v9, 16 }
 0x315   : > { %13986 = vmatmul.mubr.msk.bf16.gmra.mrb[32].mxu0 %vm701_vm2, %v9712_v40  ;;  %v10125_v35 = vsel %vm2359_vm4, %v10122_v43, %v10124_v20  ;;  %v4531_v40 = vor.u32 %v4529_v14, %v4527_v27  ;;  %v10127_v59 = vsel %vm2359_vm4, %v10124_v20, %v10126_v36  ;;  %v4826_v20 = vrot.slane %v17315_v29, 1  ;;  %v17559_v14 = vld [vmem:[%s15852_s16 + $0x68] sm:$0xff]  }
 0x316   : > { %13991 = vmatprep.mubr.msk.bf16.mxu0 %vm701_vm2, %v10117_v0  ;;  %v4535_v28 = vrot.slane %v4533_v55, 1  ;;  %v17520_v0 = vld [vmem:[%s15852_s16 + $0x48] sm:$0xff]   ;;  %v10134_v27 = vrot.slane %v17554_v12, 2 }
 0x318   : > { %v4536_v52 = vsel %vm552_vm1, %v4531_v40, %v4535_v28  ;;  %v17574_v40 = vld [vmem:[%s15852_s16 + $0x70] sm:$0xff]  }
 0x31b   : > { %13480 = vmatmul.mubr.msk.bf16.gmra.mrb[20].mxu1 %vm701_vm2, %v4496_v17  ;;  %v4537_v17 = vshrl.u32 %v17490_v9, 16 }
 0x31c   : > { %13483 = vmatprep.mubr.msk.bf16.mxu1 %vm701_vm2, %v4504_v38  ;;  %v10128_v38 = vrot.slane %v17520_v0, 2 }
 0x31d   : > { %13992 = vmatmul.mubr.msk.bf16.vlgmr.msra.gmra.mrb[0].mxu0 %vm701_vm2, %v10119_v19  ;;  %v4539_v58 = vor.u32 %v4537_v17, %v4535_v28  ;;  %v17536_v19 = vld [vmem:[%s15852_s16 + $0x50] sm:$0xff]   ;;  %v10138_v17 = vrot.slane %v17574_v40, 2 }
 0x31e   : > { %14028 = vmatpush3.bf16.msra.mxu0 %v10653_v46  ;;  %13995 = vmatprep.mubr.msk.bf16.mxu0 %vm701_vm2, %v10121_v61  ;;  %v10129_v32 = vsel %vm2359_vm4, %v10126_v36, %v10128_v38  ;;  %v4821_v46 = vrot.slane %v12135_v10, 1  ;;  %v4822_v61 = vrot.slane %v17299_v26, 1  ;;  %v10130_v56 = vrot.slane %v17536_v19, 2  ;;  %v11262_v36 = vld [vmem:[%s18222_s0 + $0x10] sm:$0xff]  ;;  %v11261_v10 = vld [vmem:[%s18222_s0 + $0x8] sm:$0xff] }
 0x31f   : > { %15068 = vmatprep.subr.msk.bf16.mxu0 %vm756_vm0, %v17495_v45  ;;  %v4544_v1 = vsel %vm552_vm1, %v4539_v58, %v4543_v2  ;;  %v4824_v26 = vrot.slane %v17309_v49, 1  ;;  %11308 = vperm.xlu1 %15117, %v11262_v36   ;;  %v4832_v58 = vrot.slane %v17357_v16, 1  ;;  %v17605_v2 = vld [vmem:[%s15852_s16 + $0x80] sm:$0xff]   ;;  %v10440_v36 = vshll.u32 %v17432_v53, 16 }
 0x320   : > { %v4823_v33 = vsel %vm1159_vm5, %v4821_v46, %v4822_v61  ;;  %v10131_v43 = vsel %vm2359_vm4, %v10128_v38, %v10130_v56  ;;  %v4834_v46 = vrot.slane %v17363_v62, 1  ;;  %v11264_v16 = vld [vmem:[%s18222_s0 + $0x20] sm:$0xff]  ;;  %v10142_v62 = vrot.slane %v17605_v2, 2 }
 0x321   : > { %v4825_v55 = vsel %vm1159_vm5, %v4822_v61, %v4824_v26  ;;  %v4827_v49 = vsel %vm1159_vm5, %v4824_v26, %v4826_v20  ;;  %v17610_v61 = vld [vmem:[%s15852_s16 + $0x88] sm:$0xff]   ;;  %v11266_v26 = vld [vmem:[%s18222_s0 + $0x30] sm:$0xff] }
 0x323   : > { %13484 = vmatmul.mubr.msk.bf16.gmra.mrb[24].mxu1 %vm701_vm2, %v4512_v57  ;;  %v10132_v57 = vrot.slane %v17541_v8, 2 }
 0x324   : > { %13487 = vmatprep.mubr.msk.bf16.mxu1 %vm701_vm2, %v4520_v48 }
 0x325   : > { %13996 = vmatmul.mubr.msk.bf16.gmra.mrb[4].mxu0 %vm701_vm2, %v10123_v44  ;;  %v10133_v48 = vsel %vm2359_vm4, %v10130_v56, %v10132_v57  ;;  %v10136_v44 = vrot.slane %v17559_v14, 2  ;;  %v10135_v29 = vsel %vm2359_vm4, %v10132_v57, %v10134_v27  ;;  %v4833_v56 = vsel %vm1159_vm5, %v4830_v7, %v4832_v58 }
 0x326   : > { %13999 = vmatprep.mubr.msk.bf16.mxu0 %vm701_vm2, %v10125_v35  ;;  %v4828_v35 = vrot.slane %v17330_v37, 1  ;;  %v11260_v37 = vld [vmem:[%s18222_s0] sm:$0xff]  ;;  %v10144_v57 = vrot.slane %v17610_v61, 2 }
 0x327   : > { %v10137_v28 = vsel %vm2359_vm4, %v10134_v27, %v10136_v44  ;;  %11298 = vperm.xlu0 %15116, %v11260_v37   ;;  %v4838_v27 = vrot.slane %v17385_v25, 1  ;;  %v10437_v37 = vshrl.u32 %v17432_v53, 16 }
 0x328   : > { %v4829_v21 = vsel %vm1159_vm5, %v4826_v20, %v4828_v35  ;;  %v4836_v20 = vrot.slane %v17379_v22, 1  ;;  %v11268_v22 = vld [vmem:[%s18222_s0 + $0x40] sm:$0xff] }
 0x32b   : > { %13488 = vmatmul.mubr.msk.bf16.gmra.mrb[28].mxu1 %vm701_vm2, %v4528_v4  ;;  %v17579_v4 = vld [vmem:[%s15852_s16 + $0x78] sm:$0xff]   ;;  %11303 = vperm.xlu0 %15116, %v11261_v10   ;;  %v4842_v10 = vrot.slane %v17404_v60, 1  ;;  %v11272_v60 = vld [vmem:[%s18222_s0 + $0x60] sm:$0xff] }
 0x32c   : > { %13491 = vmatprep.mubr.msk.bf16.mxu1 %vm701_vm2, %v4536_v52  ;;  %v4831_v52 = vsel %vm1159_vm5, %v4828_v35, %v4830_v7  ;;  %v10140_v38 = vrot.slane %v17579_v4, 2  ;;  %v4839_v35 = vsel %vm1159_vm5, %v4836_v20, %v4838_v27  ;;  %v10429_v7 = vshrl.u32 %v17429_v13, 16 }
 0x32d   : > { %14000 = vmatmul.mubr.msk.bf16.gmra.mrb[8].mxu0 %vm701_vm2, %v10127_v59  ;;  %v10139_v59 = vsel %vm2359_vm4, %v10136_v44, %v10138_v17  ;;  %v10145_v44 = vsel %vm2359_vm4, %v10142_v62, %v10144_v57 }
 0x32e   : > { %14003 = vmatprep.mubr.msk.bf16.mxu0 %vm701_vm2, %v10129_v32  ;;  %v10141_v32 = vsel %vm2359_vm4, %v10138_v17, %v10140_v38  ;;  %v11270_v17 = vld [vmem:[%s18222_s0 + $0x50] sm:$0xff] }
 0x32f   : > { %11318 = vperm.xlu0 %15116, %v11264_v16   ;;  %v10449_v16 = vshll.u32 %v17455_v39, 16 }
 0x333   : > { %13492 = vmatmul.mubr.msk.bf16.gmra.mrb[32].mxu1 %vm701_vm2, %v4544_v1  ;;  %v11263_v1 = vld [vmem:[%s18222_s0 + $0x18] sm:$0xff]  ;;  %11328 = vperm.xlu0 %15116, %v11266_v26   ;;  %v10455_v26 = vshrl.u32 %v17459_v54, 16 }
 0x334   : > { %13497 = vmatprep.mubr.msk.bf16.mxu1 %vm701_vm2, %v4823_v33  ;;  %11313 = vperm.xlu1 %15117, %v11263_v1   ;;  %v4835_v33 = vsel %vm1159_vm5, %v4832_v58, %v4834_v46  ;;  %v10446_v1 = vshrl.u32 %v17455_v39, 16 }
 0x335   : > { %14004 = vmatmul.mubr.msk.bf16.gmra.mrb[12].mxu0 %vm701_vm2, %v10131_v43  ;;  %v11265_v43 = vld [vmem:[%s18222_s0 + $0x28] sm:$0xff] }
 0x336   : > { %14007 = vmatprep.mubr.msk.bf16.mxu0 %vm701_vm2, %v10133_v48  ;;  %v10143_v48 = vsel %vm2359_vm4, %v10140_v38, %v10142_v62  ;;  %v15336_v38 = vld [vmem:[%s15852_s16 + $0xa0] ss:$0 sps:$4 sm:$0x33]  }
 0x337   : > { %11338 = vperm.xlu0 %15116, %v11268_v22   ;;  %v10150_v62 = vrot.slane %v15336_v38, 2  ;;  %v11277_v38 = vld [vmem:[%s18222_s0 + $0x88] sm:$0xff] }
 0x338   : > { %11323 = vperm.xlu1 %15117, %v11265_v43  }
 0x33b   : > { %13498 = vmatmul.mubr.msk.bf16.vlgmr.msra.gmra.mrb[0].mxu1 %vm701_vm2, %v4825_v55  ;;  %v17635_v55 = vld [vmem:[%s15852_s16 + $0x90] sm:$0xff]   ;;  %11348 = vperm.xlu0 %15116, %v11270_v17  }
 0x33c   : > { %13501 = vmatprep.mubr.msk.bf16.mxu1 %vm701_vm2, %v4827_v49  ;;  %13534 = vmatpush3.bf16.msra.mxu1 %v5352_v34  ;;  %v17639_v49 = vld [vmem:[%s15852_s16 + $0x98] sm:$0xff]   ;;  %v10146_v25 = vrot.slane %v17635_v55, 2 }
 0x33d   : > { %15055 = vmatprep.subr.msk.bf16.mxu1 %vm756_vm0, %v15373_v11  ;;  %14008 = vmatmul.mubr.msk.bf16.gmra.mrb[16].mxu0 %vm701_vm2, %v10135_v29  ;;  %v11267_v34 = vld [vmem:[%s18222_s0 + $0x38] sm:$0xff]  ;;  %v4837_v29 = vsel %vm1159_vm5, %v4834_v46, %v4836_v20  ;;  %v10432_v11 = vshll.u32 %v17429_v13, 16  ;;  %v4840_v13 = vrot.slane %v17398_v50, 1  ;;  %v10442_v46 = vrot.slane %v10440_v36, 3  ;;  %v11273_v20 = vld [vmem:[%s18222_s0 + $0x68] sm:$0xff] }
 0x33e   : > { %14011 = vmatprep.mubr.msk.bf16.mxu0 %vm701_vm2, %v10137_v28  ;;  %v10148_v28 = vrot.slane %v17639_v49, 2  ;;  %11333 = vperm.xlu1 %15117, %v11267_v34   ;;  %v10147_v6 = vsel %vm2359_vm4, %v10144_v57, %v10146_v25  ;;  %v11271_v50 = vld [vmem:[%s18222_s0 + $0x58] sm:$0xff]  ;;  %v10451_v34 = vrot.slane %v10449_v16, 3 }
 0x33f   : > { %v10434_v58 = vrot.slane %v10432_v11, 3  ;;  %11358 = vperm.xlu0 %15116, %v11272_v60   ;;  %v11275_v36 = vld [vmem:[%s18222_s0 + $0x78] sm:$0xff] }
 0x340   : > { %v10151_v22 = vsel %vm2359_vm4, %v10148_v28, %v10150_v62  ;;  %v10482_v62 = vshrl.u32 %v17513_v18, 16 }
 0x343   : > { %13502 = vmatmul.mubr.msk.bf16.gmra.mrb[4].mxu1 %vm701_vm2, %v4829_v21  ;;  %v11269_v21 = vld [vmem:[%s18222_s0 + $0x48] sm:$0xff] }
 0x344   : > { %13505 = vmatprep.mubr.msk.bf16.mxu1 %vm701_vm2, %v4831_v52  ;;  %v10149_v52 = vsel %vm2359_vm4, %v10146_v25, %v10148_v28  ;;  %11343 = vperm.xlu1 %15117, %v11269_v21   ;;  %v11276_v28 = vld [vmem:[%s18222_s0 + $0x80] sm:$0xff]  ;;  %v10467_v21 = vshll.u32 %v17481_v23, 16 }
 0x345   : > { %14012 = vmatmul.mubr.msk.bf16.gmra.mrb[20].mxu0 %vm701_vm2, %v10139_v59  ;;  %v10431_v59 = vrot.slane %v10429_v7, 2  ;;  %v10457_v7 = vrot.slane %v10455_v26, 2  ;;  %v10494_v26 = vshll.u32 %v17520_v0, 16 }
 0x346   : > { %14015 = vmatprep.mubr.msk.bf16.mxu0 %vm701_vm2, %v10141_v32  ;;  %v10439_v32 = vrot.slane %v10437_v37, 2 }
 0x347   : > { %v10435_v57 = vor.u32 %v10434_v58, %v10431_v59  ;;  %v10966_v58 = vsel %vm756_vm0, %v17495_v45, 0  ;;  %v10485_v45 = vshll.u32 %v17513_v18, 16 }
 0x348   : > { %11353 = vperm.xlu1 %15117, %v11271_v50   ;;  %v10443_v43 = vor.u32 %v10442_v46, %v10439_v32  ;;  %v4848_v32 = vrot.slane %v17450_v47, 1  ;;  %v4850_v50 = vrot.slane %v17462_v30, 1  ;;  %v11279_v47 = vld [vmem:[%s18222_s0 + $0x98] sm:$0xff] }
 0x34a   : > { %v10444_v25 = vsel %vm3112_vm6, %v10435_v57, %v10443_v43 }
 0x34b   : > { %13506 = vmatmul.mubr.msk.bf16.gmra.mrb[8].mxu1 %vm701_vm2, %v4833_v56  ;;  %v4841_v56 = vsel %vm1159_vm5, %v4838_v27, %v4840_v13  ;;  %v11274_v27 = vld [vmem:[%s18222_s0 + $0x70] sm:$0xff] }
 0x34c   : > { %13509 = vmatprep.mubr.msk.bf16.mxu1 %vm701_vm2, %v4835_v33  ;;  %v4843_v33 = vsel %vm1159_vm5, %v4840_v13, %v4842_v10  ;;  %11363 = vperm.xlu1 %15117, %v11273_v20   ;;  %v10473_v13 = vshrl.u32 %v17487_v41, 16 }
 0x34d   : > { %14016 = vmatmul.mubr.msk.bf16.gmra.mrb[24].mxu0 %vm701_vm2, %v10143_v48  ;;  %v10458_v48 = vshll.u32 %v17459_v54, 16  ;;  %11368 = vperm.xlu0 %15116, %v11274_v27   ;;  %v11281_v27 = vld [vmem:[%s18222_s0 + $0xa8] sm:$0xff] }
 0x34e   : > { %14019 = vmatprep.mubr.msk.bf16.mxu0 %vm701_vm2, %v10145_v44  ;;  %v10448_v44 = vrot.slane %v10446_v1, 2  ;;  %v10469_v1 = vrot.slane %v10467_v21, 3  ;;  %v10475_v60 = vrot.slane %v10473_v13, 2  ;;  %v10503_v21 = vshll.u32 %v17536_v19, 16 }
 0x34f   : > { %v10460_v11 = vrot.slane %v10458_v48, 3  ;;  %v4851_v48 = vsel %vm1159_vm5, %v4848_v32, %v4850_v50  ;;  %v10512_v13 = vshll.u32 %v17541_v8, 16 }
 0x350   : > { %v10452_v37 = vor.u32 %v10451_v34, %v10448_v44  ;;  %11373 = vperm.xlu1 %15117, %v11275_v36   ;;  %v11282_v44 = vld [vmem:[%s18222_s0 + $0xb0] sm:$0xff]  ;;  %v10484_v34 = vrot.slane %v10482_v62, 2  ;;  %v11287_v62 = vld [vmem:[%s18222_s0 + $0xd8] sm:$0xff] }
 0x351   : > { %11378 = vperm.xlu0 %15116, %v11276_v28   ;;  %v11283_v28 = vld [vmem:[%s18222_s0 + $0xb8] sm:$0xff] }
 0x352   : > { %v10453_v59 = vsel %vm3112_vm6, %v10443_v43, %v10452_v37  ;;  %v10491_v43 = vshrl.u32 %v17520_v0, 16 }
 0x353   : > { %13510 = vmatmul.mubr.msk.bf16.gmra.mrb[12].mxu1 %vm701_vm2, %v4837_v29  ;;  %v4844_v29 = vrot.slane %v17423_v31, 1 }
 0x354   : > { %13513 = vmatprep.mubr.msk.bf16.mxu1 %vm701_vm2, %v4839_v35  ;;  %v4846_v35 = vrot.slane %v17435_v51, 1  ;;  %v10464_v51 = vshrl.u32 %v17481_v23, 16  ;;  %11383 = vperm.xlu1 %15117, %v11277_v38   ;;  %v11286_v38 = vld [vmem:[%s18222_s0 + $0xd0] sm:$0xff] }
 0x355   : > { %14020 = vmatmul.mubr.msk.bf16.gmra.mrb[28].mxu0 %vm701_vm2, %v10147_v6  ;;  %v4845_v31 = vsel %vm1159_vm5, %v4842_v10, %v4844_v29  ;;  %v10461_v6 = vor.u32 %v10460_v11, %v10457_v7  ;;  %v11278_v10 = vld [vmem:[%s18222_s0 + $0x90] sm:$0xff]  ;;  %v10496_v7 = vrot.slane %v10494_v26, 3  ;;  %v10530_v26 = vshll.u32 %v17559_v14, 16 }
 0x356   : > { %14023 = vmatprep.mubr.msk.bf16.mxu0 %vm701_vm2, %v10149_v52  ;;  %v4847_v17 = vsel %vm1159_vm5, %v4844_v29, %v4846_v35  ;;  %v10476_v52 = vshll.u32 %v17487_v41, 16  ;;  %v10466_v46 = vrot.slane %v10464_v51, 2  ;;  %11388 = vperm.xlu0 %15116, %v11278_v10   ;;  %v4849_v30 = vsel %vm1159_vm5, %v4846_v35, %v4848_v32 }
 0x357   : > { %v10462_v16 = vsel %vm3112_vm6, %v10452_v37, %v10461_v6  ;;  %v10493_v35 = vrot.slane %v10491_v43, 2  ;;  %v4854_v37 = vrot.slane %v17490_v9, 1  ;;  %v10500_v9 = vshrl.u32 %v17536_v19, 16 }
 0x358   : > { %v10470_v57 = vor.u32 %v10469_v1, %v10466_v46  ;;  %11393 = vperm.xlu1 %15117, %v11279_v47   ;;  %v10505_v46 = vrot.slane %v10503_v21, 3  ;;  %v5260_v1 = vrot.slane %v15576_v24, 1  ;;  %v10518_v47 = vshrl.u32 %v17554_v12, 16 }
 0x359   : > { %v10497_v51 = vor.u32 %v10496_v7, %v10493_v35  ;;  %v10502_v32 = vrot.slane %v10500_v9, 2  ;;  %v10527_v43 = vshrl.u32 %v17559_v14, 16  ;;  %v15376_v35 = vld [vmem:[%s15554_s14 + $0x20] sm:$0xff]   ;;  %v10539_v9 = vshll.u32 %v17574_v40, 16 }
 0x35a   : > { %v10471_v29 = vsel %vm3112_vm6, %v10461_v6, %v10470_v57  ;;  %v10509_v6 = vshrl.u32 %v17541_v8, 16  ;;  %v5265_v7 = vrot.slane %v15376_v35, 1 }
 0x35b   : > { %13514 = vmatmul.mubr.msk.bf16.gmra.mrb[16].mxu1 %vm701_vm2, %v4841_v56  ;;  %v10478_v56 = vrot.slane %v10476_v52, 3  ;;  %v11285_v52 = vld [vmem:[%s18222_s0 + $0xc8] sm:$0xff]  ;;  %v10506_v24 = vor.u32 %v10505_v46, %v10502_v32  ;;  %v10541_v46 = vrot.slane %v10539_v9, 3 }
 0x35c   : > { %13517 = vmatprep.mubr.msk.bf16.mxu1 %vm701_vm2, %v4843_v33  ;;  %v11280_v33 = vld [vmem:[%s18222_s0 + $0xa0] sm:$0xff]  ;;  %11403 = vperm.xlu1 %15117, %v11281_v27   ;;  %v15381_v9 = vld [vmem:[%s15554_s14 + $0x48] sm:$0xff]  }
 0x35d   : > { %14024 = vmatmul.mubr.msk.bf16.gmra.mrb[32].mxu0 %vm701_vm2, %v10151_v22  ;;  %v10479_v20 = vor.u32 %v10478_v56, %v10475_v60  ;;  %11398 = vperm.xlu0 %15116, %v11280_v33   ;;  %v10487_v22 = vrot.slane %v10485_v45, 3  ;;  %v10511_v60 = vrot.slane %v10509_v6, 2  ;;  %v10514_v56 = vrot.slane %v10512_v13, 3 }
 0x35e   : > { %14029 = vmatprep.mubr.msk.bf16.mxu0 %vm701_vm2, %v10444_v25  ;;  %v4852_v25 = vrot.slane %v17476_v5, 1  ;;  %v10521_v33 = vshll.u32 %v17554_v12, 16  ;;  %v10507_v27 = vsel %vm3112_vm6, %v10497_v51, %v10506_v24  ;;  %v10545_v6 = vshrl.u32 %v17579_v4, 16 }
 0x35f   : > { %v10480_v11 = vsel %vm3112_vm6, %v10470_v57, %v10479_v20  ;;  %v10488_v36 = vor.u32 %v10487_v22, %v10484_v34  ;;  %v10515_v57 = vor.u32 %v10514_v56, %v10511_v60  ;;  %v10520_v22 = vrot.slane %v10518_v47, 2 }
 0x360   : > { %v4853_v5 = vsel %vm1159_vm5, %v4850_v50, %v4852_v25  ;;  %11413 = vperm.xlu1 %15117, %v11283_v28   ;;  %v11292_v28 = vld [vmem:[%s18222_s0 + $0x100] sm:$0xff]  ;;  %v10548_v13 = vshll.u32 %v17579_v4, 16  ;;  %v10547_v60 = vrot.slane %v10545_v6, 2 }
 0x361   : > { %11408 = vperm.xlu0 %15116, %v11282_v44   ;;  %v10489_v10 = vsel %vm3112_vm6, %v10479_v20, %v10488_v36  ;;  %v11290_v20 = vld [vmem:[%s18222_s0 + $0xf0] sm:$0xff]  ;;  %v15375_v44 = vld [vmem:[%s15554_s14 + $0x18] sm:$0xff]  }
 0x362   : > { %v5263_v34 = vrot.slane %v15375_v44, 1  ;;  %v10550_v56 = vrot.slane %v10548_v13, 3  ;;  %v17861_v13 = vld [vmem:[%s15852_s16 + $0xa0] ss:$0 sps:$4 sm:$0x77]  }
 0x363   : > { %13518 = vmatmul.mubr.msk.bf16.gmra.mrb[20].mxu1 %vm701_vm2, %v4845_v31  ;;  %v11284_v31 = vld [vmem:[%s18222_s0 + $0xc0] sm:$0xff] }
 0x364   : > { %13521 = vmatprep.mubr.msk.bf16.mxu1 %vm701_vm2, %v4847_v17  ;;  %v4855_v17 = vsel %vm1159_vm5, %v4852_v25, %v4854_v37  ;;  %11423 = vperm.xlu1 %15117, %v11285_v52   ;;  %v10516_v25 = vsel %vm3112_vm6, %v10506_v24, %v10515_v57  ;;  %v5266_v21 = vsel %vm1159_vm5, %v5263_v34, %v5265_v7  ;;  %v11293_v52 = vld [vmem:[%s18222_s0 + $0x108] sm:$0xff]  ;;  %v10557_v24 = vshll.u32 %v17605_v2, 16 }
 0x365   : > { %14030 = vmatmul.mubr.msk.bf16.vlgmr.msra.gmra.mrb[0].mxu0 %vm701_vm2, %v10453_v59  ;;  %11418 = vperm.xlu0 %15116, %v11284_v31   ;;  %v4856_v59 = vrot.slane %v17516_v42, 1  ;;  %v11288_v42 = vld [vmem:[%s18222_s0 + $0xe0] sm:$0xff] }
 0x366   : > { %14066 = vmatpush3.bf16.msra.mxu0 %v10966_v58  ;;  %14033 = vmatprep.mubr.msk.bf16.mxu0 %vm701_vm2, %v10462_v16  ;;  %v10498_v58 = vsel %vm3112_vm6, %v10488_v36, %v10497_v51  ;;  %v15374_v16 = vld [vmem:[%s15554_s14 + $0x10] sm:$0xff]   ;;  %v11291_v36 = vld [vmem:[%s18222_s0 + $0xf8] sm:$0xff]  ;;  %v10536_v51 = vshrl.u32 %v17574_v40, 16 }
 0x367   : > { %v5261_v50 = vrot.slane %v15374_v16, 1  ;;  %v4857_v45 = vsel %vm1159_vm5, %v4854_v37, %v4856_v59  ;;  %v10532_v37 = vrot.slane %v10530_v26, 3  ;;  %v15377_v59 = vld [vmem:[%s15554_s14 + $0x28] sm:$0xff]   ;;  %v15378_v16 = vld [vmem:[%s15554_s14 + $0x30] sm:$0xff]   ;;  %v15379_v26 = vld [vmem:[%s15554_s14 + $0x38] sm:$0xff]  }
 0x368   : > { %11433 = vperm.xlu1 %15117, %v11287_v62   ;;  %v10538_v32 = vrot.slane %v10536_v51, 2  ;;  %v11295_v62 = vld [vmem:[%s18222_s0 + $0x118] sm:$0xff] }
 0x369   : > { %11428 = vperm.xlu0 %15116, %v11286_v38   ;;  %v5264_v31 = vsel %vm1159_vm5, %v5261_v50, %v5263_v34  ;;  %v11294_v38 = vld [vmem:[%s18222_s0 + $0x110] sm:$0xff]  ;;  %v15380_v34 = vld [vmem:[%s15554_s14 + $0x40] sm:$0xff]  }
 0x36b   : > { %13522 = vmatmul.mubr.msk.bf16.gmra.mrb[24].mxu1 %vm701_vm2, %v4849_v30  ;;  %v5262_v30 = vsel %vm1159_vm5, %v5260_v1, %v5261_v50  ;;  %v5269_v50 = vrot.slane %v15378_v16, 1  ;;  %v10593_v16 = vshll.u32 %v17861_v13, 16 }
 0x36c   : > { %13525 = vmatprep.mubr.msk.bf16.mxu1 %vm701_vm2, %v4851_v48  ;;  %v11289_v48 = vld [vmem:[%s18222_s0 + $0xe8] sm:$0xff] }
 0x36d   : > { %14034 = vmatmul.mubr.msk.bf16.gmra.mrb[4].mxu0 %vm701_vm2, %v10471_v29  ;;  %11438 = vperm.xlu0 %15116, %v11288_v42   ;;  %v10523_v29 = vrot.slane %v10521_v33, 3  ;;  %v10551_v33 = vor.u32 %v10550_v56, %v10547_v60  ;;  %v10868_v56 = vld [vmem:[%s15852_s16 + $0x10] sm:$0x8]  ;;  %s15073_s16 = smul.u32 36, %s18247_s24 }
 0x36e   : > { %14037 = vmatprep.mubr.msk.bf16.mxu0 %vm701_vm2, %v10480_v11  ;;  %v10529_v11 = vrot.slane %v10527_v43, 2  ;;  %11443 = vperm.xlu1 %15117, %v11289_v48   ;;  %v5271_v48 = vrot.slane %v15379_v26, 1 }
 0x370   : > { %v5272_v35 = vsel %vm1159_vm5, %v5269_v50, %v5271_v48 }
 0x371   : > { %11448 = vperm.xlu0 %15116, %v11290_v20  }
 0x372   : > { %11453 = vperm.xlu1 %15117, %v11291_v36  }
 0x373   : > { %13526 = vmatmul.mubr.msk.bf16.gmra.mrb[28].mxu1 %vm701_vm2, %v4853_v5  ;;  %v10524_v5 = vor.u32 %v10523_v29, %v10520_v22  ;;  %v5273_v22 = vrot.slane %v15380_v34, 1 }
 0x374   : > { %13529 = vmatprep.mubr.msk.bf16.mxu1 %vm701_vm2, %v4855_v17  ;;  %v10533_v17 = vor.u32 %v10532_v37, %v10529_v11  ;;  %v10572_v11 = vshrl.u32 %v17635_v55, 16  ;;  %v10575_v37 = vshll.u32 %v17635_v55, 16 }
 0x375   : > { %14038 = vmatmul.mubr.msk.bf16.gmra.mrb[8].mxu0 %vm701_vm2, %v10489_v10  ;;  %11458 = vperm.xlu0 %15116, %v11292_v28   ;;  %v10525_v10 = vsel %vm3112_vm6, %v10515_v57, %v10524_v5  ;;  %v10566_v57 = vshll.u32 %v17610_v61, 16  ;;  %v5274_v36 = vsel %vm1159_vm5, %v5271_v48, %v5273_v22 }
 0x376   : > { %14041 = vmatprep.mubr.msk.bf16.mxu0 %vm701_vm2, %v10498_v58  ;;  %v5267_v58 = vrot.slane %v15377_v59, 1  ;;  %v10534_v1 = vsel %vm3112_vm6, %v10524_v5, %v10533_v17  ;;  %11463 = vperm.xlu1 %15117, %v11293_v52   ;;  %v10584_v5 = vshll.u32 %v17639_v49, 16  ;;  %v10577_v6 = vrot.slane %v10575_v37, 3 }
 0x378   : > { %v5268_v42 = vsel %vm1159_vm5, %v5265_v7, %v5267_v58  ;;  %v5270_v47 = vsel %vm1159_vm5, %v5267_v58, %v5269_v50  ;;  %v10586_v58 = vrot.slane %v10584_v5, 3  ;;  %v17905_v5 = vld [vmem:[%s15554_s14 + $0x80] sm:$0xff]  }
 0x379   : > { %11468 = vperm.xlu0 %15116, %v11294_v38   ;;  %v15382_v38 = vld [vmem:[%s15554_s14 + $0x50] sm:$0xff]  }
 0x37a   : > { %11473 = vperm.xlu1 %15117, %v11295_v62  }
 0x37b   : > { %13530 = vmatmul.mubr.msk.bf16.gmra.mrb[32].mxu1 %vm701_vm2, %v4857_v45  ;;  %v10554_v45 = vshrl.u32 %v17605_v2, 16 }
 0x37c   : > { %13535 = vmatprep.mubr.msk.bf16.mxu1 %vm701_vm2, %v5262_v30  ;;  %v10563_v30 = vshrl.u32 %v17610_v61, 16 }
 0x37d   : > { %14042 = vmatmul.mubr.msk.bf16.gmra.mrb[12].mxu0 %vm701_vm2, %v10507_v27  ;;  %v10556_v20 = vrot.slane %v10554_v45, 2  ;;  %v10559_v27 = vrot.slane %v10557_v24, 3  ;;  %v10595_v24 = vrot.slane %v10593_v16, 3  ;;  %v10887_v16 = vrot.slane %v17520_v0, 3 }
 0x37e   : > { %14045 = vmatprep.mubr.msk.bf16.mxu0 %vm701_vm2, %v10516_v25  ;;  %v10565_v29 = vrot.slane %v10563_v30, 2  ;;  %v10568_v25 = vrot.slane %v10566_v57, 3  ;;  %v12542_v57 = vcombine.low %v10868_v56, %v17419_v63  ;;  %v15385_v63 = vld [vmem:[%s15554_s14 + $0x68] sm:$0xff]  }
 0x37f   : > { %v10560_v7 = vor.u32 %v10559_v27, %v10556_v20  ;;  %v10875_v27 = vrot.slane %v17432_v53, 3  ;;  %v5283_v34 = vrot.slane %v15385_v63, 1  ;;  %v10877_v53 = vrot.slane %v17455_v39, 3 }
 0x380   : > { %v10569_v28 = vor.u32 %v10568_v25, %v10565_v29  ;;  %v10874_v20 = vrot.slane %v12542_v57, 3  ;;  %v15386_v29 = vld [vmem:[%s15554_s14 + $0x70] sm:$0xff]   ;;  %v5289_v39 = vrot.slane %v17905_v5, 1 }
 0x381   : > { %v10561_v51 = vsel %vm3112_vm6, %v10551_v33, %v10560_v7  ;;  %v5285_v25 = vrot.slane %v15386_v29, 1  ;;  %v10878_v37 = vsel %vm3559_vm7, %v10875_v27, %v10877_v53 }
 0x382   : > { %v10570_v52 = vsel %vm3112_vm6, %v10560_v7, %v10569_v28 }
 0x383   : > { %13536 = vmatmul.mubr.msk.bf16.vlgmr.msra.gmra.mrb[0].mxu1 %vm701_vm2, %v5264_v31  ;;  %v10581_v31 = vshrl.u32 %v17639_v49, 16  ;;  %v5286_v7 = vsel %vm1159_vm5, %v5283_v34, %v5285_v25 }
 0x384   : > { %13539 = vmatprep.mubr.msk.bf16.mxu1 %vm701_vm2, %v5266_v21  ;;  %14104 = vmatpush3.bf16.msra.mxu1 %v15515_v3  ;;  %v10542_v3 = vor.u32 %v10541_v46, %v10538_v32  ;;  %v5275_v21 = vrot.slane %v15381_v9, 1 }
 0x385   : > { %14046 = vmatmul.mubr.msk.bf16.gmra.mrb[16].mxu0 %vm701_vm2, %v10525_v10  ;;  %v5277_v10 = vrot.slane %v15382_v38, 1  ;;  %v10583_v59 = vrot.slane %v10581_v31, 2 }
 0x386   : > { %14049 = vmatprep.mubr.msk.bf16.mxu0 %vm701_vm2, %v10534_v1  ;;  %v10543_v43 = vsel %vm3112_vm6, %v10533_v17, %v10542_v3  ;;  %v10552_v44 = vsel %vm3112_vm6, %v10542_v3, %v10551_v33  ;;  %v10574_v17 = vrot.slane %v10572_v11, 2  ;;  %v5276_v32 = vsel %vm1159_vm5, %v5273_v22, %v5275_v21  ;;  %v15384_v33 = vld [vmem:[%s15554_s14 + $0x60] sm:$0xff]  }
 0x387   : > { %v10590_v1 = vshrl.u32 %v17861_v13, 16  ;;  %v5278_v50 = vsel %vm1159_vm5, %v5275_v21, %v5277_v10  ;;  %v10587_v60 = vor.u32 %v10586_v58, %v10583_v59  ;;  %v5281_v30 = vrot.slane %v15384_v33, 1 }
 0x388   : > { %v10578_v46 = vor.u32 %v10577_v6, %v10574_v17  ;;  %v10876_v22 = vsel %vm3559_vm7, %v10874_v20, %v10875_v27  ;;  %v10879_v11 = vrot.slane %v17459_v54, 3  ;;  %v10883_v21 = vrot.slane %v17487_v41, 3  ;;  %v17918_v6 = vld [vmem:[%s15554_s14 + $0x88] sm:$0xff]  }
 0x389   : > { %v10592_v45 = vrot.slane %v10590_v1, 2  ;;  %v5672_v59 = vshrl.u32 %v15384_v33, 16  ;;  %v5675_v58 = vshll.u32 %v15384_v33, 16  ;;  %v10889_v33 = vrot.slane %v17536_v19, 3 }
 0x38a   : > { %v10579_v62 = vsel %vm3112_vm6, %v10569_v28, %v10578_v46  ;;  %v10880_v31 = vsel %vm3559_vm7, %v10877_v53, %v10879_v11 }
 0x38b   : > { %13540 = vmatmul.mubr.msk.bf16.gmra.mrb[4].mxu1 %vm701_vm2, %v5268_v42  ;;  %v15383_v42 = vld [vmem:[%s15554_s14 + $0x58] sm:$0xff]   ;;  %v10596_v26 = vor.u32 %v10595_v24, %v10592_v45  ;;  %v10890_v27 = vsel %vm3559_vm7, %v10887_v16, %v10889_v33 }
 0x38c   : > { %13543 = vmatprep.mubr.msk.bf16.mxu1 %vm701_vm2, %v5270_v47  ;;  %v5279_v3 = vrot.slane %v15383_v42, 1  ;;  %v10588_v47 = vsel %vm3112_vm6, %v10578_v46, %v10587_v60  ;;  %v15339_v46 = vld [vmem:[%s15554_s14 + $0x98] ss:$0 sps:$4 sm:$0x11]   ;;  %v5681_v42 = vshrl.u32 %v15385_v63, 16 }
 0x38d   : > { %14050 = vmatmul.mubr.msk.bf16.gmra.mrb[20].mxu0 %vm701_vm2, %v10543_v43 }
 0x38e   : > { %14053 = vmatprep.mubr.msk.bf16.mxu0 %vm701_vm2, %v10552_v44  ;;  %v5280_v43 = vsel %vm1159_vm5, %v5277_v10, %v5279_v3  ;;  %v5282_v48 = vsel %vm1159_vm5, %v5279_v3, %v5281_v30  ;;  %v10597_v44 = vsel %vm3112_vm6, %v10587_v60, %v10596_v26  ;;  %v17923_v10 = vld [vmem:[%s15554_s14 + $0x90] sm:$0xff]   ;;  %v5677_v60 = vrot.slane %v5675_v58, 2 }
 0x38f   : > { %v5684_v3 = vshll.u32 %v15385_v63, 16  ;;  %v10891_v26 = vrot.slane %v17541_v8, 3  ;;  %v5711_v8 = vshll.u32 %v17905_v5, 16 }
 0x391   : > { %v5686_v57 = vrot.slane %v5684_v3, 2 }
 0x393   : > { %13544 = vmatmul.mubr.msk.bf16.gmra.mrb[8].mxu1 %vm701_vm2, %v5272_v35  ;;  %v5284_v35 = vsel %vm1159_vm5, %v5281_v30, %v5283_v34  ;;  %v5683_v30 = vrot.slane %v5681_v42, 1  ;;  %v10892_v34 = vsel %vm3559_vm7, %v10889_v33, %v10891_v26 }
 0x394   : > { %13547 = vmatprep.mubr.msk.bf16.mxu1 %vm701_vm2, %v5274_v36  ;;  %v17900_v36 = vld [vmem:[%s15554_s14 + $0x78] sm:$0xff]  }
 0x395   : > { %14054 = vmatmul.mubr.msk.bf16.gmra.mrb[24].mxu0 %vm701_vm2, %v10561_v51  ;;  %v5287_v28 = vrot.slane %v17900_v36, 1  ;;  %v10881_v51 = vrot.slane %v17481_v23, 3  ;;  %v5293_v23 = vrot.slane %v17923_v10, 1  ;;  %v5699_v63 = vshrl.u32 %v17900_v36, 16 }
 0x396   : > { %14057 = vmatprep.mubr.msk.bf16.mxu0 %vm701_vm2, %v10570_v52  ;;  %v5291_v52 = vrot.slane %v17918_v6, 1  ;;  %v5702_v19 = vshll.u32 %v17900_v36, 16  ;;  %v5713_v36 = vrot.slane %v5711_v8, 2 }
 0x397   : > { %v5288_v54 = vsel %vm1159_vm5, %v5285_v25, %v5287_v28  ;;  %v5290_v9 = vsel %vm1159_vm5, %v5287_v28, %v5289_v39  ;;  %v10882_v17 = vsel %vm3559_vm7, %v10879_v11, %v10881_v51  ;;  %v10884_v38 = vsel %vm3559_vm7, %v10881_v51, %v10883_v21 }
 0x398   : > { %v5292_v41 = vsel %vm1159_vm5, %v5289_v39, %v5291_v52  ;;  %v5294_v1 = vsel %vm1159_vm5, %v5291_v52, %v5293_v23  ;;  %v10893_v25 = vrot.slane %v17554_v12, 3  ;;  %v5704_v53 = vrot.slane %v5702_v19, 2 }
 0x399   : > { %v10895_v11 = vrot.slane %v17559_v14, 3  ;;  %v5720_v39 = vshll.u32 %v17918_v6, 16  ;;  %v5726_v51 = vshrl.u32 %v17923_v10, 16  ;;  %v5729_v14 = vshll.u32 %v17923_v10, 16 }
 0x39a   : > { %v10894_v28 = vsel %vm3559_vm7, %v10891_v26, %v10893_v25 }
 0x39b   : > { %13548 = vmatmul.mubr.msk.bf16.gmra.mrb[12].mxu1 %vm701_vm2, %v5276_v32  ;;  %v10885_v32 = vrot.slane %v17513_v18, 3  ;;  %v5690_v18 = vshrl.u32 %v15386_v29, 16  ;;  %v10896_v12 = vsel %vm3559_vm7, %v10893_v25, %v10895_v11  ;;  %v5722_v52 = vrot.slane %v5720_v39, 2 }
 0x39c   : > { %13551 = vmatprep.mubr.msk.bf16.mxu1 %vm701_vm2, %v5278_v50  ;;  %v5674_v50 = vrot.slane %v5672_v59, 1  ;;  %v5731_v59 = vrot.slane %v5729_v14, 2  ;;  %v18053_v14 = vld [vmem:[%s18227_s5] ss:$0 sm:$0xff] }
 0x39d   : > { %14058 = vmatmul.mubr.msk.bf16.gmra.mrb[28].mxu0 %vm701_vm2, %v10579_v62  ;;  %v10886_v56 = vsel %vm3559_vm7, %v10883_v21, %v10885_v32  ;;  %v5295_v62 = vrot.slane %v15339_v46, 1  ;;  %v10888_v45 = vsel %vm3559_vm7, %v10885_v32, %v10887_v16  ;;  %v10897_v21 = vrot.slane %v17574_v40, 3 }
 0x39e   : > { %14061 = vmatprep.mubr.msk.bf16.mxu0 %vm701_vm2, %v10588_v47  ;;  %v5678_v24 = vor.u32 %v5677_v60, %v5674_v50  ;;  %v5693_v47 = vshll.u32 %v15386_v29, 16 }
 0x39f   : > { %v5296_v0 = vsel %vm1159_vm5, %v5293_v23, %v5295_v62  ;;  %v5728_v23 = vrot.slane %v5726_v51, 1  ;;  %v10898_v10 = vsel %vm3559_vm7, %v10895_v11, %v10897_v21  ;;  %v10903_v62 = vrot.slane %v17610_v61, 3 }
 0x3a0   : > { %v5695_v20 = vrot.slane %v5693_v47, 2 }
 0x3a3   : > { %13552 = vmatmul.mubr.msk.bf16.gmra.mrb[16].mxu1 %vm701_vm2, %v5280_v43  ;;  %v5679_v43 = vsel %vm1912_vm3, %v15730_v15, %v5678_v24  ;;  %v5708_v15 = vshrl.u32 %v17905_v5, 16  ;;  %v5717_v5 = vshrl.u32 %v17918_v6, 16 }
 0x3a4   : > { %13555 = vmatprep.mubr.msk.bf16.mxu1 %vm701_vm2, %v5282_v48  ;;  %v5692_v48 = vrot.slane %v5690_v18, 1  ;;  %v10907_v18 = vrot.slane %v17639_v49, 3 }
 0x3a5   : > { %14062 = vmatmul.mubr.msk.bf16.gmra.mrb[32].mxu0 %vm701_vm2, %v10597_v44  ;;  %v5687_v44 = vor.u32 %v5686_v57, %v5683_v30 }
 0x3a6   : > { %14067 = vmatprep.mubr.msk.bf16.mxu0 %vm701_vm2, %v10876_v22  ;;  %v5696_v22 = vor.u32 %v5695_v20, %v5692_v48 }
 0x3a7   : > { %v5688_v29 = vsel %vm1912_vm3, %v5678_v24, %v5687_v44 }
 0x3ab   : > { %13556 = vmatmul.mubr.msk.bf16.gmra.mrb[20].mxu1 %vm701_vm2, %v5284_v35  ;;  %v5701_v35 = vrot.slane %v5699_v63, 1 }
 0x3ac   : > { %13559 = vmatprep.mubr.msk.bf16.mxu1 %vm701_vm2, %v5286_v7  ;;  %v5697_v7 = vsel %vm1912_vm3, %v5687_v44, %v5696_v22  ;;  %v11309_v44 = vpop.permute.xlu1 %11308 }
 0x3ad   : > { %14068 = vmatmul.mubr.msk.bf16.vlgmr.msra.gmra.mrb[0].mxu0 %vm701_vm2, %v10878_v37  ;;  %v5710_v37 = vrot.slane %v5708_v15, 1 }
 0x3ae   : > { %14071 = vmatprep.mubr.msk.bf16.mxu0 %vm701_vm2, %v10880_v31  ;;  %v5705_v31 = vor.u32 %v5704_v53, %v5701_v35 }
 0x3b3   : > { %13560 = vmatmul.mubr.msk.bf16.gmra.mrb[24].mxu1 %vm701_vm2, %v5288_v54  ;;  %v5714_v54 = vor.u32 %v5713_v36, %v5710_v37  ;;  %v11314_v15 = vpop.permute.xlu1 %11313 }
 0x3b4   : > { %13563 = vmatprep.mubr.msk.bf16.mxu1 %vm701_vm2, %v5290_v9  ;;  %v5706_v9 = vsel %vm1912_vm3, %v5696_v22, %v5705_v31 }
 0x3b5   : > { %14072 = vmatmul.mubr.msk.bf16.gmra.mrb[4].mxu0 %vm701_vm2, %v10882_v17  ;;  %v5719_v17 = vrot.slane %v5717_v5, 1  ;;  %v5715_v6 = vsel %vm1912_vm3, %v5705_v31, %v5714_v54 }
 0x3b6   : > { %14075 = vmatprep.mubr.msk.bf16.mxu0 %vm701_vm2, %v10884_v38  ;;  %v10899_v38 = vrot.slane %v17579_v4, 3  ;;  %v10901_v4 = vrot.slane %v17605_v2, 3  ;;  %v10905_v2 = vrot.slane %v17635_v55, 3 }
 0x3b7   : > { %v5723_v58 = vor.u32 %v5722_v52, %v5719_v17  ;;  %v18022_v53 = vpop.permute.xlu1 %11323 }
 0x3b8   : > { %v10900_v40 = vsel %vm3559_vm7, %v10897_v21, %v10899_v38  ;;  %v10902_v42 = vsel %vm3559_vm7, %v10899_v38, %v10901_v4  ;;  %v10906_v61 = vsel %vm3559_vm7, %v10903_v62, %v10905_v2  ;;  %v10908_v47 = vsel %vm3559_vm7, %v10905_v2, %v10907_v18 }
 0x3b9   : > { %v5724_v16 = vsel %vm1912_vm3, %v5714_v54, %v5723_v58 }
 0x3bb   : > { %13564 = vmatmul.mubr.msk.bf16.gmra.mrb[28].mxu1 %vm701_vm2, %v5292_v41  ;;  %v15391_v41 = vld [vmem:[%s15554_s14 + $0x98] ss:$0 sps:$4 sm:$0x33]   ;;  %s15074_s14 = smul.u32 576, %s18241_s25 }
 0x3bc   : > { %13567 = vmatprep.mubr.msk.bf16.mxu1 %vm701_vm2, %v5294_v1  ;;  %v5735_v32 = vshrl.u32 %v15391_v41, 16  ;;  %v5738_v46 = vshll.u32 %v15391_v41, 16  ;;  %v5732_v1 = vor.u32 %v5731_v59, %v5728_v23 }
 0x3bd   : > { %14076 = vmatmul.mubr.msk.bf16.gmra.mrb[8].mxu0 %vm701_vm2, %v10886_v56  ;;  %v18034_v36 = vpop.permute.xlu1 %11333  ;;  %s407_s17 = sadd.s32 %s15074_s14, %s15073_s16 }
 0x3be   : > { %14079 = vmatprep.mubr.msk.bf16.mxu0 %vm701_vm2, %v10888_v45  ;;  %v5737_v50 = vrot.slane %v5735_v32, 1  ;;  %v5740_v60 = vrot.slane %v5738_v46, 2  ;;  %v5733_v56 = vsel %vm1912_vm3, %v5723_v58, %v5732_v1  ;;  %v10904_v45 = vsel %vm3559_vm7, %v10901_v4, %v10903_v62  ;;  %s11824_s19 = sshll.u32 %s407_s17, 3 }
 0x3bf   : > { %s18060_s8 = scalar_lea.vmem %s18228_s6, %s11824_s19 }
 0x3c0   : > { %v5741_v3 = vor.u32 %v5740_v60, %v5737_v50 }
 0x3c2   : > { %v5742_v24 = vsel %vm1912_vm3, %v5732_v1, %v5741_v3 }
 0x3c3   : > { %13568 = vmatmul.mubr.msk.bf16.gmra.mrb[32].mxu1 %vm701_vm2, %v5296_v0  ;;  %v10909_v0 = vrot.slane %v17861_v13, 3 }
 0x3c4   : > { %13593 = vmatprep.mubr.msk.bf16.mxu1 %vm701_vm2, %v5679_v43 }
 0x3c5   : > { %14080 = vmatmul.mubr.msk.bf16.gmra.mrb[12].mxu0 %vm701_vm2, %v10890_v27  ;;  %v10910_v33 = vsel %vm3559_vm7, %v10907_v18, %v10909_v0  ;;  %v11299_v27 = vpop.permute.xlu0 %11298 }
 0x3c6   : > { %14083 = vmatprep.mubr.msk.bf16.mxu0 %vm701_vm2, %v10892_v34 }
 0x3c9   : > { %v11304_v19 = vpop.permute.xlu0 %11303 }
 0x3cb   : > { %13594 = vmatmul.mubr.msk.bf16.vlgmr.msra.gmra.mrb[20].mxu1 %vm701_vm2, %v5688_v29 }
 0x3cc   : > { %13597 = vmatprep.mubr.msk.bf16.mxu1 %vm701_vm2, %v5697_v7 }
 0x3cd   : > { %14084 = vmatmul.mubr.msk.bf16.gmra.mrb[16].mxu0 %vm701_vm2, %v10894_v28  ;;  %v18014_v8 = vpop.permute.xlu0 %11318 }
 0x3ce   : > { %14087 = vmatprep.mubr.msk.bf16.mxu0 %vm701_vm2, %v10896_v12  ;;  %v18046_v12 = vpop.permute.xlu1 %11343 }
 0x3d1   : > { %v18027_v11 = vpop.permute.xlu0 %11328 }
 0x3d3   : > { %13598 = vmatmul.mubr.msk.bf16.gmra.mrb[24].mxu1 %vm701_vm2, %v5706_v9  ;;  %v18055_v9 = vpop.permute.xlu1 %11353 }
 0x3d4   : > { %13601 = vmatprep.mubr.msk.bf16.mxu1 %vm701_vm2, %v5715_v6 }
 0x3d5   : > { %14088 = vmatmul.mubr.msk.bf16.gmra.mrb[20].mxu0 %vm701_vm2, %v10898_v10  ;;  %v18043_v39 = vpop.permute.xlu0 %11338 }
 0x3d6   : > { %14091 = vmatprep.mubr.msk.bf16.mxu0 %vm701_vm2, %v10900_v40 }
 0x3d7   : > { %v18070_v1 = vpop.permute.xlu1 %11363 }
 0x3d9   : > { %v18048_v54 = vpop.permute.xlu0 %11348 }
 0x3db   : > { %13602 = vmatmul.mubr.msk.bf16.gmra.mrb[28].mxu1 %vm701_vm2, %v5724_v16 }
 0x3dc   : > { %13605 = vmatprep.mubr.msk.bf16.mxu1 %vm701_vm2, %v5733_v56 }
 0x3dd   : > { %14092 = vmatmul.mubr.msk.bf16.gmra.mrb[24].mxu0 %vm701_vm2, %v10902_v42  ;;  %v18063_v10 = vpop.permute.xlu0 %11358 }
 0x3de   : > { %14095 = vmatprep.mubr.msk.bf16.mxu0 %vm701_vm2, %v10904_v45 }
 0x3e1   : > { %v18074_v42 = vpop.permute.xlu0 %11368 }
 0x3e3   : > { %13606 = vmatmul.mubr.msk.bf16.gmra.mrb[32].mxu1 %vm701_vm2, %v5742_v24 }
 0x3e5   : > { %14096 = vmatmul.mubr.msk.bf16.gmra.mrb[28].mxu0 %vm701_vm2, %v10906_v61 }
 0x3e6   : > { %14099 = vmatprep.mubr.msk.bf16.mxu0 %vm701_vm2, %v10908_v47 }
 0x3ed   : > { %14100 = vmatmul.mubr.msk.bf16.gmra.mrb[32].mxu0 %vm701_vm2, %v10910_v33 }
 0x456   : > { %v13537_v30 = vpop.f32.mrb[0].mxu1 }
 0x457   : > { %v5388_v55 = vpop.f32.mrb[1].mxu1 }
 0x458   : > { %v13538_v57 = vpop.f32.mrb[2].mxu1 }
 0x459   : > { %v5391_v49 = vpop.f32.mrb[3].mxu1 }
 0x45e   : > { %v13541_v43 = vpop.f32.mrb[4].mxu1 }
 0x45f   : > { %v18000_v26 = vpop.f32.mrb[5].mxu1 }
 0x460   : > { %v18002_v48 = vpop.f32.mrb[6].mxu1 }
 0x461   : > { %v18004_v20 = vpop.f32.mrb[7].mxu1 }
 0x466   : > { %v18006_v13 = vpop.f32.mrb[8].mxu1 }
 0x467   : > { %v18008_v63 = vpop.f32.mrb[9].mxu1 }
 0x468   : > { %v18010_v34 = vpop.f32.mrb[10].mxu1 }
 0x469   : > { %v18012_v22 = vpop.f32.mrb[11].mxu1 }
 0x46e   : > { %v18016_v29 = vpop.f32.mrb[12].mxu1 }
 0x46f   : > { %v18018_v25 = vpop.f32.mrb[13].mxu1 }
 0x470   : > { %v18020_v35 = vpop.f32.mrb[14].mxu1 }
 0x471   : > { %v18024_v7 = vpop.f32.mrb[15].mxu1 }
 0x476   : > { %v18029_v37 = vpop.f32.mrb[16].mxu1 }
 0x477   : > { %v18036_v28 = vpop.f32.mrb[17].mxu1 }
 0x478   : > { %v18038_v31 = vpop.f32.mrb[18].mxu1 }
 0x479   : > { %v18040_v5 = vpop.f32.mrb[19].mxu1 }
 0x480   : > { %v14069_v51 = vpop.f32.mrb[0].mxu0 }
 0x481   : > { %v14105_v21 = vadd.f32 %v14069_v51, %v13537_v30  ;;  %v11002_v17 = vpop.f32.mrb[1].mxu0 }
 0x482   : > { %v14106_v52 = vadd.f32 %v11002_v17, %v5388_v55  ;;  %v14070_v6 = vpop.f32.mrb[2].mxu0 }
 0x483   : > { %v11190_v38 = vadd.f32 %v14105_v21, %v18053_v14  ;;  %v14107_v23 = vadd.f32 %v14070_v6, %v13538_v57  ;;  %v11005_v59 = vpop.f32.mrb[3].mxu0  ;;  %v18090_v21 = vpop.permute.xlu0 %11378 }
 0x484   : > { %v11188_v58 = vadd.f32 %v14106_v52, %v18053_v14  ;;  %v14108_v41 = vadd.f32 %v11005_v59, %v5391_v49 }
 0x485   : > { %11226 = vst [vmem:[%s18060_s8 + $0x10] sm:$0xff] %v11190_v38  ;;  %v11191_v32 = vadd.f32 %v14107_v23, %v18053_v14  ;;  %v11478_v16 = vmul.f32 %v11309_v44, %v11190_v38 }
 0x486   : > { %11224 = vst [vmem:[%s18060_s8] sm:$0xff] %v11188_v58  ;;  %v11476_v46 = vmul.f32 %v11299_v27, %v11188_v58  ;;  %v11189_v40 = vadd.f32 %v14108_v41, %v18053_v14 }
 0x487   : > { %11227 = vst [vmem:[%s18060_s8 + $0x18] sm:$0xff] %v11191_v32  ;;  %v11479_v60 = vmul.f32 %v11314_v15, %v11191_v32  ;;  %v11556_v61 = vmul.f32 %v11478_v16, %v11190_v38 }
 0x488   : > { %11225 = vst [vmem:[%s18060_s8 + $0x8] sm:$0xff] %v11189_v40  ;;  %v11477_v4 = vmul.f32 %v11304_v19, %v11189_v40  ;;  %v14073_v50 = vpop.f32.mrb[4].mxu0  ;;  %v11554_v3 = vmul.f32 %v11476_v46, %v11188_v58 }
 0x489   : > { %v14109_v56 = vadd.f32 %v14073_v50, %v13541_v43  ;;  %v11018_v62 = vpop.f32.mrb[5].mxu0  ;;  %v18081_v43 = vpop.permute.xlu1 %11373  ;;  %v11557_v27 = vmul.f32 %v11479_v60, %v11191_v32 }
 0x48a   : > { %v11512_v45 = vadd.f32 %v11477_v4, %v11476_v46  ;;  %v11555_v24 = vmul.f32 %v11477_v4, %v11189_v40  ;;  %v14110_v2 = vadd.f32 %v11018_v62, %v18000_v26  ;;  %v14074_v18 = vpop.f32.mrb[6].mxu0 }
 0x48b   : > { %v11194_v47 = vadd.f32 %v14109_v56, %v18053_v14  ;;  %v14111_v0 = vadd.f32 %v14074_v18, %v18002_v48  ;;  %v11021_v33 = vpop.f32.mrb[7].mxu0 }
 0x48c   : > { %v11513_v30 = vadd.f32 %v11512_v45, %v11478_v16  ;;  %v11590_v55 = vadd.f32 %v11555_v24, %v11554_v3  ;;  %v11192_v57 = vadd.f32 %v14110_v2, %v18053_v14  ;;  %v14112_v49 = vadd.f32 %v11021_v33, %v18004_v20  ;;  %v18105_v3 = vpop.permute.xlu0 %11388 }
 0x48d   : > { %11230 = vst [vmem:[%s18060_s8 + $0x30] sm:$0xff] %v11194_v47  ;;  %v11195_v26 = vadd.f32 %v14111_v0, %v18053_v14  ;;  %v11482_v51 = vmul.f32 %v18027_v11, %v11194_v47  ;;  %v18097_v40 = vpop.permute.xlu1 %11383 }
 0x48e   : > { %v11591_v44 = vadd.f32 %v11590_v55, %v11556_v61  ;;  %11228 = vst [vmem:[%s18060_s8 + $0x20] sm:$0xff] %v11192_v57  ;;  %v11480_v19 = vmul.f32 %v18014_v8, %v11192_v57  ;;  %v11514_v48 = vadd.f32 %v11513_v30, %v11479_v60  ;;  %v11193_v15 = vadd.f32 %v14112_v49, %v18053_v14 }
 0x48f   : > { %11231 = vst [vmem:[%s18060_s8 + $0x38] sm:$0xff] %v11195_v26  ;;  %v11483_v23 = vmul.f32 %v18034_v36, %v11195_v26  ;;  %v11560_v16 = vmul.f32 %v11482_v51, %v11194_v47 }
 0x490   : > { %v11515_v20 = vadd.f32 %v11514_v48, %v11480_v19  ;;  %v11558_v17 = vmul.f32 %v11480_v19, %v11192_v57  ;;  %v11592_v52 = vadd.f32 %v11591_v44, %v11557_v27  ;;  %11229 = vst [vmem:[%s18060_s8 + $0x28] sm:$0xff] %v11193_v15  ;;  %v11481_v6 = vmul.f32 %v18022_v53, %v11193_v15  ;;  %v14077_v38 = vpop.f32.mrb[8].mxu0 }
 0x491   : > { %v14113_v59 = vadd.f32 %v14077_v38, %v18006_v13  ;;  %v11034_v8 = vpop.f32.mrb[9].mxu0  ;;  %v11561_v62 = vmul.f32 %v11483_v23, %v11195_v26  ;;  %v18114_v30 = vpop.permute.xlu1 %11393 }
 0x492   : > { %v11593_v58 = vadd.f32 %v11592_v52, %v11558_v17  ;;  %v11516_v41 = vadd.f32 %v11515_v20, %v11481_v6  ;;  %v11559_v32 = vmul.f32 %v11481_v6, %v11193_v15  ;;  %v14114_v11 = vadd.f32 %v11034_v8, %v18008_v63  ;;  %v14078_v46 = vpop.f32.mrb[10].mxu0 }
 0x493   : > { %v11198_v4 = vadd.f32 %v14113_v59, %v18053_v14  ;;  %v14115_v53 = vadd.f32 %v14078_v46, %v18010_v34  ;;  %v11037_v36 = vpop.f32.mrb[11].mxu0 }
 0x494   : > { %v11517_v50 = vadd.f32 %v11516_v41, %v11482_v51  ;;  %v11594_v13 = vadd.f32 %v11593_v58, %v11559_v32  ;;  %v11196_v60 = vadd.f32 %v14114_v11, %v18053_v14  ;;  %v14116_v56 = vadd.f32 %v11037_v36, %v18012_v22  ;;  %v18121_v51 = vpop.permute.xlu0 %11398 }
 0x495   : > { %11234 = vst [vmem:[%s18060_s8 + $0x50] sm:$0xff] %v11198_v4  ;;  %v11199_v63 = vadd.f32 %v14115_v53, %v18053_v14  ;;  %v11486_v18 = vmul.f32 %v18048_v54, %v11198_v4  ;;  %v18130_v41 = vpop.permute.xlu1 %11403 }
 0x496   : > { %v11595_v45 = vadd.f32 %v11594_v13, %v11560_v16  ;;  %11232 = vst [vmem:[%s18060_s8 + $0x40] sm:$0xff] %v11196_v60  ;;  %v11484_v24 = vmul.f32 %v18043_v39, %v11196_v60  ;;  %v11518_v34 = vadd.f32 %v11517_v50, %v11483_v23  ;;  %v11197_v2 = vadd.f32 %v14116_v56, %v18053_v14 }
 0x497   : > { %11235 = vst [vmem:[%s18060_s8 + $0x58] sm:$0xff] %v11199_v63  ;;  %v11487_v55 = vmul.f32 %v18055_v9, %v11199_v63  ;;  %v11564_v19 = vmul.f32 %v11486_v18, %v11198_v4 }
 0x498   : > { %v11519_v61 = vadd.f32 %v11518_v34, %v11484_v24  ;;  %v11562_v47 = vmul.f32 %v11484_v24, %v11196_v60  ;;  %v11596_v0 = vadd.f32 %v11595_v45, %v11561_v62  ;;  %11233 = vst [vmem:[%s18060_s8 + $0x48] sm:$0xff] %v11197_v2  ;;  %v11485_v22 = vmul.f32 %v18046_v12, %v11197_v2  ;;  %v14081_v33 = vpop.f32.mrb[12].mxu0  ;;  %v18138_v13 = vpop.permute.xlu0 %11408 }
 0x499   : > { %v14117_v57 = vadd.f32 %v14081_v33, %v18016_v29  ;;  %v11050_v39 = vpop.f32.mrb[13].mxu0  ;;  %v11565_v6 = vmul.f32 %v11487_v55, %v11199_v63 }
 0x49a   : > { %v11597_v49 = vadd.f32 %v11596_v0, %v11562_v47  ;;  %v11520_v27 = vadd.f32 %v11519_v61, %v11485_v22  ;;  %v11563_v26 = vmul.f32 %v11485_v22, %v11197_v2  ;;  %v14118_v54 = vadd.f32 %v11050_v39, %v18018_v25  ;;  %v14082_v44 = vpop.f32.mrb[14].mxu0  ;;  %v11414_v47 = vpop.permute.xlu1 %11413 }
 0x49b   : > { %v11202_v48 = vadd.f32 %v14117_v57, %v18053_v14  ;;  %v14119_v12 = vadd.f32 %v14082_v44, %v18020_v35  ;;  %v11053_v15 = vpop.f32.mrb[15].mxu0 }
 0x49c   : > { %v11521_v9 = vadd.f32 %v11520_v27, %v11486_v18  ;;  %v11598_v20 = vadd.f32 %v11597_v49, %v11563_v26  ;;  %v11200_v29 = vadd.f32 %v14118_v54, %v18053_v14  ;;  %v14120_v17 = vadd.f32 %v11053_v15, %v18024_v7  ;;  %v18154_v27 = vpop.permute.xlu0 %11418 }
 0x49d   : > { %11238 = vst [vmem:[%s18060_s8 + $0x70] sm:$0xff] %v11202_v48  ;;  %v11203_v25 = vadd.f32 %v14119_v12, %v18053_v14  ;;  %v11490_v32 = vmul.f32 %v18074_v42, %v11202_v48 }
 0x49e   : > { %v13595_v52 = vpop.f32.mrb[20].mxu1  ;;  %v11599_v23 = vadd.f32 %v11598_v20, %v11564_v19  ;;  %11236 = vst [vmem:[%s18060_s8 + $0x60] sm:$0xff] %v11200_v29  ;;  %v11488_v35 = vmul.f32 %v18063_v10, %v11200_v29  ;;  %v11522_v59 = vadd.f32 %v11521_v9, %v11487_v55  ;;  %v11201_v8 = vadd.f32 %v14120_v17, %v18053_v14 }
 0x49f   : > { %v5914_v38 = vpop.f32.mrb[21].mxu1  ;;  %11239 = vst [vmem:[%s18060_s8 + $0x78] sm:$0xff] %v11203_v25  ;;  %v11491_v36 = vmul.f32 %v18081_v43, %v11203_v25  ;;  %v11568_v45 = vmul.f32 %v11490_v32, %v11202_v48 }
 0x4a0   : > { %v13596_v58 = vpop.f32.mrb[22].mxu1  ;;  %v11523_v11 = vadd.f32 %v11522_v59, %v11488_v35  ;;  %v11566_v46 = vmul.f32 %v11488_v35, %v11200_v29  ;;  %v11600_v16 = vadd.f32 %v11599_v23, %v11565_v6  ;;  %11237 = vst [vmem:[%s18060_s8 + $0x68] sm:$0xff] %v11201_v8  ;;  %v11489_v4 = vmul.f32 %v18070_v1, %v11201_v8  ;;  %v14085_v53 = vpop.f32.mrb[16].mxu0 }
 0x4a1   : > { %v5917_v7 = vpop.f32.mrb[23].mxu1  ;;  %v14121_v10 = vadd.f32 %v14085_v53, %v18029_v37  ;;  %v11066_v50 = vpop.f32.mrb[17].mxu0  ;;  %v11569_v0 = vmul.f32 %v11491_v36, %v11203_v25 }
 0x4a2   : > { %v11601_v60 = vadd.f32 %v11600_v16, %v11566_v46  ;;  %v11524_v56 = vadd.f32 %v11523_v11, %v11489_v4  ;;  %v11567_v42 = vmul.f32 %v11489_v4, %v11201_v8  ;;  %v14122_v62 = vadd.f32 %v11066_v50, %v18036_v28  ;;  %v14086_v63 = vpop.f32.mrb[18].mxu0  ;;  %v18159_v6 = vpop.permute.xlu1 %11423 }
 0x4a3   : > { %v11206_v24 = vadd.f32 %v14121_v10, %v18053_v14  ;;  %v14123_v1 = vadd.f32 %v14086_v63, %v18038_v31  ;;  %v11069_v34 = vpop.f32.mrb[19].mxu0  ;;  %v11429_v16 = vpop.permute.xlu0 %11428 }
 0x4a4   : > { %v11525_v43 = vadd.f32 %v11524_v56, %v11490_v32  ;;  %v11602_v2 = vadd.f32 %v11601_v60, %v11567_v42  ;;  %v11204_v37 = vadd.f32 %v14122_v62, %v18053_v14  ;;  %v14124_v18 = vadd.f32 %v11069_v34, %v18040_v5 }
 0x4a5   : > { %11242 = vst [vmem:[%s18060_s8 + $0x90] sm:$0xff] %v11206_v24  ;;  %v11207_v28 = vadd.f32 %v14123_v1, %v18053_v14  ;;  %v11494_v49 = vmul.f32 %v18105_v3, %v11206_v24 }
 0x4a6   : > { %v13599_v61 = vpop.f32.mrb[24].mxu1  ;;  %v11603_v33 = vadd.f32 %v11602_v2, %v11568_v45  ;;  %11240 = vst [vmem:[%s18060_s8 + $0x80] sm:$0xff] %v11204_v37  ;;  %v11492_v31 = vmul.f32 %v18090_v21, %v11204_v37  ;;  %v11526_v55 = vadd.f32 %v11525_v43, %v11491_v36  ;;  %v11205_v57 = vadd.f32 %v14124_v18, %v18053_v14  ;;  %v11434_v45 = vpop.permute.xlu1 %11433 }
 0x4a7   : > { %v5930_v22 = vpop.f32.mrb[25].mxu1  ;;  %11243 = vst [vmem:[%s18060_s8 + $0x98] sm:$0xff] %v11207_v28  ;;  %v11495_v21 = vmul.f32 %v18114_v30, %v11207_v28  ;;  %v11572_v25 = vmul.f32 %v11494_v49, %v11206_v24 }
 0x4a8   : > { %v13600_v39 = vpop.f32.mrb[26].mxu1  ;;  %v11527_v26 = vadd.f32 %v11526_v55, %v11492_v31  ;;  %v11570_v54 = vmul.f32 %v11492_v31, %v11204_v37  ;;  %v11604_v44 = vadd.f32 %v11603_v33, %v11569_v0  ;;  %11241 = vst [vmem:[%s18060_s8 + $0x88] sm:$0xff] %v11205_v57  ;;  %v11493_v19 = vmul.f32 %v18097_v40, %v11205_v57  ;;  %v14089_v48 = vpop.f32.mrb[20].mxu0 }
 0x4a9   : > { %v18152_v5 = vpop.f32.mrb[27].mxu1  ;;  %v14125_v12 = vadd.f32 %v14089_v48, %v13595_v52  ;;  %v11082_v15 = vpop.f32.mrb[21].mxu0  ;;  %v11573_v11 = vmul.f32 %v11495_v21, %v11207_v28 }
 0x4aa   : > { %v11605_v9 = vadd.f32 %v11604_v44, %v11570_v54  ;;  %v11528_v20 = vadd.f32 %v11527_v26, %v11493_v19  ;;  %v11571_v3 = vmul.f32 %v11493_v19, %v11205_v57  ;;  %v14126_v29 = vadd.f32 %v11082_v15, %v5914_v38  ;;  %v14090_v17 = vpop.f32.mrb[22].mxu0  ;;  %v11439_v31 = vpop.permute.xlu0 %11438 }
 0x4ab   : > { %v11210_v23 = vadd.f32 %v14125_v12, %v18053_v14  ;;  %v14127_v35 = vadd.f32 %v14090_v17, %v13596_v58  ;;  %v11085_v59 = vpop.f32.mrb[23].mxu0 }
 0x4ac   : > { %v11529_v40 = vadd.f32 %v11528_v20, %v11494_v49  ;;  %v11606_v8 = vadd.f32 %v11605_v9, %v11571_v3  ;;  %v11208_v30 = vadd.f32 %v14126_v29, %v18053_v14  ;;  %v14128_v52 = vadd.f32 %v11085_v59, %v5917_v7 }
 0x4ad   : > { %11246 = vst [vmem:[%s18060_s8 + $0xb0] sm:$0xff] %v11210_v23  ;;  %v11211_v38 = vadd.f32 %v14127_v35, %v18053_v14  ;;  %v11498_v50 = vmul.f32 %v18138_v13, %v11210_v23 }
 0x4ae   : > { %v13603_v32 = vpop.f32.mrb[28].mxu1  ;;  %v11607_v4 = vadd.f32 %v11606_v8, %v11572_v25  ;;  %11244 = vst [vmem:[%s18060_s8 + $0xa0] sm:$0xff] %v11208_v30  ;;  %v11496_v58 = vmul.f32 %v18121_v51, %v11208_v30  ;;  %v11530_v53 = vadd.f32 %v11529_v40, %v11495_v21  ;;  %v11209_v36 = vadd.f32 %v14128_v52, %v18053_v14  ;;  %v11444_v21 = vpop.permute.xlu1 %11443 }
 0x4af   : > { %v18165_v46 = vpop.f32.mrb[29].mxu1  ;;  %11247 = vst [vmem:[%s18060_s8 + $0xb8] sm:$0xff] %v11211_v38  ;;  %v11499_v24 = vmul.f32 %v11414_v47, %v11211_v38  ;;  %v11576_v13 = vmul.f32 %v11498_v50, %v11210_v23  ;;  %v11449_v35 = vpop.permute.xlu0 %11448 }
 0x4b0   : > { %v13604_v10 = vpop.f32.mrb[30].mxu1  ;;  %v11531_v60 = vadd.f32 %v11530_v53, %v11496_v58  ;;  %v11574_v56 = vmul.f32 %v11496_v58, %v11208_v30  ;;  %v11608_v42 = vadd.f32 %v11607_v4, %v11573_v11  ;;  %11245 = vst [vmem:[%s18060_s8 + $0xa8] sm:$0xff] %v11209_v36  ;;  %v11497_v62 = vmul.f32 %v18130_v41, %v11209_v36  ;;  %v14093_v63 = vpop.f32.mrb[24].mxu0 }
 0x4b1   : > { %v5949_v7 = vpop.f32.mrb[31].mxu1  ;;  %v14129_v1 = vadd.f32 %v14093_v63, %v13599_v61  ;;  %v11098_v34 = vpop.f32.mrb[25].mxu0  ;;  %v11577_v49 = vmul.f32 %v11499_v24, %v11211_v38 }
 0x4b2   : > { %v11609_v51 = vadd.f32 %v11608_v42, %v11574_v56  ;;  %v11532_v43 = vadd.f32 %v11531_v60, %v11497_v62  ;;  %v11575_v2 = vmul.f32 %v11497_v62, %v11209_v36  ;;  %v14130_v37 = vadd.f32 %v11098_v34, %v5930_v22  ;;  %v14094_v18 = vpop.f32.mrb[26].mxu0  ;;  %v11454_v53 = vpop.permute.xlu1 %11453 }
 0x4b3   : > { %v11214_v0 = vadd.f32 %v14129_v1, %v18053_v14  ;;  %v14131_v28 = vadd.f32 %v14094_v18, %v13600_v39  ;;  %v11101_v33 = vpop.f32.mrb[27].mxu0  ;;  %v11459_v62 = vpop.permute.xlu0 %11458 }
 0x4b4   : > { %v11533_v55 = vadd.f32 %v11532_v43, %v11498_v50  ;;  %v11610_v41 = vadd.f32 %v11609_v51, %v11575_v2  ;;  %v11212_v47 = vadd.f32 %v14130_v37, %v18053_v14  ;;  %v14132_v61 = vadd.f32 %v11101_v33, %v18152_v5 }
 0x4b5   : > { %11250 = vst [vmem:[%s18060_s8 + $0xd0] sm:$0xff] %v11214_v0  ;;  %v11215_v22 = vadd.f32 %v14131_v28, %v18053_v14  ;;  %v11502_v12 = vmul.f32 %v11429_v16, %v11214_v0 }
 0x4b6   : > { %v13607_v57 = vpop.f32.mrb[32].mxu1  ;;  %v11611_v54 = vadd.f32 %v11610_v41, %v11576_v13  ;;  %11248 = vst [vmem:[%s18060_s8 + $0xc0] sm:$0xff] %v11212_v47  ;;  %v11500_v39 = vmul.f32 %v18154_v27, %v11212_v47  ;;  %v11534_v44 = vadd.f32 %v11533_v55, %v11499_v24  ;;  %v11213_v19 = vadd.f32 %v14132_v61, %v18053_v14  ;;  %v11464_v28 = vpop.permute.xlu1 %11463 }
 0x4b7   : > { %v5962_v26 = vpop.f32.mrb[33].mxu1  ;;  %11251 = vst [vmem:[%s18060_s8 + $0xd8] sm:$0xff] %v11215_v22  ;;  %v11503_v17 = vmul.f32 %v11434_v45, %v11215_v22  ;;  %v11580_v52 = vmul.f32 %v11502_v12, %v11214_v0 }
 0x4b8   : > { %v13608_v48 = vpop.f32.mrb[34].mxu1  ;;  %v11535_v5 = vadd.f32 %v11534_v44, %v11500_v39  ;;  %v11578_v9 = vmul.f32 %v11500_v39, %v11212_v47  ;;  %v11612_v20 = vadd.f32 %v11611_v54, %v11577_v49  ;;  %11249 = vst [vmem:[%s18060_s8 + $0xc8] sm:$0xff] %v11213_v19  ;;  %v11501_v3 = vmul.f32 %v18159_v6, %v11213_v19  ;;  %v14097_v29 = vpop.f32.mrb[28].mxu0 }
 0x4b9   : > { %v5965_v15 = vpop.f32.mrb[35].mxu1  ;;  %v14133_v25 = vadd.f32 %v14097_v29, %v13603_v32  ;;  %v11114_v23 = vpop.f32.mrb[29].mxu0  ;;  %v11581_v36 = vmul.f32 %v11503_v17, %v11215_v22 }
 0x4ba   : > { %v11613_v27 = vadd.f32 %v11612_v20, %v11578_v9  ;;  %v11536_v59 = vadd.f32 %v11535_v5, %v11501_v3  ;;  %v11579_v40 = vmul.f32 %v11501_v3, %v11213_v19  ;;  %v14134_v8 = vadd.f32 %v11114_v23, %v18165_v46  ;;  %v14098_v30 = vpop.f32.mrb[30].mxu0 }
 0x4bb   : > { %v11218_v11 = vadd.f32 %v14133_v25, %v18053_v14  ;;  %v14135_v38 = vadd.f32 %v14098_v30, %v13604_v10  ;;  %v11117_v16 = vpop.f32.mrb[31].mxu0 }
 0x4bc   : > { %v11537_v6 = vadd.f32 %v11536_v59, %v11502_v12  ;;  %v11614_v4 = vadd.f32 %v11613_v27, %v11579_v40  ;;  %v11216_v32 = vadd.f32 %v14134_v8, %v18053_v14  ;;  %v14136_v58 = vadd.f32 %v11117_v16, %v5949_v7 }
 0x4bd   : > { %11254 = vst [vmem:[%s18060_s8 + $0xf0] sm:$0xff] %v11218_v11  ;;  %v11219_v50 = vadd.f32 %v14135_v38, %v18053_v14  ;;  %v11506_v10 = vmul.f32 %v11449_v35, %v11218_v11 }
 0x4be   : > { %v11615_v60 = vadd.f32 %v11614_v4, %v11580_v52  ;;  %11252 = vst [vmem:[%s18060_s8 + $0xe0] sm:$0xff] %v11216_v32  ;;  %v11504_v46 = vmul.f32 %v11439_v31, %v11216_v32  ;;  %v11538_v56 = vadd.f32 %v11537_v6, %v11503_v17  ;;  %v11217_v42 = vadd.f32 %v14136_v58, %v18053_v14 }
 0x4bf   : > { %11255 = vst [vmem:[%s18060_s8 + $0xf8] sm:$0xff] %v11219_v50  ;;  %v11507_v34 = vmul.f32 %v11454_v53, %v11219_v50  ;;  %v11584_v33 = vmul.f32 %v11506_v10, %v11218_v11 }
 0x4c0   : > { %v11539_v63 = vadd.f32 %v11538_v56, %v11504_v46  ;;  %v11582_v45 = vmul.f32 %v11504_v46, %v11216_v32  ;;  %v11616_v24 = vadd.f32 %v11615_v60, %v11581_v36  ;;  %11253 = vst [vmem:[%s18060_s8 + $0xe8] sm:$0xff] %v11217_v42  ;;  %v11505_v7 = vmul.f32 %v11444_v21, %v11217_v42  ;;  %v14101_v1 = vpop.f32.mrb[32].mxu0 }
 0x4c1   : > { %v14137_v51 = vadd.f32 %v14101_v1, %v13607_v57  ;;  %v11130_v43 = vpop.f32.mrb[33].mxu0  ;;  %v11585_v22 = vmul.f32 %v11507_v34, %v11219_v50 }
 0x4c2   : > { %v11617_v2 = vadd.f32 %v11616_v24, %v11582_v45  ;;  %v11540_v37 = vadd.f32 %v11539_v63, %v11505_v7  ;;  %v11583_v18 = vmul.f32 %v11505_v7, %v11217_v42  ;;  %v14138_v13 = vadd.f32 %v11130_v43, %v5962_v26  ;;  %v14102_v0 = vpop.f32.mrb[34].mxu0  ;;  %v11469_v26 = vpop.permute.xlu0 %11468 }
 0x4c3   : > { %v11222_v31 = vadd.f32 %v14137_v51, %v18053_v14  ;;  %v14139_v55 = vadd.f32 %v14102_v0, %v13608_v48  ;;  %v11133_v41 = vpop.f32.mrb[35].mxu0 }
 0x4c4   : > { %v11541_v47 = vadd.f32 %v11540_v37, %v11506_v10  ;;  %v11618_v61 = vadd.f32 %v11617_v2, %v11583_v18  ;;  %v11220_v49 = vadd.f32 %v14138_v13, %v18053_v14  ;;  %v14140_v57 = vadd.f32 %v11133_v41, %v5965_v15  ;;  %v11474_v15 = vpop.permute.xlu1 %11473 }
 0x4c5   : > { %11258 = vst [vmem:[%s18060_s8 + $0x110] sm:$0xff] %v11222_v31  ;;  %v11223_v54 = vadd.f32 %v14139_v55, %v18053_v14  ;;  %v11510_v48 = vmul.f32 %v11469_v26, %v11222_v31 }
 0x4c6   : > { %v11619_v39 = vadd.f32 %v11618_v61, %v11584_v33  ;;  %11256 = vst [vmem:[%s18060_s8 + $0x100] sm:$0xff] %v11220_v49  ;;  %v11508_v44 = vmul.f32 %v11459_v62, %v11220_v49  ;;  %v11542_v19 = vadd.f32 %v11541_v47, %v11507_v34  ;;  %v11221_v21 = vadd.f32 %v14140_v57, %v18053_v14 }
 0x4c7   : > { %11259 = vst [vmem:[%s18060_s8 + $0x118] sm:$0xff] %v11223_v54  ;;  %v11511_v29 = vmul.f32 %v11474_v15, %v11223_v54  ;;  %v11588_v23 = vmul.f32 %v11510_v48, %v11222_v31 }
 0x4c8   : > { %v11543_v12 = vadd.f32 %v11542_v19, %v11508_v44  ;;  %v11586_v5 = vmul.f32 %v11508_v44, %v11220_v49  ;;  %v11620_v9 = vadd.f32 %v11619_v39, %v11585_v22  ;;  %11257 = vst [vmem:[%s18060_s8 + $0x108] sm:$0xff] %v11221_v21  ;;  %v11509_v20 = vmul.f32 %v11464_v28, %v11221_v21 }
 0x4c9   : > { %v11589_v59 = vmul.f32 %v11511_v29, %v11223_v54 }
 0x4ca   : > { %v11621_v3 = vadd.f32 %v11620_v9, %v11586_v5  ;;  %v11544_v17 = vadd.f32 %v11543_v12, %v11509_v20  ;;  %v11587_v25 = vmul.f32 %v11509_v20, %v11221_v21 }
 0x4cc   : > { %v11545_v35 = vadd.f32 %v11544_v17, %v11510_v48  ;;  %v11622_v27 = vadd.f32 %v11621_v3, %v11587_v25 }
 0x4ce   : > { %v11546_v40 = vadd.f32 %v11545_v35, %v11511_v29  ;;  %v11623_v14 = vadd.f32 %v11622_v27, %v11588_v23 }
 0x4d0   : > { %v11547_v8 = vrot.slane %v11546_v40, 4  ;;  %v11624_v30 = vadd.f32 %v11623_v14, %v11589_v59 }
 0x4d2   : > { %v11548_v52 = vadd.f32 %v11547_v8, %v11546_v40  ;;  %v11625_v11 = vrot.slane %v11624_v30, 4 }
 0x4d4   : > { %v11549_v38 = vrot.slane %v11548_v52, 2  ;;  %v11626_v16 = vadd.f32 %v11625_v11, %v11624_v30 }
 0x4d6   : > { %v11550_v6 = vadd.f32 %v11549_v38, %v11548_v52  ;;  %v11627_v4 = vrot.slane %v11626_v16, 2 }
 0x4d8   : > { %v11551_v32 = vrot.slane %v11550_v6, 1  ;;  %v11628_v58 = vadd.f32 %v11627_v4, %v11626_v16 }
 0x4da   : > { %v11552_v53 = vadd.f32 %v11551_v32, %v11550_v6  ;;  %v11629_v36 = vrot.slane %v11628_v58, 1 }
 0x4dc   : > { %11553 = vst [vmem:[%s417_s9] sm:$0x1] %v11552_v53  ;;  %v11630_v50 = vadd.f32 %v11629_v36, %v11628_v58 }
 0x4de   : > { %11631 = vst [vmem:[%s417_s9 + $0x1] sm:$0x1] %v11630_v50 }
 0x4df PF: > { %s18_s28 = sadd.s32 1, %s15430_s28   ;;  %s18230_s24 = smov %s15422_s26 }
 0x4e0   : > { %p15_p10 = scmp.ge.s32.totalorder %s18_s28, 34   ;;  %s18231_s25 = smov %s15426_s27 }
 0x4e1   : > { %s18232_s26 = smov %s18235_s29  ;;  %s18233_s27 = smov %s18239_s30 }
 0x4e2   :  { %17 = sbr.rel (!%p15_p10) target bundleno = 3 (0x3), region = 118 }

</bundles_post_ra>
